<compile_context>
chip_gen: v7x
topology: tpu7x:2x2x1
jax: 0.10.0
libtpu: 0.0.40
codegen_flags: <defaults>
</compile_context>

<pallas_src>
import functools

import jax
import jax.numpy as jnp
import numpy as np
from jax import lax
from jax.experimental import pallas as pl
from jax.experimental.pallas import tpu as pltpu


def _self_attention_kernel(x_ref, wqkv_ref, bqkv_ref, wo_ref, bo_ref,
                           gamma_ref, beta_ref, gmat_ref, o_ref,
                           q_s, kt_s, v_s, y_s, s1_s,
                           *, num_heads, d_keys, num_groups, eps, block_q,
                           exp_dtype):
    qi = pl.program_id(1)
    nq = pl.num_programs(1)
    E, S = v_s.shape
    tq = block_q

    # ---- per-batch prologue: fused QKV projection, all channel-major --------
    @pl.when(qi == 0)
    def _prologue():
        x_bf = x_ref[...].astype(jnp.bfloat16)                         # (C, S)
        qkv = jnp.dot(wqkv_ref[...], x_bf,
                      preferred_element_type=jnp.float32) + bqkv_ref[...]  # (3E, S)
        scale = d_keys ** -0.5
        q_s[...] = (qkv[:E, :] * scale).astype(jnp.bfloat16)           # (E, S)
        # Single per-batch transpose: K to token-major so the scores matmul
        # has its contraction dim (dk) on the lane axis of the LHS.
        kt_s[...] = jnp.transpose(qkv[E:2 * E, :]).astype(jnp.bfloat16)  # (S, E)
        v_s[...] = qkv[2 * E:, :].astype(jnp.bfloat16)                 # (E, S)
        s1_s[...] = jnp.zeros_like(s1_s)

    # ---- attention for this query tile (per-head, channel-major output) -----
    row0 = pl.multiple_of(qi * tq, tq)

    head_outs = []
    for h in range(num_heads):
        q_t = q_s[pl.ds(h * d_keys, d_keys), pl.ds(row0, tq)]          # (dk, Tq)
        k_t = kt_s[:, pl.ds(h * d_keys, d_keys)]                       # (S, dk)
        v_h = v_s[pl.ds(h * d_keys, d_keys), :]                        # (dk, S)

        # scores^T: (S, dk) @ (dk, Tq) -> (S, Tq); softmax along sublane axis.
        sc_t = jnp.dot(k_t, q_t, preferred_element_type=jnp.float32)
        m = jnp.max(sc_t, axis=0, keepdims=True)                       # (1, Tq)
        p = jnp.exp((sc_t - m).astype(exp_dtype))                      # (S, Tq)
        rs = jnp.sum(p.astype(jnp.float32), axis=0, keepdims=True)     # (1, Tq)

        # pv in channel-major: (dk, S) @ (S, Tq) -> (dk, Tq); normalize after.
        pv = jnp.dot(v_h, p.astype(jnp.bfloat16),
                     preferred_element_type=jnp.float32)
        inv = 1.0 / rs                                                 # exact
        head_outs.append((pv * inv).astype(jnp.bfloat16))

    attn_cs = jnp.concatenate(head_outs, axis=0)                       # (E, Tq)

    # ---- output projection + residual, channel-major ------------------------
    y_t = jnp.dot(wo_ref[...], attn_cs, preferred_element_type=jnp.float32)
    y_t = y_t + bo_ref[...] + x_ref[:, pl.ds(row0, tq)]                # (E, Tq)
    y_s[:, pl.ds(row0, tq)] = y_t
    s1_s[...] += jnp.sum(y_t, axis=1, keepdims=True)                   # (E, 1)

    # ---- per-batch epilogue: exact two-pass GroupNorm, channel-major store --
    @pl.when(qi == nq - 1)
    def _epilogue():
        cpg = E // num_groups
        n_inv = 1.0 / float(cpg * S)
        # gmat[i,j] = 1 iff channels i,j share a group -> gmat @ v gives the
        # per-channel copy of that channel's group sum.
        mean_c = jnp.dot(gmat_ref[...], s1_s[...],
                         preferred_element_type=jnp.float32) * n_inv   # (E, 1)
        d = y_s[...] - mean_c                                          # (E, S)
        ssq = jnp.sum(d * d, axis=1, keepdims=True)                    # (E, 1)
        var_c = jnp.dot(gmat_ref[...], ssq,
                        preferred_element_type=jnp.float32) * n_inv
        inv_std = lax.rsqrt(var_c + eps)
        o_ref[...] = d * inv_std * gamma_ref[...] + beta_ref[...]


def self_attention_block(x_nchw, params, *, num_heads, num_groups,
                         eps=1e-5, block_q=None, exp_dtype=None):
    B, C, H, W = x_nchw.shape
    S = H * W
    E = params["wq"].shape[1]
    assert C == E, "residual add requires in_channels == embedding_dim"
    assert E % num_heads == 0 and E % num_groups == 0
    d_keys = E // num_heads

    tq = int(block_q) if block_q is not None else min(256, S)
    assert S % tq == 0, "block_q must divide H*W"
    assert tq % 128 == 0 or tq == S, "block_q must be a multiple of 128 (or == H*W)"
    nq = S // tq

    # bf16 exp only where the EUP/VPU have bf16 paths (v6e / v7x).
    if exp_dtype is None:
        try:
            kind = jax.devices()[0].device_kind.lower()
        except Exception:
            kind = ""
        exp_dtype = jnp.bfloat16 if ("v6" in kind or "v7" in kind) else jnp.float32

    # NCHW -> (B, C, S): free reshape, kernel is channel-major end to end.
    x_cs = x_nchw.reshape(B, C, S).astype(jnp.float32)

    # Transposed (channel-major) weights as bf16 MXU operands; biases/affine
    # as (E,1) columns so they broadcast along the lane (sequence) axis.
    wqkv_t = jnp.concatenate([params["wq"], params["wk"], params["wv"]],
                             axis=1).T.astype(jnp.bfloat16)            # (3E, C)
    bqkv = jnp.concatenate([params["bq"], params["bk"], params["bv"]],
                           axis=1).reshape(3 * E, 1).astype(jnp.float32)
    wo_t = params["wo"].T.astype(jnp.bfloat16)                          # (E, E)
    bo = params["bo"].reshape(E, 1).astype(jnp.float32)
    gamma = params["gamma"].reshape(E, 1).astype(jnp.float32)
    beta = params["beta"].reshape(E, 1).astype(jnp.float32)

    # Same-group indicator matrix for GroupNorm reductions (channel-major).
    gidx = jnp.arange(E) // (E // num_groups)
    gmat = (gidx[:, None] == gidx[None, :]).astype(jnp.float32)          # (E, E)

    # VMEM budget from the chosen tiles, capped at 80% of physical VMEM.
    est = 0
    est += 2 * (C * S + E * S) * 4                      # x / out blocks (dbl-buffered)
    est += 2 * (3 * E * C + E * E) * 2                  # bf16 weights (dbl-buffered)
    est += 2 * (E * E * 4 + 6 * E * 128 * 4)            # gmat + lane-padded vectors
    est += 3 * E * S * 2 + E * S * 4 + E * 128 * 4      # q/kT/v + y + s1 scratch
    est += 3 * E * S * 4                                # prologue qkv transient (f32)
    est += 2 * num_heads * S * tq * 4 + 4 * E * tq * 4  # score/prob + tile transients
    try:
        phys = pltpu.get_tpu_info().vmem_capacity_bytes
    except Exception:
        phys = 64 << 20
    vmem_limit = int(min(max(est * 3 // 2, 32 << 20), int(phys * 0.8)))

    kernel = functools.partial(
        _self_attention_kernel, num_heads=num_heads, d_keys=d_keys,
        num_groups=num_groups, eps=eps, block_q=tq, exp_dtype=exp_dtype)

    def const_spec(shape):
        return pl.BlockSpec(shape, lambda b, q: tuple(0 for _ in shape))

    out_cs = pl.pallas_call(
        kernel,
        out_shape=jax.ShapeDtypeStruct((B, E, S), jnp.float32),
        grid=(B, nq),
        in_specs=[
            pl.BlockSpec((None, C, S), lambda b, q: (b, 0, 0)),   # x, channel-major
            const_spec((3 * E, C)),                               # Wqkv^T (bf16)
            const_spec((3 * E, 1)),                               # bqkv
            const_spec((E, E)),                                   # Wo^T (bf16)
            const_spec((E, 1)),                                   # bo
            const_spec((E, 1)),                                   # gamma
            const_spec((E, 1)),                                   # beta
            const_spec((E, E)),                                   # group indicator
        ],
        out_specs=pl.BlockSpec((None, E, S), lambda b, q: (b, 0, 0)),
        scratch_shapes=[
            pltpu.VMEM((E, S), jnp.bfloat16),   # Q, channel-major, pre-scaled
            pltpu.VMEM((S, E), jnp.bfloat16),   # K^T, token-major
            pltpu.VMEM((E, S), jnp.bfloat16),   # V, channel-major
            pltpu.VMEM((E, S), jnp.float32),    # pre-norm y (post-residual)
            pltpu.VMEM((E, 1), jnp.float32),    # per-channel sum of y
        ],
        compiler_params=pltpu.CompilerParams(
            dimension_semantics=("parallel", "arbitrary"),
            vmem_limit_bytes=vmem_limit),
    )(x_cs, wqkv_t, bqkv, wo_t, bo, gamma, beta, gmat)

    return out_cs.reshape(B, E, H, W)


def reference(x_nchw, params, *, num_heads, num_groups, eps=1e-5):
    """Pure-JAX (f32) re-implementation of the PyTorch forward for validation."""
    B, C, H, W = x_nchw.shape
    S = H * W
    E = params["wq"].shape[1]
    dk = E // num_heads
    x = jnp.transpose(x_nchw.reshape(B, C, S), (0, 2, 1))
    q = x @ params["wq"] + params["bq"]
    k = x @ params["wk"] + params["bk"]
    v = x @ params["wv"] + params["bv"]
    split = lambda t: jnp.transpose(t.reshape(B, S, num_heads, dk), (0, 2, 1, 3))
    q, k, v = split(q), split(k), split(v)
    scores = jax.nn.softmax(
        jnp.einsum("bhqd,bhkd->bhqk", q, k) * dk ** -0.5, axis=-1)
    attn = jnp.einsum("bhqk,bhkd->bhqd", scores, v)
    attn = jnp.transpose(attn, (0, 2, 1, 3)).reshape(B, S, E)
    y = attn @ params["wo"] + params["bo"]
    y = jnp.transpose(y, (0, 2, 1)).reshape(B, E, H, W) + x_nchw
    yg = y.reshape(B, num_groups, E // num_groups, H, W)
    mean = yg.mean(axis=(2, 3, 4), keepdims=True)
    var = yg.var(axis=(2, 3, 4), keepdims=True)
    yn = ((yg - mean) / jnp.sqrt(var + eps)).reshape(B, E, H, W)
    return (yn * params["gamma"].reshape(1, E, 1, 1)
            + params["beta"].reshape(1, E, 1, 1))


if __name__ == "__main__":
    # Module defaults (num_heads=4, num_groups=32) imply embedding_dim % 32 == 0
    # and in_channels == embedding_dim for the residual; E = 128 keeps the
    # channel (sublane) axis a full tile.
    B, C, H, W = 2, 128, 16, 16
    E, num_heads, num_groups = 128, 4, 32

    key = jax.random.PRNGKey(0)
    ks = jax.random.split(key, 12)

    def lin_init(kw, kb, fan_in, fan_out):
        lim = fan_in ** -0.5
        w = jax.random.uniform(kw, (fan_in, fan_out), jnp.float32, -lim, lim)
        b = jax.random.uniform(kb, (1, fan_out), jnp.float32, -lim, lim)
        return w, b

    wq, bq = lin_init(ks[0], ks[1], C, E)
    wk, bk = lin_init(ks[2], ks[3], C, E)
    wv, bv = lin_init(ks[4], ks[5], C, E)
    wo, bo = lin_init(ks[6], ks[7], E, E)
    gamma = 1.0 + 0.1 * jax.random.normal(ks[8], (1, E), jnp.float32)
    beta = 0.1 * jax.random.normal(ks[9], (1, E), jnp.float32)
    params = dict(wq=wq, bq=bq, wk=wk, bk=bk, wv=wv, bv=bv,
                  wo=wo, bo=bo, gamma=gamma, beta=beta)

    x = jax.random.normal(ks[10], (B, C, H, W), jnp.float32)

    out = self_attention_block(x, params, num_heads=num_heads,
                               num_groups=num_groups, block_q=128)
    out = jax.block_until_ready(out)

    ref = reference(x, params, num_heads=num_heads, num_groups=num_groups)
    # bf16 MXU operands (and bf16 exp on v6e/v7x) -> allow a few e-2 of drift.
    np.testing.assert_allclose(np.asarray(out), np.asarray(ref),
                               rtol=3e-2, atol=3e-2)
    print("KERNEL_OK")
</pallas_src>

<mosaic_0001>
module attributes {stable_mosaic.version = 11 : i64} {
  func.func @_self_attention_kernel(%arg0: i32, %arg1: i32, %arg2: memref<1x128x256xf32, #tpu.memory_space<vmem>>, %arg3: memref<384x128xbf16, #tpu.memory_space<vmem>>, %arg4: memref<384x1xf32, #tpu.memory_space<vmem>>, %arg5: memref<128x128xbf16, #tpu.memory_space<vmem>>, %arg6: memref<128x1xf32, #tpu.memory_space<vmem>>, %arg7: memref<128x1xf32, #tpu.memory_space<vmem>>, %arg8: memref<128x1xf32, #tpu.memory_space<vmem>>, %arg9: memref<128x128xf32, #tpu.memory_space<vmem>>, %arg10: memref<1x128x256xf32, #tpu.memory_space<vmem>>, %arg11: memref<128x256xbf16, #tpu.memory_space<vmem>>, %arg12: memref<256x128xbf16, #tpu.memory_space<vmem>>, %arg13: memref<128x256xbf16, #tpu.memory_space<vmem>>, %arg14: memref<128x256xf32, #tpu.memory_space<vmem>>, %arg15: memref<128x1xf32, #tpu.memory_space<vmem>>) attributes {dimension_semantics = [#tpu.dimension_semantics<parallel>, #tpu.dimension_semantics<arbitrary>], iteration_bounds = array<i64: 2, 2>, scalar_prefetch = 0 : i64, scratch_operands = 5 : i64, tpu.core_type = #tpu.core_type<tc>, window_params = [{transform_indices = @transform_0, window_bounds = array<i64: 1, 128, 256>}, {pipeline_mode = #tpu.pipeline_mode<synchronous>, transform_indices = @transform_1, window_bounds = array<i64: 384, 128>}, {pipeline_mode = #tpu.pipeline_mode<synchronous>, transform_indices = @transform_2, window_bounds = array<i64: 384, 1>}, {pipeline_mode = #tpu.pipeline_mode<synchronous>, transform_indices = @transform_3, window_bounds = array<i64: 128, 128>}, {pipeline_mode = #tpu.pipeline_mode<synchronous>, transform_indices = @transform_4, window_bounds = array<i64: 128, 1>}, {pipeline_mode = #tpu.pipeline_mode<synchronous>, transform_indices = @transform_5, window_bounds = array<i64: 128, 1>}, {pipeline_mode = #tpu.pipeline_mode<synchronous>, transform_indices = @transform_6, window_bounds = array<i64: 128, 1>}, {pipeline_mode = #tpu.pipeline_mode<synchronous>, transform_indices = @transform_7, window_bounds = array<i64: 128, 128>}, {transform_indices = @transform_8, window_bounds = array<i64: 1, 128, 256>}]} {
    %c0_i32 = arith.constant 0 : i32
    %0 = arith.cmpi eq, %arg1, %c0_i32 : i32
    %1 = arith.extui %0 : i1 to i32
    %c0_i32_0 = arith.constant 0 : i32
    %2 = arith.cmpi ne, %1, %c0_i32_0 : i32
    scf.if %2 {
      %c0_50 = arith.constant 0 : index
      %c0_51 = arith.constant 0 : index
      %c0_52 = arith.constant 0 : index
      %101 = vector.load %arg2[%c0_50, %c0_51, %c0_52] : memref<1x128x256xf32, #tpu.memory_space<vmem>>, vector<1x128x256xf32>
      %102 = vector.shape_cast %101 : vector<1x128x256xf32> to vector<128x256xf32>
      %103 = arith.truncf %102 : vector<128x256xf32> to vector<128x256xbf16>
      %c0_53 = arith.constant 0 : index
      %c0_54 = arith.constant 0 : index
      %104 = vector.load %arg3[%c0_53, %c0_54] : memref<384x128xbf16, #tpu.memory_space<vmem>>, vector<384x128xbf16>
      %cst_55 = arith.constant dense<0.000000e+00> : vector<384x256xf32>
      %105 = tpu.matmul %104, %103, %cst_55 {dimension_numbers = #tpu.dot_dimension_numbers<[1], [0], [0], [1], [0, 0, 1, 1], [], []>} : vector<384x128xbf16>, vector<128x256xbf16>, vector<384x256xf32> -> vector<384x256xf32>
      %c0_56 = arith.constant 0 : index
      %c0_57 = arith.constant 0 : index
      %106 = vector.load %arg4[%c0_56, %c0_57] : memref<384x1xf32, #tpu.memory_space<vmem>>, vector<384x1xf32>
      %107 = vector.broadcast %106 : vector<384x1xf32> to vector<384x256xf32>
      %108 = arith.addf %105, %107 : vector<384x256xf32>
      %109 = vector.extract_strided_slice %108 {offsets = [0, 0], sizes = [128, 256], strides = [1, 1]} : vector<384x256xf32> to vector<128x256xf32>
      %cst_58 = arith.constant 0.176776692 : f32
      %110 = vector.broadcast %cst_58 : f32 to vector<128x256xf32>
      %111 = arith.mulf %109, %110 : vector<128x256xf32>
      %112 = arith.truncf %111 : vector<128x256xf32> to vector<128x256xbf16>
      %c0_59 = arith.constant 0 : index
      %c0_60 = arith.constant 0 : index
      %113 = vector.load %arg11[%c0_59, %c0_60] : memref<128x256xbf16, #tpu.memory_space<vmem>>, vector<128x256xbf16>
      tpu.vector_store %arg11[%c0_59, %c0_60], %112 {strides = array<i32>} : memref<128x256xbf16, #tpu.memory_space<vmem>>, vector<128x256xbf16>,
      %114 = vector.extract_strided_slice %108 {offsets = [128, 0], sizes = [128, 256], strides = [1, 1]} : vector<384x256xf32> to vector<128x256xf32>
      %115 = tpu.transpose %114, [1, 0] : vector<128x256xf32> -> vector<256x128xf32>
      %116 = arith.truncf %115 : vector<256x128xf32> to vector<256x128xbf16>
      %c0_61 = arith.constant 0 : index
      %c0_62 = arith.constant 0 : index
      %117 = vector.load %arg12[%c0_61, %c0_62] : memref<256x128xbf16, #tpu.memory_space<vmem>>, vector<256x128xbf16>
      tpu.vector_store %arg12[%c0_61, %c0_62], %116 {strides = array<i32>} : memref<256x128xbf16, #tpu.memory_space<vmem>>, vector<256x128xbf16>,
      %118 = vector.extract_strided_slice %108 {offsets = [256, 0], sizes = [128, 256], strides = [1, 1]} : vector<384x256xf32> to vector<128x256xf32>
      %119 = arith.truncf %118 : vector<128x256xf32> to vector<128x256xbf16>
      %c0_63 = arith.constant 0 : index
      %c0_64 = arith.constant 0 : index
      %120 = vector.load %arg13[%c0_63, %c0_64] : memref<128x256xbf16, #tpu.memory_space<vmem>>, vector<128x256xbf16>
      tpu.vector_store %arg13[%c0_63, %c0_64], %119 {strides = array<i32>} : memref<128x256xbf16, #tpu.memory_space<vmem>>, vector<128x256xbf16>,
      %cst_65 = arith.constant 0.000000e+00 : f32
      %121 = vector.broadcast %cst_65 : f32 to vector<128x1xf32>
      %c0_66 = arith.constant 0 : index
      %c0_67 = arith.constant 0 : index
      %122 = vector.load %arg15[%c0_66, %c0_67] : memref<128x1xf32, #tpu.memory_space<vmem>>, vector<128x1xf32>
      tpu.vector_store %arg15[%c0_66, %c0_67], %121 {strides = array<i32>} : memref<128x1xf32, #tpu.memory_space<vmem>>, vector<128x1xf32>,
    } else {
    }
    %c128_i32 = arith.constant 128 : i32
    %3 = arith.muli %arg1, %c128_i32 : i32
    %4 = tpu.assume_multiple %3, 128 : i32
    %c0 = arith.constant 0 : index
    %5 = arith.index_cast %4 : i32 to index
    %6 = vector.load %arg11[%c0, %5] : memref<128x256xbf16, #tpu.memory_space<vmem>>, vector<32x128xbf16>
    %c0_1 = arith.constant 0 : index
    %c0_2 = arith.constant 0 : index
    %7 = vector.load %arg12[%c0_1, %c0_2] : memref<256x128xbf16, #tpu.memory_space<vmem>>, vector<256x32xbf16>
    %c0_3 = arith.constant 0 : index
    %c0_4 = arith.constant 0 : index
    %8 = vector.load %arg13[%c0_3, %c0_4] : memref<128x256xbf16, #tpu.memory_space<vmem>>, vector<32x256xbf16>
    %cst = arith.constant dense<0.000000e+00> : vector<256x128xf32>
    %9 = tpu.matmul %7, %6, %cst {dimension_numbers = #tpu.dot_dimension_numbers<[1], [0], [0], [1], [0, 0, 1, 1], [], []>} : vector<256x32xbf16>, vector<32x128xbf16>, vector<256x128xf32> -> vector<256x128xf32>
    %cst_5 = arith.constant dense<0xFF800000> : vector<128xf32>
    %10 = vector.multi_reduction <maximumf>, %9, %cst_5 [0] : vector<256x128xf32> to vector<128xf32>
    %11 = vector.shape_cast %10 : vector<128xf32> to vector<1x128xf32>
    %12 = vector.broadcast %11 : vector<1x128xf32> to vector<256x128xf32>
    %13 = arith.subf %9, %12 : vector<256x128xf32>
    %14 = math.exp %13 : vector<256x128xf32>
    %cst_6 = arith.constant dense<0.000000e+00> : vector<128xf32>
    %15 = vector.multi_reduction <add>, %14, %cst_6 [0] : vector<256x128xf32> to vector<128xf32>
    %16 = vector.shape_cast %15 : vector<128xf32> to vector<1x128xf32>
    %17 = arith.truncf %14 : vector<256x128xf32> to vector<256x128xbf16>
    %cst_7 = arith.constant dense<0.000000e+00> : vector<32x128xf32>
    %18 = tpu.matmul %8, %17, %cst_7 {dimension_numbers = #tpu.dot_dimension_numbers<[1], [0], [0], [1], [0, 0, 1, 1], [], []>} : vector<32x256xbf16>, vector<256x128xbf16>, vector<32x128xf32> -> vector<32x128xf32>
    %cst_8 = arith.constant 1.000000e+00 : f32
    %19 = vector.broadcast %cst_8 : f32 to vector<1x128xf32>
    %20 = arith.divf %19, %16 : vector<1x128xf32>
    %21 = vector.broadcast %20 : vector<1x128xf32> to vector<32x128xf32>
    %22 = arith.mulf %18, %21 : vector<32x128xf32>
    %23 = arith.truncf %22 : vector<32x128xf32> to vector<32x128xbf16>
    %c32 = arith.constant 32 : index
    %24 = arith.index_cast %4 : i32 to index
    %25 = vector.load %arg11[%c32, %24] : memref<128x256xbf16, #tpu.memory_space<vmem>>, vector<32x128xbf16>
    %c0_9 = arith.constant 0 : index
    %c32_10 = arith.constant 32 : index
    %26 = vector.load %arg12[%c0_9, %c32_10] : memref<256x128xbf16, #tpu.memory_space<vmem>>, vector<256x32xbf16>
    %c32_11 = arith.constant 32 : index
    %c0_12 = arith.constant 0 : index
    %27 = vector.load %arg13[%c32_11, %c0_12] : memref<128x256xbf16, #tpu.memory_space<vmem>>, vector<32x256xbf16>
    %cst_13 = arith.constant dense<0.000000e+00> : vector<256x128xf32>
    %28 = tpu.matmul %26, %25, %cst_13 {dimension_numbers = #tpu.dot_dimension_numbers<[1], [0], [0], [1], [0, 0, 1, 1], [], []>} : vector<256x32xbf16>, vector<32x128xbf16>, vector<256x128xf32> -> vector<256x128xf32>
    %cst_14 = arith.constant dense<0xFF800000> : vector<128xf32>
    %29 = vector.multi_reduction <maximumf>, %28, %cst_14 [0] : vector<256x128xf32> to vector<128xf32>
    %30 = vector.shape_cast %29 : vector<128xf32> to vector<1x128xf32>
    %31 = vector.broadcast %30 : vector<1x128xf32> to vector<256x128xf32>
    %32 = arith.subf %28, %31 : vector<256x128xf32>
    %33 = math.exp %32 : vector<256x128xf32>
    %cst_15 = arith.constant dense<0.000000e+00> : vector<128xf32>
    %34 = vector.multi_reduction <add>, %33, %cst_15 [0] : vector<256x128xf32> to vector<128xf32>
    %35 = vector.shape_cast %34 : vector<128xf32> to vector<1x128xf32>
    %36 = arith.truncf %33 : vector<256x128xf32> to vector<256x128xbf16>
    %cst_16 = arith.constant dense<0.000000e+00> : vector<32x128xf32>
    %37 = tpu.matmul %27, %36, %cst_16 {dimension_numbers = #tpu.dot_dimension_numbers<[1], [0], [0], [1], [0, 0, 1, 1], [], []>} : vector<32x256xbf16>, vector<256x128xbf16>, vector<32x128xf32> -> vector<32x128xf32>
    %cst_17 = arith.constant 1.000000e+00 : f32
    %38 = vector.broadcast %cst_17 : f32 to vector<1x128xf32>
    %39 = arith.divf %38, %35 : vector<1x128xf32>
    %40 = vector.broadcast %39 : vector<1x128xf32> to vector<32x128xf32>
    %41 = arith.mulf %37, %40 : vector<32x128xf32>
    %42 = arith.truncf %41 : vector<32x128xf32> to vector<32x128xbf16>
    %c64 = arith.constant 64 : index
    %43 = arith.index_cast %4 : i32 to index
    %44 = vector.load %arg11[%c64, %43] : memref<128x256xbf16, #tpu.memory_space<vmem>>, vector<32x128xbf16>
    %c0_18 = arith.constant 0 : index
    %c64_19 = arith.constant 64 : index
    %45 = vector.load %arg12[%c0_18, %c64_19] : memref<256x128xbf16, #tpu.memory_space<vmem>>, vector<256x32xbf16>
    %c64_20 = arith.constant 64 : index
    %c0_21 = arith.constant 0 : index
    %46 = vector.load %arg13[%c64_20, %c0_21] : memref<128x256xbf16, #tpu.memory_space<vmem>>, vector<32x256xbf16>
    %cst_22 = arith.constant dense<0.000000e+00> : vector<256x128xf32>
    %47 = tpu.matmul %45, %44, %cst_22 {dimension_numbers = #tpu.dot_dimension_numbers<[1], [0], [0], [1], [0, 0, 1, 1], [], []>} : vector<256x32xbf16>, vector<32x128xbf16>, vector<256x128xf32> -> vector<256x128xf32>
    %cst_23 = arith.constant dense<0xFF800000> : vector<128xf32>
    %48 = vector.multi_reduction <maximumf>, %47, %cst_23 [0] : vector<256x128xf32> to vector<128xf32>
    %49 = vector.shape_cast %48 : vector<128xf32> to vector<1x128xf32>
    %50 = vector.broadcast %49 : vector<1x128xf32> to vector<256x128xf32>
    %51 = arith.subf %47, %50 : vector<256x128xf32>
    %52 = math.exp %51 : vector<256x128xf32>
    %cst_24 = arith.constant dense<0.000000e+00> : vector<128xf32>
    %53 = vector.multi_reduction <add>, %52, %cst_24 [0] : vector<256x128xf32> to vector<128xf32>
    %54 = vector.shape_cast %53 : vector<128xf32> to vector<1x128xf32>
    %55 = arith.truncf %52 : vector<256x128xf32> to vector<256x128xbf16>
    %cst_25 = arith.constant dense<0.000000e+00> : vector<32x128xf32>
    %56 = tpu.matmul %46, %55, %cst_25 {dimension_numbers = #tpu.dot_dimension_numbers<[1], [0], [0], [1], [0, 0, 1, 1], [], []>} : vector<32x256xbf16>, vector<256x128xbf16>, vector<32x128xf32> -> vector<32x128xf32>
    %cst_26 = arith.constant 1.000000e+00 : f32
    %57 = vector.broadcast %cst_26 : f32 to vector<1x128xf32>
    %58 = arith.divf %57, %54 : vector<1x128xf32>
    %59 = vector.broadcast %58 : vector<1x128xf32> to vector<32x128xf32>
    %60 = arith.mulf %56, %59 : vector<32x128xf32>
    %61 = arith.truncf %60 : vector<32x128xf32> to vector<32x128xbf16>
    %c96 = arith.constant 96 : index
    %62 = arith.index_cast %4 : i32 to index
    %63 = vector.load %arg11[%c96, %62] : memref<128x256xbf16, #tpu.memory_space<vmem>>, vector<32x128xbf16>
    %c0_27 = arith.constant 0 : index
    %c96_28 = arith.constant 96 : index
    %64 = vector.load %arg12[%c0_27, %c96_28] : memref<256x128xbf16, #tpu.memory_space<vmem>>, vector<256x32xbf16>
    %c96_29 = arith.constant 96 : index
    %c0_30 = arith.constant 0 : index
    %65 = vector.load %arg13[%c96_29, %c0_30] : memref<128x256xbf16, #tpu.memory_space<vmem>>, vector<32x256xbf16>
    %cst_31 = arith.constant dense<0.000000e+00> : vector<256x128xf32>
    %66 = tpu.matmul %64, %63, %cst_31 {dimension_numbers = #tpu.dot_dimension_numbers<[1], [0], [0], [1], [0, 0, 1, 1], [], []>} : vector<256x32xbf16>, vector<32x128xbf16>, vector<256x128xf32> -> vector<256x128xf32>
    %cst_32 = arith.constant dense<0xFF800000> : vector<128xf32>
    %67 = vector.multi_reduction <maximumf>, %66, %cst_32 [0] : vector<256x128xf32> to vector<128xf32>
    %68 = vector.shape_cast %67 : vector<128xf32> to vector<1x128xf32>
    %69 = vector.broadcast %68 : vector<1x128xf32> to vector<256x128xf32>
    %70 = arith.subf %66, %69 : vector<256x128xf32>
    %71 = math.exp %70 : vector<256x128xf32>
    %cst_33 = arith.constant dense<0.000000e+00> : vector<128xf32>
    %72 = vector.multi_reduction <add>, %71, %cst_33 [0] : vector<256x128xf32> to vector<128xf32>
    %73 = vector.shape_cast %72 : vector<128xf32> to vector<1x128xf32>
    %74 = arith.truncf %71 : vector<256x128xf32> to vector<256x128xbf16>
    %cst_34 = arith.constant dense<0.000000e+00> : vector<32x128xf32>
    %75 = tpu.matmul %65, %74, %cst_34 {dimension_numbers = #tpu.dot_dimension_numbers<[1], [0], [0], [1], [0, 0, 1, 1], [], []>} : vector<32x256xbf16>, vector<256x128xbf16>, vector<32x128xf32> -> vector<32x128xf32>
    %cst_35 = arith.constant 1.000000e+00 : f32
    %76 = vector.broadcast %cst_35 : f32 to vector<1x128xf32>
    %77 = arith.divf %76, %73 : vector<1x128xf32>
    %78 = vector.broadcast %77 : vector<1x128xf32> to vector<32x128xf32>
    %79 = arith.mulf %75, %78 : vector<32x128xf32>
    %80 = arith.truncf %79 : vector<32x128xf32> to vector<32x128xbf16>
    %81 = tpu.concatenate %23, %42, %61, %80 in 0 : vector<32x128xbf16>, vector<32x128xbf16>, vector<32x128xbf16>, vector<32x128xbf16> -> vector<128x128xbf16>
    %c0_36 = arith.constant 0 : index
    %c0_37 = arith.constant 0 : index
    %82 = vector.load %arg5[%c0_36, %c0_37] : memref<128x128xbf16, #tpu.memory_space<vmem>>, vector<128x128xbf16>
    %cst_38 = arith.constant dense<0.000000e+00> : vector<128x128xf32>
    %83 = tpu.matmul %82, %81, %cst_38 {dimension_numbers = #tpu.dot_dimension_numbers<[1], [0], [0], [1], [0, 0, 1, 1], [], []>} : vector<128x128xbf16>, vector<128x128xbf16>, vector<128x128xf32> -> vector<128x128xf32>
    %c0_39 = arith.constant 0 : index
    %c0_40 = arith.constant 0 : index
    %84 = vector.load %arg6[%c0_39, %c0_40] : memref<128x1xf32, #tpu.memory_space<vmem>>, vector<128x1xf32>
    %85 = vector.broadcast %84 : vector<128x1xf32> to vector<128x128xf32>
    %86 = arith.addf %83, %85 : vector<128x128xf32>
    %c0_41 = arith.constant 0 : index
    %c0_42 = arith.constant 0 : index
    %87 = arith.index_cast %4 : i32 to index
    %88 = vector.load %arg2[%c0_41, %c0_42, %87] : memref<1x128x256xf32, #tpu.memory_space<vmem>>, vector<1x128x128xf32>
    %89 = vector.shape_cast %88 : vector<1x128x128xf32> to vector<128x128xf32>
    %90 = arith.addf %86, %89 : vector<128x128xf32>
    %c0_43 = arith.constant 0 : index
    %91 = arith.index_cast %4 : i32 to index
    %92 = vector.load %arg14[%c0_43, %91] : memref<128x256xf32, #tpu.memory_space<vmem>>, vector<128x128xf32>
    tpu.vector_store %arg14[%c0_43, %91], %90 {strides = array<i32>} : memref<128x256xf32, #tpu.memory_space<vmem>>, vector<128x128xf32>,
    %c0_44 = arith.constant 0 : index
    %c0_45 = arith.constant 0 : index
    %93 = vector.load %arg15[%c0_44, %c0_45] : memref<128x1xf32, #tpu.memory_space<vmem>>, vector<128x1xf32>
    %cst_46 = arith.constant dense<0.000000e+00> : vector<128xf32>
    %94 = vector.multi_reduction <add>, %90, %cst_46 [1] : vector<128x128xf32> to vector<128xf32>
    %95 = vector.shape_cast %94 : vector<128xf32> to vector<128x1xf32>
    %96 = arith.addf %93, %95 : vector<128x1xf32>
    %c0_47 = arith.constant 0 : index
    %c0_48 = arith.constant 0 : index
    %97 = vector.load %arg15[%c0_47, %c0_48] : memref<128x1xf32, #tpu.memory_space<vmem>>, vector<128x1xf32>
    tpu.vector_store %arg15[%c0_47, %c0_48], %96 {strides = array<i32>} : memref<128x1xf32, #tpu.memory_space<vmem>>, vector<128x1xf32>,
    %c1_i32 = arith.constant 1 : i32
    %98 = arith.cmpi eq, %arg1, %c1_i32 : i32
    %99 = arith.extui %98 : i1 to i32
    %c0_i32_49 = arith.constant 0 : i32
    %100 = arith.cmpi ne, %99, %c0_i32_49 : i32
    scf.if %100 {
      %c0_50 = arith.constant 0 : index
      %c0_51 = arith.constant 0 : index
      %101 = vector.load %arg9[%c0_50, %c0_51] : memref<128x128xf32, #tpu.memory_space<vmem>>, vector<128x128xf32>
      %c0_52 = arith.constant 0 : index
      %c0_53 = arith.constant 0 : index
      %102 = vector.load %arg15[%c0_52, %c0_53] : memref<128x1xf32, #tpu.memory_space<vmem>>, vector<128x1xf32>
      %cst_54 = arith.constant dense<0.000000e+00> : vector<128x1xf32>
      %103 = tpu.matmul %101, %102, %cst_54 {dimension_numbers = #tpu.dot_dimension_numbers<[1], [0], [0], [1], [0, 0, 1, 1], [], []>} : vector<128x128xf32>, vector<128x1xf32>, vector<128x1xf32> -> vector<128x1xf32>
      %cst_55 = arith.constant 9.765625E-4 : f32
      %104 = vector.broadcast %cst_55 : f32 to vector<128x1xf32>
      %105 = arith.mulf %103, %104 : vector<128x1xf32>
      %c0_56 = arith.constant 0 : index
      %c0_57 = arith.constant 0 : index
      %106 = vector.load %arg14[%c0_56, %c0_57] : memref<128x256xf32, #tpu.memory_space<vmem>>, vector<128x256xf32>
      %107 = vector.broadcast %105 : vector<128x1xf32> to vector<128x256xf32>
      %108 = arith.subf %106, %107 : vector<128x256xf32>
      %109 = arith.mulf %108, %108 : vector<128x256xf32>
      %cst_58 = arith.constant dense<0.000000e+00> : vector<128xf32>
      %110 = vector.multi_reduction <add>, %109, %cst_58 [1] : vector<128x256xf32> to vector<128xf32>
      %111 = vector.shape_cast %110 : vector<128xf32> to vector<128x1xf32>
      %c0_59 = arith.constant 0 : index
      %c0_60 = arith.constant 0 : index
      %112 = vector.load %arg9[%c0_59, %c0_60] : memref<128x128xf32, #tpu.memory_space<vmem>>, vector<128x128xf32>
      %cst_61 = arith.constant dense<0.000000e+00> : vector<128x1xf32>
      %113 = tpu.matmul %112, %111, %cst_61 {dimension_numbers = #tpu.dot_dimension_numbers<[1], [0], [0], [1], [0, 0, 1, 1], [], []>} : vector<128x128xf32>, vector<128x1xf32>, vector<128x1xf32> -> vector<128x1xf32>
      %cst_62 = arith.constant 9.765625E-4 : f32
      %114 = vector.broadcast %cst_62 : f32 to vector<128x1xf32>
      %115 = arith.mulf %113, %114 : vector<128x1xf32>
      %cst_63 = arith.constant 9.99999974E-6 : f32
      %116 = vector.broadcast %cst_63 : f32 to vector<128x1xf32>
      %117 = arith.addf %115, %116 : vector<128x1xf32>
      %118 = math.rsqrt %117 : vector<128x1xf32>
      %119 = vector.broadcast %118 : vector<128x1xf32> to vector<128x256xf32>
      %120 = arith.mulf %108, %119 : vector<128x256xf32>
      %c0_64 = arith.constant 0 : index
      %c0_65 = arith.constant 0 : index
      %121 = vector.load %arg7[%c0_64, %c0_65] : memref<128x1xf32, #tpu.memory_space<vmem>>, vector<128x1xf32>
      %122 = vector.broadcast %121 : vector<128x1xf32> to vector<128x256xf32>
      %123 = arith.mulf %120, %122 : vector<128x256xf32>
      %c0_66 = arith.constant 0 : index
      %c0_67 = arith.constant 0 : index
      %124 = vector.load %arg8[%c0_66, %c0_67] : memref<128x1xf32, #tpu.memory_space<vmem>>, vector<128x1xf32>
      %125 = vector.broadcast %124 : vector<128x1xf32> to vector<128x256xf32>
      %126 = arith.addf %123, %125 : vector<128x256xf32>
      %c0_68 = arith.constant 0 : index
      %c0_69 = arith.constant 0 : index
      %c0_70 = arith.constant 0 : index
      %127 = vector.load %arg10[%c0_68, %c0_69, %c0_70] : memref<1x128x256xf32, #tpu.memory_space<vmem>>, vector<1x128x256xf32>
      %128 = vector.shape_cast %127 : vector<1x128x256xf32> to vector<128x256xf32>
      %129 = vector.shape_cast %126 : vector<128x256xf32> to vector<1x128x256xf32>
      tpu.vector_store %arg10[%c0_68, %c0_69, %c0_70], %129 {strides = array<i32>} : memref<1x128x256xf32, #tpu.memory_space<vmem>>, vector<1x128x256xf32>,
    } else {
    }
    return
  }
  func.func @transform_0(%arg0: i32, %arg1: i32) -> (i32, i32, i32) {
    %c0_i32 = arith.constant 0 : i32
    %c0_i32_0 = arith.constant 0 : i32
    %c0_i32_1 = arith.constant 0 : i32
    return %arg0, %c0_i32, %c0_i32_0 : i32, i32, i32
  }
  func.func @transform_1(%arg0: i32, %arg1: i32) -> (i32, i32) {
    %c0_i32 = arith.constant 0 : i32
    %c0_i32_0 = arith.constant 0 : i32
    %c0_i32_1 = arith.constant 0 : i32
    return %c0_i32, %c0_i32_0 : i32, i32
  }
  func.func @transform_2(%arg0: i32, %arg1: i32) -> (i32, i32) {
    %c0_i32 = arith.constant 0 : i32
    %c0_i32_0 = arith.constant 0 : i32
    %c0_i32_1 = arith.constant 0 : i32
    return %c0_i32, %c0_i32_0 : i32, i32
  }
  func.func @transform_3(%arg0: i32, %arg1: i32) -> (i32, i32) {
    %c0_i32 = arith.constant 0 : i32
    %c0_i32_0 = arith.constant 0 : i32
    %c0_i32_1 = arith.constant 0 : i32
    return %c0_i32, %c0_i32_0 : i32, i32
  }
  func.func @transform_4(%arg0: i32, %arg1: i32) -> (i32, i32) {
    %c0_i32 = arith.constant 0 : i32
    %c0_i32_0 = arith.constant 0 : i32
    %c0_i32_1 = arith.constant 0 : i32
    return %c0_i32, %c0_i32_0 : i32, i32
  }
  func.func @transform_5(%arg0: i32, %arg1: i32) -> (i32, i32) {
    %c0_i32 = arith.constant 0 : i32
    %c0_i32_0 = arith.constant 0 : i32
    %c0_i32_1 = arith.constant 0 : i32
    return %c0_i32, %c0_i32_0 : i32, i32
  }
  func.func @transform_6(%arg0: i32, %arg1: i32) -> (i32, i32) {
    %c0_i32 = arith.constant 0 : i32
    %c0_i32_0 = arith.constant 0 : i32
    %c0_i32_1 = arith.constant 0 : i32
    return %c0_i32, %c0_i32_0 : i32, i32
  }
  func.func @transform_7(%arg0: i32, %arg1: i32) -> (i32, i32) {
    %c0_i32 = arith.constant 0 : i32
    %c0_i32_0 = arith.constant 0 : i32
    %c0_i32_1 = arith.constant 0 : i32
    return %c0_i32, %c0_i32_0 : i32, i32
  }
  func.func @transform_8(%arg0: i32, %arg1: i32) -> (i32, i32, i32) {
    %c0_i32 = arith.constant 0 : i32
    %c0_i32_0 = arith.constant 0 : i32
    %c0_i32_1 = arith.constant 0 : i32
    return %arg0, %c0_i32, %c0_i32_0 : i32, i32, i32
  }
}

</mosaic_0001>

<bundles_post_ra>
// kernel: tpu_custom_call.1
= control target key start
LH: loop header
LB: loop body
LE: loop exit
PB: predicated region body
PF: predicated region fallthrough
CT: control target
= control target key end

     0   :  { %s8840_s0 = inlined_call_operand.vmem [shape: f32[2,128,256], index: 0, kind: input, shape index: {}]   ;;  %s8841_s1 = inlined_call_operand.vmem [shape: bf16[384,128], index: 1, kind: input, shape index: {}]   ;;  %s8842_s2 = inlined_call_operand.vmem [shape: f32[384,1], index: 2, kind: input, shape index: {}]   ;;  %s8843_s3 = inlined_call_operand.vmem [shape: bf16[128,128], index: 3, kind: input, shape index: {}]   ;;  %s8844_s4 = inlined_call_operand.vmem [shape: f32[128,1], index: 4, kind: input, shape index: {}]   ;;  %s8845_s5 = inlined_call_operand.vmem [shape: f32[128,1], index: 5, kind: input, shape index: {}]   ;;  %s8846_s6 = inlined_call_operand.vmem [shape: f32[128,1], index: 6, kind: input, shape index: {}]   ;;  %s8847_s7 = inlined_call_operand.hbm [shape: f32[128,128], index: 7, kind: input, shape index: {}]   ;;  %s8848_s8 = inlined_call_operand.hbm [shape: f32[2,128,256], index: 8, kind: output, shape index: {}]  }
   0x1   :  { %8872 = sst [smem:[#allocation32_spill]] %s8840_s0 }
   0x2   :  { %13 = vsyncpa [#allocation8], 0 }
   0x3   :  { %14 = vsyncpa [#allocation9], 0 }
   0x4   :  { %16 = vsyncpa [#allocation9 + $0x1], 0  ;;  %s6317_s27 = smov 0   ;;  %s6319_s28 = smov 0  }
   0x5   :  { %s6321_s29 = smov 0   ;;  %s6323_s30 = smov 0  }
   0x6   :  { %s6325_s9 = smov 0   ;;  %s6327_s10 = smov 0  }
   0x7   :  { %s6329_s11 = smov 0   ;;  %s6331_s12 = smov 0  }
   0x8 LB: > { %8873 = sst [smem:[#allocation13_spill]] %s6253_s11  ;;  %s4821_s13 = sadd.s32 4294967295, %s6257_s12   ;;  %s6257_s12 = sphi %s6331_s12, %s22_s12   ;;  %s6253_s11 = sphi %s6329_s11, %s8926_s11   ;;  %s6249_s10 = sphi %s6327_s10, %s8931_s10   ;;  %s6245_s9 = sphi %s6325_s9, %s8924_s9   ;;  %s6241_s30 = sphi %s6323_s30, %s8930_s30   ;;  %s6237_s29 = sphi %s6321_s29, %s8929_s29   ;;  %s6233_s28 = sphi %s6319_s28, %s8928_s28   ;;  %s6229_s27 = sphi %s6317_s27, %s8927_s27  }
   0x9   : > { %s4822_s14 = sadd.s32 4294967294, %s6257_s12   ;;  %s31_s15 = sadd.s32 1, %s6249_s10 }
   0xa   : > { %s34_s16 = sadd.s32 1, %s6253_s11  ;;  %p32_p0 = scmp.ge.s32.totalorder %s31_s15, 2 }
   0xb   : > { %s214_s17 = sadd.s32 1, %s6237_s29  ;;  %p224_p1 = scmp.ne.s32.totalorder %s6237_s29, %s6233_s28 }
   0xc   : > { %p225_p2 = scmp.eq.s32.totalorder %s4821_s13, 3  ;;  %s8933_s15 = smov (%p32_p0, %s31_s15), 0 }
   0xd   : > { %8874 = sst [smem:[#allocation14_spill]] %s8933_s15  ;;  %s8935_s16 = smov (!%p32_p0, %s34_s16), %s6253_s11 }
   0xe   : > { %p6367_p3 = por %p225_p2, %p224_p1  ;;  %p230_p4 = scmp.ne.s32.totalorder %s6233_s28, %s6229_s27 }
   0xf   : > { %p36_p5 = scmp.ge.s32.totalorder %s8935_s16, 2  ;;  %p231_p6 = scmp.eq.s32.totalorder %s4822_s14, 3 }
  0x10   : > { %s8875_s18 = scalar_select %p6367_p3, 1, 0 }
  0x11   : > { %p4823_p7 = scmp.ge.s32.totalorder %s6257_s12, 1  ;;  %p238_p8 = scmp.lt.s32.totalorder %s6257_s12, 5 }
  0x12   : > { %s8937_s16 = smov (%p36_p5, %s8935_s16), 0  ;;  %p6377_p9 = por %p231_p6, %p230_p4 }
  0x13   : > { %8876 = sst [smem:[#allocation15_spill]] %s8937_s16  ;;  %p6381_p10 = pnand %p4823_p7, %p238_p8 }
  0x14   : > { %s8877_s19 = scalar_select %p6377_p9, 1, 0 }
  0x15   : > { %s8878_s20 = scalar_select %p6381_p10, 1, 0 }
  0x16   : > { %s211_s21 = ssub.s32 %s6253_s11, %s8937_s16  ;;  %p5582_p12 = pneg %p6381_p10 }
  0x17   : > { %p212_p11 = scmp.eq.s32.totalorder %s211_s21, 0  ;;  %p6389_p13 = scmp.eq.s32.totalorder %s4821_s13, 0 }
  0x18   : > { %s6259_s24 = smov [#allocation7]   ;;  %s6131_s16 = scalar_lea.hbm %s8847_s7, 2048 }
  0x19   : > { %s8879_s22 = scalar_select %p6389_p13, 1, 0 }
  0x1a   : > { %s6394_s23 = scalar_select %p212_p11, %s6237_s29, %s214_s17  }
  0x1b   : > { %s268_s25 = sshll.u32 %s6259_s24, 4  ;;  %p6398_p0 = pnand %p6389_p13, %p5582_p12  ;;  %s269_s25 = int_to_ptr.vmem [resolvable:$true] %s268_s25 }
  0x1c   : > { %p6132_p1 = scmp.ne.s32.totalorder %s8847_s7, %s6131_s16  ;;  %p6138_p6 = scmp.lt.u32.totalorder %s6131_s16, %s8847_s7 }
  0x1d   : > { %p6133_p2 = pneg %p6398_p0 }
  0x1f   : > { %p6134_p4 = pnand %p6133_p2, %p6132_p1 }
  0x21   : > { %p6135_p5 = pneg %p6134_p4 }
  0x23   : > { %p6140_p7 = pnand %p6138_p6, %p6135_p5 }
  0x25   : > { %6143 = shalt.err (!%p6140_p7)
}
  0x26   : > { %s6144_s11 = scalar_lea.vmem %s269_s25, 2048  ;;  %p6152_p9 = scmp.lt.s32.totalorder %s269_s25, %s269_s25 }
  0x27   : > { %p6145_p8 = scmp.ne.s32.totalorder %s269_s25, %s6144_s11  ;;  %p6153_p3 = scmp.lt.s32.totalorder %s6144_s11, %s6144_s11 }
  0x29   : > { %p6147_p11 = pnand %p6145_p8, %p6133_p2  ;;  %p6154_p13 = por %p6153_p3, %p6152_p9 }
  0x2b   : > { %p6148_p12 = pneg %p6147_p11 }
  0x2d   : > { %p6155_p10 = pnand %p6154_p13, %p6148_p12 }
  0x2f   : > { %6158 = shalt.err (!%p6155_p10)
}
  0x30   : > { %s6260_s15 = smov 128   ;;  %s6261_s14 = smov 8  }
  0x31   : > { %5585 = dma.hbm_to_vmem [thread:$0]  (!%p6398_p0), %s8847_s7, 2048, %s269_s25, [#allocation8], %s6260_s15, %s6260_s15, %s6261_s14  }
  0x32   : > { %p8881_p1 = scmp.ne.s32.totalorder %s8878_s20, 0 }
  0x34   : > { %292 = sbr.rel (%p8881_p1) target bundleno = 3670 (0xe56), region = 52 }
  0x3b   : > { %p8882_p4 = scmp.ne.s32.totalorder %s8879_s22, 0 }
  0x3d   : > { %6220 = dma.done.wait (%p8882_p4), [#allocation8], 2048  }
  0x3e   : > { %6222 = vsyncadd (%p8882_p4), [#allocation8], 4294965248  ;;  %s8855_s11 = sand.u32 1, %s6233_s28   ;;  %p326_p3 = scmp.lt.s32.totalorder %s6245_s9, 1 }
  0x3f   : > { %s4828_s16 = sshll.u32 %s8855_s11, 8  ;;  %s8883_s0 = sld [smem:[#allocation32_spill]] }
  0x40   : > { %s327_s26 = scalar_select %p326_p3, %s6245_s9, 1 }
  0x41   : > { %s6434_s15 = scalar_lea.vmem [#allocation10], %s4828_s16  ;;  %p4831_p9 = scmp.ne.s32.totalorder %s6241_s30, 0 }
  0x42   : > { %s4938_s17 = sshll.u32 %s327_s26, 8  ;;  %v6262_v7 = vmov (!%p4831_p9), 0   ;;  %v432_v38 = vld [vmem:[%s8842_s2] sm:$0xff] (!%p4831_p9)  ;;  %v434_v39 = vld [vmem:[%s8842_s2 + $0x10] sm:$0xff] (!%p4831_p9)  ;;  %v433_v41 = vld [vmem:[%s8842_s2 + $0x8] sm:$0xff] (!%p4831_p9)  ;;  %vm1329_vm0 = vcmask (!%p4831_p9), 7168  }
  0x43   : > { %335 = sbr.rel (%p4831_p9) target bundleno = 580 (0x244), region = 60  ;;  %896 = vmatprep.mubr.bf16.mxu0 (!%p4831_p9), %v6262_v7  ;;  %1016 = vmatprep.mubr.bf16.mxu1 (!%p4831_p9), %v6262_v7  ;;  %v435_v47 = vld [vmem:[%s8842_s2 + $0x18] sm:$0xff] (!%p4831_p9)  ;;  %v436_v49 = vld [vmem:[%s8842_s2 + $0x20] sm:$0xff] (!%p4831_p9)  ;;  %v437_v53 = vld [vmem:[%s8842_s2 + $0x28] sm:$0xff] (!%p4831_p9) }
  0x44   : > { %5669 = vset.pattern.permute.xlu0 (!%p4831_p9), %v6262_v7  ;;  %5670 = vset.pattern.permute.xlu1 (!%p4831_p9), %v6262_v7  ;;  %v438_v55 = vld [vmem:[%s8842_s2 + $0x30] sm:$0xff] (!%p4831_p9)  ;;  %v5783_v56 = vld [vmem:[%s8841_s1] sm:$0xff] (!%p4831_p9)   ;;  %v439_v58 = vld [vmem:[%s8842_s2 + $0x38] sm:$0xff] (!%p4831_p9) }
  0x45   : > { %s6432_s20 = scalar_lea.vmem %s8883_s0, %s4938_s17  ;;  %482 = vperm.xlu0 (!%p4831_p9), %5669, %v432_v38   ;;  %492 = vperm.xlu1 (!%p4831_p9), %5670, %v434_v39   ;;  %v5784_v57 = vld [vmem:[%s8841_s1 + $0x60] sm:$0xff] (!%p4831_p9)   ;;  %v441_v60 = vld [vmem:[%s8842_s2 + $0x48] sm:$0xff] (!%p4831_p9)  ;;  %v442_v62 = vld [vmem:[%s8842_s2 + $0x50] sm:$0xff] (!%p4831_p9) }
  0x46   : > { %v337_v0 = vld [vmem:[%s6432_s20 + $0x8] sm:$0xff] (!%p4831_p9)  ;;  %v339_v1 = vld [vmem:[%s6432_s20 + $0x18] sm:$0xff] (!%p4831_p9)  ;;  %v336_v2 = vld [vmem:[%s6432_s20] sm:$0xff] (!%p4831_p9) }
  0x47   : > { %v369_v3 = vpack.c.bf16 (!%p4831_p9), %v339_v1, %v337_v0  ;;  %v338_v4 = vld [vmem:[%s6432_s20 + $0x10] sm:$0xff] (!%p4831_p9)  ;;  %v341_v5 = vld [vmem:[%s6432_s20 + $0x28] sm:$0xff] (!%p4831_p9)  ;;  %v343_v6 = vld [vmem:[%s6432_s20 + $0x38] sm:$0xff] (!%p4831_p9) }
  0x48   : > { %v368_v8 = vpack.c.bf16 (!%p4831_p9), %v338_v4, %v336_v2  ;;  %v371_v9 = vpack.c.bf16 (!%p4831_p9), %v343_v6, %v341_v5  ;;  %v340_v10 = vld [vmem:[%s6432_s20 + $0x20] sm:$0xff] (!%p4831_p9)  ;;  %v342_v11 = vld [vmem:[%s6432_s20 + $0x30] sm:$0xff] (!%p4831_p9)  ;;  %v345_v12 = vld [vmem:[%s6432_s20 + $0x48] sm:$0xff] (!%p4831_p9) }
  0x49   : > { %864 = vmatprep.subr.bf16.mxu0 (!%p4831_p9), %v369_v3  ;;  %5556 = vmatprep.subr.bf16.mxu1 (!%p4831_p9), %v369_v3  ;;  %v347_v13 = vld [vmem:[%s6432_s20 + $0x58] sm:$0xff] (!%p4831_p9)  ;;  %v370_v14 = vpack.c.bf16 (!%p4831_p9), %v342_v11, %v340_v10  ;;  %v344_v16 = vld [vmem:[%s6432_s20 + $0x40] sm:$0xff] (!%p4831_p9)  ;;  %v346_v17 = vld [vmem:[%s6432_s20 + $0x50] sm:$0xff] (!%p4831_p9) }
  0x4a   : > { %865 = vmatpush1.bf16.msra.mxu0 %v368_v8  ;;  %5564 = vmatpush1.bf16.msra.mxu1 %v368_v8  ;;  %v373_v15 = vpack.c.bf16 %v347_v13, %v345_v12  ;;  %v349_v18 = vld [vmem:[%s6432_s20 + $0x68] sm:$0xff]  ;;  %v351_v19 = vld [vmem:[%s6432_s20 + $0x78] sm:$0xff]  ;;  %v372_v20 = vpack.c.bf16 %v346_v17, %v344_v16  ;;  %v348_v22 = vld [vmem:[%s6432_s20 + $0x60] sm:$0xff] }
  0x4b   : > { %866 = vmatprep.subr.bf16.mxu0 %v371_v9  ;;  %5557 = vmatprep.subr.bf16.mxu1 %v371_v9  ;;  %v375_v21 = vpack.c.bf16 %v351_v19, %v349_v18  ;;  %v350_v23 = vld [vmem:[%s6432_s20 + $0x70] sm:$0xff]  ;;  %v353_v24 = vld [vmem:[%s6432_s20 + $0x88] sm:$0xff]  ;;  %v355_v25 = vld [vmem:[%s6432_s20 + $0x98] sm:$0xff] }
  0x4c   : > { %v352_v26 = vld [vmem:[%s6432_s20 + $0x80] sm:$0xff]  ;;  %v374_v27 = vpack.c.bf16 %v350_v23, %v348_v22  ;;  %v354_v28 = vld [vmem:[%s6432_s20 + $0x90] sm:$0xff]  ;;  %v377_v29 = vpack.c.bf16 %v355_v25, %v353_v24  ;;  %v357_v30 = vld [vmem:[%s6432_s20 + $0xa8] sm:$0xff]  ;;  %487 = vperm.xlu0 %5669, %v433_v41   ;;  %497 = vperm.xlu1 %5670, %v435_v47  }
  0x4d   : > { %v359_v31 = vld [vmem:[%s6432_s20 + $0xb8] sm:$0xff]  ;;  %v356_v32 = vld [vmem:[%s6432_s20 + $0xa0] sm:$0xff]  ;;  %v376_v33 = vpack.c.bf16 %v354_v28, %v352_v26  ;;  %v358_v34 = vld [vmem:[%s6432_s20 + $0xb0] sm:$0xff] }
  0x4e   : > { %867 = vmatpush1.bf16.msra.mxu0 %v370_v14  ;;  %5565 = vmatpush1.bf16.msra.mxu1 %v370_v14  ;;  %v379_v35 = vpack.c.bf16 %v359_v31, %v357_v30  ;;  %v361_v36 = vld [vmem:[%s6432_s20 + $0xc8] sm:$0xff]  ;;  %v363_v37 = vld [vmem:[%s6432_s20 + $0xd8] sm:$0xff]  ;;  %v378_v40 = vpack.c.bf16 %v358_v34, %v356_v32  ;;  %v360_v43 = vld [vmem:[%s6432_s20 + $0xc0] sm:$0xff] }
  0x4f   : > { %868 = vmatprep.subr.bf16.mxu0 %v373_v15  ;;  %5558 = vmatprep.subr.bf16.mxu1 %v373_v15  ;;  %v381_v42 = vpack.c.bf16 %v363_v37, %v361_v36  ;;  %v362_v44 = vld [vmem:[%s6432_s20 + $0xd0] sm:$0xff]  ;;  %v365_v45 = vld [vmem:[%s6432_s20 + $0xe8] sm:$0xff]  ;;  %v367_v46 = vld [vmem:[%s6432_s20 + $0xf8] sm:$0xff] }
  0x50   : > { %v380_v48 = vpack.c.bf16 %v362_v44, %v360_v43  ;;  %v383_v50 = vpack.c.bf16 %v367_v46, %v365_v45  ;;  %v364_v51 = vld [vmem:[%s6432_s20 + $0xe0] sm:$0xff]  ;;  %v366_v52 = vld [vmem:[%s6432_s20 + $0xf0] sm:$0xff]  ;;  %502 = vperm.xlu0 %5669, %v436_v49   ;;  %507 = vperm.xlu1 %5670, %v437_v53   ;;  %v5785_v61 = vld [vmem:[%s8841_s1 + $0x8] sm:$0xff]  }
  0x51   : > { %v382_v54 = vpack.c.bf16 %v366_v52, %v364_v51  ;;  %v440_v59 = vld [vmem:[%s8842_s2 + $0x40] sm:$0xff]  ;;  %v5786_v63 = vld [vmem:[%s8841_s1 + $0x68] sm:$0xff]   ;;  %v443_v0 = vld [vmem:[%s8842_s2 + $0x58] sm:$0xff] }
  0x52   : > { %869 = vmatpush1.bf16.msra.mxu0 %v372_v20  ;;  %5566 = vmatpush1.bf16.msra.mxu1 %v372_v20  ;;  %v444_v1 = vld [vmem:[%s8842_s2 + $0x60] sm:$0xff]  ;;  %v445_v2 = vld [vmem:[%s8842_s2 + $0x68] sm:$0xff]  ;;  %v446_v3 = vld [vmem:[%s8842_s2 + $0x70] sm:$0xff] }
  0x53   : > { %870 = vmatprep.subr.bf16.mxu0 %v375_v21  ;;  %5559 = vmatprep.subr.bf16.mxu1 %v375_v21  ;;  %v5787_v4 = vld [vmem:[%s8841_s1 + $0x10] sm:$0xff]   ;;  %v447_v6 = vld [vmem:[%s8842_s2 + $0x78] sm:$0xff]  ;;  %v448_v8 = vld [vmem:[%s8842_s2 + $0x80] sm:$0xff] }
  0x54   : > { %512 = vperm.xlu0 %5669, %v438_v55   ;;  %517 = vperm.xlu1 %5670, %v439_v58   ;;  %v5788_v5 = vld [vmem:[%s8841_s1 + $0x70] sm:$0xff]   ;;  %v449_v9 = vld [vmem:[%s8842_s2 + $0x88] sm:$0xff]  ;;  %v5789_v11 = vld [vmem:[%s8841_s1 + $0x18] sm:$0xff]  }
  0x55   : > { %v450_v10 = vld [vmem:[%s8842_s2 + $0x90] sm:$0xff]  ;;  %v5790_v12 = vld [vmem:[%s8841_s1 + $0x78] sm:$0xff]   ;;  %v452_v14 = vld [vmem:[%s8842_s2 + $0xa0] sm:$0xff] }
  0x56   : > { %871 = vmatpush1.bf16.msra.mxu0 %v374_v27  ;;  %5567 = vmatpush1.bf16.msra.mxu1 %v374_v27  ;;  %v451_v13 = vld [vmem:[%s8842_s2 + $0x98] sm:$0xff]  ;;  %v453_v15 = vld [vmem:[%s8842_s2 + $0xa8] sm:$0xff]  ;;  %v454_v16 = vld [vmem:[%s8842_s2 + $0xb0] sm:$0xff] }
  0x57   : > { %872 = vmatprep.subr.bf16.mxu0 %v377_v29  ;;  %5560 = vmatprep.subr.bf16.mxu1 %v377_v29  ;;  %v5791_v17 = vld [vmem:[%s8841_s1 + $0x20] sm:$0xff]   ;;  %v455_v19 = vld [vmem:[%s8842_s2 + $0xb8] sm:$0xff]  ;;  %v457_v21 = vld [vmem:[%s8842_s2 + $0xc8] sm:$0xff] }
  0x58   : > { %522 = vperm.xlu0 %5669, %v440_v59   ;;  %527 = vperm.xlu1 %5670, %v441_v60   ;;  %v5792_v18 = vld [vmem:[%s8841_s1 + $0x80] sm:$0xff]   ;;  %v458_v22 = vld [vmem:[%s8842_s2 + $0xd0] sm:$0xff]  ;;  %v5793_v23 = vld [vmem:[%s8841_s1 + $0x28] sm:$0xff]  }
  0x59   : > { %v456_v20 = vld [vmem:[%s8842_s2 + $0xc0] sm:$0xff]  ;;  %v5794_v24 = vld [vmem:[%s8841_s1 + $0x88] sm:$0xff]   ;;  %v459_v25 = vld [vmem:[%s8842_s2 + $0xd8] sm:$0xff] }
  0x5a   : > { %873 = vmatpush1.bf16.msra.mxu0 %v376_v33  ;;  %5568 = vmatpush1.bf16.msra.mxu1 %v376_v33  ;;  %v460_v26 = vld [vmem:[%s8842_s2 + $0xe0] sm:$0xff]  ;;  %v461_v27 = vld [vmem:[%s8842_s2 + $0xe8] sm:$0xff]  ;;  %v462_v28 = vld [vmem:[%s8842_s2 + $0xf0] sm:$0xff] }
  0x5b   : > { %874 = vmatprep.subr.bf16.mxu0 %v379_v35  ;;  %5561 = vmatprep.subr.bf16.mxu1 %v379_v35  ;;  %v5795_v29 = vld [vmem:[%s8841_s1 + $0x30] sm:$0xff]   ;;  %v463_v31 = vld [vmem:[%s8842_s2 + $0xf8] sm:$0xff]  ;;  %v464_v32 = vld [vmem:[%s8842_s2 + $0x100] sm:$0xff] }
  0x5c   : > { %532 = vperm.xlu0 %5669, %v442_v62   ;;  %537 = vperm.xlu1 %5670, %v443_v0   ;;  %v5796_v30 = vld [vmem:[%s8841_s1 + $0x90] sm:$0xff]   ;;  %v465_v33 = vld [vmem:[%s8842_s2 + $0x108] sm:$0xff]  ;;  %v5797_v35 = vld [vmem:[%s8841_s1 + $0x38] sm:$0xff]  }
  0x5d   : > { %v466_v34 = vld [vmem:[%s8842_s2 + $0x110] sm:$0xff]  ;;  %v5798_v36 = vld [vmem:[%s8841_s1 + $0x98] sm:$0xff]   ;;  %v468_v38 = vld [vmem:[%s8842_s2 + $0x120] sm:$0xff] }
  0x5e   : > { %875 = vmatpush1.bf16.msra.mxu0 %v378_v40  ;;  %5569 = vmatpush1.bf16.msra.mxu1 %v378_v40  ;;  %v467_v37 = vld [vmem:[%s8842_s2 + $0x118] sm:$0xff]  ;;  %v469_v39 = vld [vmem:[%s8842_s2 + $0x128] sm:$0xff]  ;;  %v470_v40 = vld [vmem:[%s8842_s2 + $0x130] sm:$0xff] }
  0x5f   : > { %876 = vmatprep.subr.bf16.mxu0 %v381_v42  ;;  %5562 = vmatprep.subr.bf16.mxu1 %v381_v42  ;;  %v5799_v41 = vld [vmem:[%s8841_s1 + $0x40] sm:$0xff]   ;;  %v471_v43 = vld [vmem:[%s8842_s2 + $0x138] sm:$0xff]  ;;  %v473_v45 = vld [vmem:[%s8842_s2 + $0x148] sm:$0xff] }
  0x60   : > { %542 = vperm.xlu0 %5669, %v444_v1   ;;  %547 = vperm.xlu1 %5670, %v445_v2   ;;  %v5800_v42 = vld [vmem:[%s8841_s1 + $0xa0] sm:$0xff]   ;;  %v474_v46 = vld [vmem:[%s8842_s2 + $0x150] sm:$0xff]  ;;  %v5801_v47 = vld [vmem:[%s8841_s1 + $0x48] sm:$0xff]  }
  0x61   : > { %v472_v44 = vld [vmem:[%s8842_s2 + $0x140] sm:$0xff]  ;;  %v475_v49 = vld [vmem:[%s8842_s2 + $0x158] sm:$0xff]  ;;  %v477_v51 = vld [vmem:[%s8842_s2 + $0x168] sm:$0xff] }
  0x62   : > { %877 = vmatpush1.bf16.msra.mxu0 %v380_v48  ;;  %5570 = vmatpush1.bf16.msra.mxu1 %v380_v48  ;;  %v5802_v48 = vld [vmem:[%s8841_s1 + $0xa8] sm:$0xff]   ;;  %v478_v52 = vld [vmem:[%s8842_s2 + $0x170] sm:$0xff]  ;;  %v479_v55 = vld [vmem:[%s8842_s2 + $0x178] sm:$0xff] }
  0x63   : > { %878 = vmatprep.subr.bf16.mxu0 %v383_v50  ;;  %5563 = vmatprep.subr.bf16.mxu1 %v383_v50  ;;  %v476_v50 = vld [vmem:[%s8842_s2 + $0x160] sm:$0xff]  ;;  %v5803_v53 = vld [vmem:[%s8841_s1 + $0x50] sm:$0xff]  }
  0x64   : > { %552 = vperm.xlu0 %5669, %v446_v3   ;;  %557 = vperm.xlu1 %5670, %v447_v6  }
  0x66   : > { %879 = vmatpush1.bf16.msra.mxu0 %v382_v54  ;;  %5571 = vmatpush1.bf16.msra.mxu1 %v382_v54  ;;  %v5804_v54 = vld [vmem:[%s8841_s1 + $0xb0] sm:$0xff]  }
  0x68   : > { %562 = vperm.xlu0 %5669, %v448_v8   ;;  %567 = vperm.xlu1 %5670, %v449_v9  }
  0x69   : > { %897 = vmatmul.mubr.bf16.vlgmr.msra.gmra.mrb[0].mxu0 %v5783_v56  ;;  %1017 = vmatmul.mubr.bf16.vlgmr.msra.gmra.mrb[0].mxu1 %v5784_v57  ;;  %v5805_v56 = vld [vmem:[%s8841_s1 + $0x58] sm:$0xff]  }
  0x6a   : > { %906 = vmatprep.mubr.bf16.mxu0 %v6262_v7  ;;  %1026 = vmatprep.mubr.bf16.mxu1 %v6262_v7  ;;  %v5806_v57 = vld [vmem:[%s8841_s1 + $0xb8] sm:$0xff]  }
  0x6c   : > { %572 = vperm.xlu0 %5669, %v450_v10   ;;  %577 = vperm.xlu1 %5670, %v451_v13  }
  0x70   : > { %582 = vperm.xlu0 %5669, %v452_v14   ;;  %587 = vperm.xlu1 %5670, %v453_v15  }
  0x71   : > { %907 = vmatmul.mubr.bf16.gmra.mrb[4].mxu0 %v5785_v61  ;;  %1027 = vmatmul.mubr.bf16.gmra.mrb[4].mxu1 %v5786_v63 }
  0x72   : > { %916 = vmatprep.mubr.bf16.mxu0 %v6262_v7  ;;  %1036 = vmatprep.mubr.bf16.mxu1 %v6262_v7 }
  0x74   : > { %592 = vperm.xlu0 %5669, %v454_v16   ;;  %597 = vperm.xlu1 %5670, %v455_v19  }
  0x78   : > { %602 = vperm.xlu0 %5669, %v456_v20   ;;  %607 = vperm.xlu1 %5670, %v457_v21  }
  0x79   : > { %917 = vmatmul.mubr.bf16.gmra.mrb[8].mxu0 %v5787_v4  ;;  %1037 = vmatmul.mubr.bf16.gmra.mrb[8].mxu1 %v5788_v5 }
  0x7a   : > { %926 = vmatprep.mubr.bf16.mxu0 %v6262_v7  ;;  %1046 = vmatprep.mubr.bf16.mxu1 %v6262_v7 }
  0x7c   : > { %612 = vperm.xlu0 %5669, %v458_v22   ;;  %617 = vperm.xlu1 %5670, %v459_v25  }
  0x80   : > { %622 = vperm.xlu0 %5669, %v460_v26   ;;  %627 = vperm.xlu1 %5670, %v461_v27  }
  0x81   : > { %927 = vmatmul.mubr.bf16.gmra.mrb[12].mxu0 %v5789_v11  ;;  %1047 = vmatmul.mubr.bf16.gmra.mrb[12].mxu1 %v5790_v12 }
  0x82   : > { %936 = vmatprep.mubr.bf16.mxu0 %v6262_v7  ;;  %1056 = vmatprep.mubr.bf16.mxu1 %v6262_v7 }
  0x84   : > { %632 = vperm.xlu0 %5669, %v462_v28   ;;  %637 = vperm.xlu1 %5670, %v463_v31  }
  0x88   : > { %642 = vperm.xlu0 %5669, %v464_v32   ;;  %647 = vperm.xlu1 %5670, %v465_v33  }
  0x89   : > { %937 = vmatmul.mubr.bf16.gmra.mrb[16].mxu0 %v5791_v17  ;;  %1057 = vmatmul.mubr.bf16.gmra.mrb[16].mxu1 %v5792_v18 }
  0x8a   : > { %946 = vmatprep.mubr.bf16.mxu0 %v6262_v7  ;;  %1066 = vmatprep.mubr.bf16.mxu1 %v6262_v7 }
  0x8c   : > { %652 = vperm.xlu0 %5669, %v466_v34   ;;  %657 = vperm.xlu1 %5670, %v467_v37  }
  0x90   : > { %662 = vperm.xlu0 %5669, %v468_v38   ;;  %667 = vperm.xlu1 %5670, %v469_v39  }
  0x91   : > { %947 = vmatmul.mubr.bf16.gmra.mrb[20].mxu0 %v5793_v23  ;;  %1067 = vmatmul.mubr.bf16.gmra.mrb[20].mxu1 %v5794_v24 }
  0x92   : > { %956 = vmatprep.mubr.bf16.mxu0 %v6262_v7  ;;  %1076 = vmatprep.mubr.bf16.mxu1 %v6262_v7 }
  0x94   : > { %672 = vperm.xlu0 %5669, %v470_v40   ;;  %677 = vperm.xlu1 %5670, %v471_v43  }
  0x98   : > { %682 = vperm.xlu0 %5669, %v472_v44   ;;  %687 = vperm.xlu1 %5670, %v473_v45  }
  0x99   : > { %957 = vmatmul.mubr.bf16.gmra.mrb[24].mxu0 %v5795_v29  ;;  %1077 = vmatmul.mubr.bf16.gmra.mrb[24].mxu1 %v5796_v30 }
  0x9a   : > { %966 = vmatprep.mubr.bf16.mxu0 %v6262_v7  ;;  %1086 = vmatprep.mubr.bf16.mxu1 %v6262_v7 }
  0x9c   : > { %692 = vperm.xlu0 %5669, %v474_v46   ;;  %697 = vperm.xlu1 %5670, %v475_v49  }
  0xa0   : > { %702 = vperm.xlu0 %5669, %v476_v50   ;;  %707 = vperm.xlu1 %5670, %v477_v51  }
  0xa1   : > { %967 = vmatmul.mubr.bf16.gmra.mrb[28].mxu0 %v5797_v35  ;;  %1087 = vmatmul.mubr.bf16.gmra.mrb[28].mxu1 %v5798_v36 }
  0xa2   : > { %976 = vmatprep.mubr.bf16.mxu0 %v6262_v7  ;;  %1096 = vmatprep.mubr.bf16.mxu1 %v6262_v7 }
  0xa4   : > { %712 = vperm.xlu0 %5669, %v478_v52   ;;  %717 = vperm.xlu1 %5670, %v479_v55  }
  0xa9   : > { %977 = vmatmul.mubr.bf16.gmra.mrb[32].mxu0 %v5799_v41  ;;  %1097 = vmatmul.mubr.bf16.gmra.mrb[32].mxu1 %v5800_v42 }
  0xaa   : > { %986 = vmatprep.mubr.bf16.mxu0 %v6262_v7  ;;  %1106 = vmatprep.mubr.bf16.mxu1 %v6262_v7 }
  0xb1   : > { %987 = vmatmul.mubr.bf16.gmra.mrb[36].mxu0 %v5801_v47  ;;  %1107 = vmatmul.mubr.bf16.gmra.mrb[36].mxu1 %v5802_v48 }
  0xb2   : > { %996 = vmatprep.mubr.bf16.mxu0 %v6262_v7  ;;  %1116 = vmatprep.mubr.bf16.mxu1 %v6262_v7 }
  0xb9   : > { %997 = vmatmul.mubr.bf16.gmra.mrb[40].mxu0 %v5803_v53  ;;  %1117 = vmatmul.mubr.bf16.gmra.mrb[40].mxu1 %v5804_v54 }
  0xba   : > { %1006 = vmatprep.mubr.bf16.mxu0 %v6262_v7  ;;  %1126 = vmatprep.mubr.bf16.mxu1 %v6262_v7 }
  0xc1   : > { %1007 = vmatmul.mubr.bf16.gmra.mrb[44].mxu0 %v5805_v56  ;;  %1127 = vmatmul.mubr.bf16.gmra.mrb[44].mxu1 %v5806_v57 }
  0xc4   : > { %v483_v58 = vpop.permute.xlu0 %482  ;;  %v493_v59 = vpop.permute.xlu1 %492 }
  0xcb   : > { %v488_v60 = vpop.permute.xlu0 %487  ;;  %v6711_v61 = vpop.permute.xlu1 %497 }
  0xcf   : > { %v6713_v62 = vpop.permute.xlu0 %502  ;;  %v6715_v63 = vpop.permute.xlu1 %507 }
  0xd3   : > { %v6717_v7 = vpop.permute.xlu0 %512  ;;  %v6719_v0 = vpop.permute.xlu1 %517 }
  0xd7   : > { %v6721_v1 = vpop.permute.xlu0 %522  ;;  %v6723_v2 = vpop.permute.xlu1 %527 }
  0xdb   : > { %v6725_v3 = vpop.permute.xlu0 %532  ;;  %v6727_v4 = vpop.permute.xlu1 %537 }
  0xdf   : > { %v6729_v5 = vpop.permute.xlu0 %542  ;;  %v6731_v6 = vpop.permute.xlu1 %547 }
  0xe3   : > { %v6733_v8 = vpop.permute.xlu0 %552  ;;  %v6735_v9 = vpop.permute.xlu1 %557 }
  0xe7   : > { %v6737_v10 = vpop.permute.xlu0 %562  ;;  %v6739_v11 = vpop.permute.xlu1 %567 }
  0xeb   : > { %v6741_v12 = vpop.permute.xlu0 %572  ;;  %v6743_v13 = vpop.permute.xlu1 %577 }
  0xef   : > { %v6745_v14 = vpop.permute.xlu0 %582  ;;  %v6747_v15 = vpop.permute.xlu1 %587 }
  0xf3   : > { %v6749_v16 = vpop.permute.xlu0 %592  ;;  %v6751_v17 = vpop.permute.xlu1 %597 }
  0xf7   : > { %v603_v18 = vpop.permute.xlu0 %602  ;;  %v608_v19 = vpop.permute.xlu1 %607 }
  0xfb   : > { %v613_v42 = vpop.permute.xlu0 %612  ;;  %v618_v43 = vpop.permute.xlu1 %617 }
 0x13c   : > { %v898_v20 = vpop.f32.mrb[0].mxu0  ;;  %v1018_v21 = vpop.f32.mrb[0].mxu1 }
 0x13d   : > { %v899_v22 = vadd.f32 %v898_v20, %v483_v58  ;;  %v900_v23 = vpop.f32.mrb[1].mxu0  ;;  %v6753_v24 = vadd.f32 %v1018_v21, %v603_v18  ;;  %v1020_v25 = vpop.f32.mrb[1].mxu1 }
 0x13e   : > { %v901_v26 = vadd.f32 %v900_v23, %v483_v58  ;;  %v902_v27 = vpop.f32.mrb[2].mxu0  ;;  %v6755_v28 = vadd.f32 %v1020_v25, %v603_v18  ;;  %v1022_v29 = vpop.f32.mrb[2].mxu1 }
 0x13f   : > { %v903_v30 = vadd.f32 %v902_v27, %v488_v60  ;;  %v904_v31 = vpop.f32.mrb[3].mxu0  ;;  %v6757_v32 = vadd.f32 %v1022_v29, %v608_v19  ;;  %v1024_v33 = vpop.f32.mrb[3].mxu1  ;;  %v1137_v37 = vmul.f32 0.17677669, %v899_v22 }
 0x140   : > { %v905_v34 = vadd.f32 %v904_v31, %v488_v60  ;;  %v5687_v35 = vpack.i.bf16 %v6755_v28, %v6753_v24  ;;  %v6761_v36 = vadd.f32 %v1024_v33, %v608_v19  ;;  %v1138_v39 = vmul.f32 0.17677669, %v901_v26  ;;  %v623_v26 = vpop.permute.xlu0 %622  ;;  %v628_v27 = vpop.permute.xlu1 %627 }
 0x141   : > { %v1139_v38 = vmul.f32 0.17677669, %v903_v30 }
 0x142   : > { %v1140_v40 = vmul.f32 0.17677669, %v905_v34  ;;  %v5689_v41 = vpack.i.bf16 %v6761_v36, %v6757_v32 }
 0x143   : > { %v1169_v44 = vpack.c.bf16 %v1139_v38, %v1137_v37 }
 0x144   : > { %v1170_v45 = vpack.c.bf16 %v1140_v40, %v1138_v39  ;;  %v908_v46 = vpop.f32.mrb[4].mxu0  ;;  %v1028_v47 = vpop.f32.mrb[4].mxu1 }
 0x145   : > { %1185 = vst [vmem:[#allocation2] sm:$0xff] %v1169_v44  ;;  %v909_v48 = vadd.f32 %v908_v46, %v493_v59  ;;  %v910_v49 = vpop.f32.mrb[5].mxu0  ;;  %v6765_v50 = vadd.f32 %v1028_v47, %v613_v42  ;;  %v1030_v51 = vpop.f32.mrb[5].mxu1 }
 0x146   : > { %1186 = vst [vmem:[#allocation2 + $0x8] sm:$0xff] %v1170_v45  ;;  %v911_v52 = vadd.f32 %v910_v49, %v493_v59  ;;  %v912_v53 = vpop.f32.mrb[6].mxu0  ;;  %v6767_v54 = vadd.f32 %v1030_v51, %v613_v42  ;;  %v1032_v55 = vpop.f32.mrb[6].mxu1 }
 0x147   : > { %v913_v56 = vadd.f32 %v912_v53, %v6711_v61  ;;  %v914_v57 = vpop.f32.mrb[7].mxu0  ;;  %v6770_v58 = vadd.f32 %v1032_v55, %v618_v43  ;;  %v1034_v60 = vpop.f32.mrb[7].mxu1  ;;  %v1141_v21 = vmul.f32 0.17677669, %v909_v48 }
 0x148   : > { %v915_v18 = vadd.f32 %v914_v57, %v6711_v61  ;;  %v5691_v19 = vpack.i.bf16 %v6767_v54, %v6765_v50  ;;  %v6775_v20 = vadd.f32 %v1034_v60, %v618_v43  ;;  %v1142_v59 = vmul.f32 0.17677669, %v911_v52  ;;  %v633_v57 = vpop.permute.xlu0 %632  ;;  %v638_v60 = vpop.permute.xlu1 %637 }
 0x149   : > { %v1143_v22 = vmul.f32 0.17677669, %v913_v56 }
 0x14a   : > { %v1144_v23 = vmul.f32 0.17677669, %v915_v18  ;;  %v5693_v25 = vpack.i.bf16 %v6775_v20, %v6770_v58 }
 0x14b   : > { %v1171_v29 = vpack.c.bf16 %v1143_v22, %v1141_v21 }
 0x14c   : > { %v1172_v30 = vpack.c.bf16 %v1144_v23, %v1142_v59  ;;  %v918_v31 = vpop.f32.mrb[8].mxu0  ;;  %v1038_v33 = vpop.f32.mrb[8].mxu1 }
 0x14d   : > { %1187 = vst [vmem:[#allocation2 + $0x10] sm:$0xff] %v1171_v29  ;;  %v919_v61 = vadd.f32 %v918_v31, %v6713_v62  ;;  %v920_v34 = vpop.f32.mrb[9].mxu0  ;;  %v6780_v37 = vadd.f32 %v1038_v33, %v623_v26  ;;  %v1040_v38 = vpop.f32.mrb[9].mxu1 }
 0x14e   : > { %1188 = vst [vmem:[#allocation2 + $0x18] sm:$0xff] %v1172_v30  ;;  %v921_v39 = vadd.f32 %v920_v34, %v6713_v62  ;;  %v922_v40 = vpop.f32.mrb[10].mxu0  ;;  %v6783_v42 = vadd.f32 %v1040_v38, %v623_v26  ;;  %v1042_v43 = vpop.f32.mrb[10].mxu1 }
 0x14f   : > { %v923_v44 = vadd.f32 %v922_v40, %v6715_v63  ;;  %v924_v45 = vpop.f32.mrb[11].mxu0  ;;  %v6786_v46 = vadd.f32 %v1042_v43, %v628_v27  ;;  %v1044_v47 = vpop.f32.mrb[11].mxu1  ;;  %v1145_v52 = vmul.f32 0.17677669, %v919_v61 }
 0x150   : > { %v925_v48 = vadd.f32 %v924_v45, %v6715_v63  ;;  %v5695_v49 = vpack.i.bf16 %v6783_v42, %v6780_v37  ;;  %v6791_v51 = vadd.f32 %v1044_v47, %v628_v27  ;;  %v1146_v62 = vmul.f32 0.17677669, %v921_v39 }
 0x151   : > { %v1147_v53 = vmul.f32 0.17677669, %v923_v44 }
 0x152   : > { %v1148_v55 = vmul.f32 0.17677669, %v925_v48  ;;  %v5697_v56 = vpack.i.bf16 %v6791_v51, %v6786_v46 }
 0x153   : > { %v1173_v18 = vpack.c.bf16 %v1147_v53, %v1145_v52  ;;  %v643_v53 = vpop.permute.xlu0 %642 }
 0x154   : > { %v1174_v21 = vpack.c.bf16 %v1148_v55, %v1146_v62  ;;  %v928_v22 = vpop.f32.mrb[12].mxu0  ;;  %v1048_v59 = vpop.f32.mrb[12].mxu1 }
 0x155   : > { %1189 = vst [vmem:[#allocation2 + $0x20] sm:$0xff] %v1173_v18  ;;  %v929_v63 = vadd.f32 %v928_v22, %v6717_v7  ;;  %v930_v23 = vpop.f32.mrb[13].mxu0  ;;  %v6796_v26 = vadd.f32 %v1048_v59, %v633_v57  ;;  %v1050_v27 = vpop.f32.mrb[13].mxu1 }
 0x156   : > { %1190 = vst [vmem:[#allocation2 + $0x28] sm:$0xff] %v1174_v21  ;;  %v931_v29 = vadd.f32 %v930_v23, %v6717_v7  ;;  %v932_v30 = vpop.f32.mrb[14].mxu0  ;;  %v6799_v31 = vadd.f32 %v1050_v27, %v633_v57  ;;  %v1052_v33 = vpop.f32.mrb[14].mxu1 }
 0x157   : > { %v933_v61 = vadd.f32 %v932_v30, %v6719_v0  ;;  %v934_v34 = vpop.f32.mrb[15].mxu0  ;;  %v6802_v38 = vadd.f32 %v1052_v33, %v638_v60  ;;  %v1054_v39 = vpop.f32.mrb[15].mxu1  ;;  %v1149_v45 = vmul.f32 0.17677669, %v929_v63 }
 0x158   : > { %v935_v40 = vadd.f32 %v934_v34, %v6719_v0  ;;  %v5699_v43 = vpack.i.bf16 %v6799_v31, %v6796_v26  ;;  %v6807_v44 = vadd.f32 %v1054_v39, %v638_v60  ;;  %v1150_v7 = vmul.f32 0.17677669, %v931_v29  ;;  %v648_v62 = vpop.permute.xlu1 %647 }
 0x159   : > { %v1151_v47 = vmul.f32 0.17677669, %v933_v61 }
 0x15a   : > { %v1152_v48 = vmul.f32 0.17677669, %v935_v40  ;;  %v5701_v52 = vpack.i.bf16 %v6807_v44, %v6802_v38 }
 0x15b   : > { %v1175_v55 = vpack.c.bf16 %v1151_v47, %v1149_v45 }
 0x15c   : > { %v1176_v57 = vpack.c.bf16 %v1152_v48, %v1150_v7  ;;  %v938_v18 = vpop.f32.mrb[16].mxu0  ;;  %v1058_v21 = vpop.f32.mrb[16].mxu1 }
 0x15d   : > { %1191 = vst [vmem:[#allocation2 + $0x30] sm:$0xff] %v1175_v55  ;;  %v939_v0 = vadd.f32 %v938_v18, %v6721_v1  ;;  %v1059_v22 = vadd.f32 %v1058_v21, %v643_v53  ;;  %v940_v59 = vpop.f32.mrb[17].mxu0  ;;  %v1060_v60 = vpop.f32.mrb[17].mxu1 }
 0x15e   : > { %1192 = vst [vmem:[#allocation2 + $0x38] sm:$0xff] %v1176_v57  ;;  %v941_v63 = vadd.f32 %v940_v59, %v6721_v1  ;;  %v942_v23 = vpop.f32.mrb[18].mxu0  ;;  %v1062_v27 = vpop.f32.mrb[18].mxu1  ;;  %v1061_v34 = vadd.f32 %v1060_v60, %v643_v53 }
 0x15f   : > { %v943_v29 = vadd.f32 %v942_v23, %v6723_v2  ;;  %v1063_v30 = vadd.f32 %v1062_v27, %v648_v62  ;;  %v944_v33 = vpop.f32.mrb[19].mxu0  ;;  %v1064_v61 = vpop.f32.mrb[19].mxu1  ;;  %v1153_v45 = vmul.f32 0.17677669, %v939_v0 }
 0x160   : > { %v945_v39 = vadd.f32 %v944_v33, %v6723_v2  ;;  %v1065_v40 = vadd.f32 %v1064_v61, %v648_v62  ;;  %v1154_v48 = vmul.f32 0.17677669, %v941_v63  ;;  %v653_v57 = vpop.permute.xlu0 %652  ;;  %v658_v21 = vpop.permute.xlu1 %657 }
 0x161   : > { %v1155_v47 = vmul.f32 0.17677669, %v943_v29  ;;  %v1297_v7 = vpack.c.bf16 %v1063_v30, %v1059_v22 }
 0x162   : > { %v1156_v55 = vmul.f32 0.17677669, %v945_v39  ;;  %v1298_v18 = vpack.c.bf16 %v1065_v40, %v1061_v34 }
 0x163   : > { %v1177_v1 = vpack.c.bf16 %v1155_v47, %v1153_v45  ;;  %1313 = vst [vmem:[#allocation4] sm:$0xff] %v1297_v7 }
 0x164   : > { %v1178_v59 = vpack.c.bf16 %v1156_v55, %v1154_v48  ;;  %1314 = vst [vmem:[#allocation4 + $0x8] sm:$0xff] %v1298_v18  ;;  %v948_v23 = vpop.f32.mrb[20].mxu0  ;;  %v1068_v27 = vpop.f32.mrb[20].mxu1 }
 0x165   : > { %1193 = vst [vmem:[#allocation2 + $0x40] sm:$0xff] %v1177_v1  ;;  %v949_v53 = vadd.f32 %v948_v23, %v6725_v3  ;;  %v950_v60 = vpop.f32.mrb[21].mxu0  ;;  %v1070_v2 = vpop.f32.mrb[21].mxu1  ;;  %v1069_v63 = vadd.f32 %v1068_v27, %v653_v57 }
 0x166   : > { %1194 = vst [vmem:[#allocation2 + $0x48] sm:$0xff] %v1178_v59  ;;  %v951_v62 = vadd.f32 %v950_v60, %v6725_v3  ;;  %v952_v0 = vpop.f32.mrb[22].mxu0  ;;  %v1072_v22 = vpop.f32.mrb[22].mxu1  ;;  %v1071_v34 = vadd.f32 %v1070_v2, %v653_v57 }
 0x167   : > { %v953_v29 = vadd.f32 %v952_v0, %v6727_v4  ;;  %v1073_v30 = vadd.f32 %v1072_v22, %v658_v21  ;;  %v954_v33 = vpop.f32.mrb[23].mxu0  ;;  %v1074_v61 = vpop.f32.mrb[23].mxu1  ;;  %v1157_v45 = vmul.f32 0.17677669, %v949_v53 }
 0x168   : > { %v955_v39 = vadd.f32 %v954_v33, %v6727_v4  ;;  %v1075_v40 = vadd.f32 %v1074_v61, %v658_v21  ;;  %v1158_v48 = vmul.f32 0.17677669, %v951_v62  ;;  %v663_v1 = vpop.permute.xlu0 %662  ;;  %v668_v3 = vpop.permute.xlu1 %667 }
 0x169   : > { %v1159_v47 = vmul.f32 0.17677669, %v953_v29  ;;  %v1299_v7 = vpack.c.bf16 %v1073_v30, %v1069_v63 }
 0x16a   : > { %v1160_v55 = vmul.f32 0.17677669, %v955_v39  ;;  %v1300_v18 = vpack.c.bf16 %v1075_v40, %v1071_v34 }
 0x16b   : > { %v1179_v59 = vpack.c.bf16 %v1159_v47, %v1157_v45  ;;  %1315 = vst [vmem:[#allocation4 + $0x10] sm:$0xff] %v1299_v7 }
 0x16c   : > { %v1180_v23 = vpack.c.bf16 %v1160_v55, %v1158_v48  ;;  %1316 = vst [vmem:[#allocation4 + $0x18] sm:$0xff] %v1300_v18  ;;  %v958_v27 = vpop.f32.mrb[24].mxu0  ;;  %v1078_v60 = vpop.f32.mrb[24].mxu1 }
 0x16d   : > { %1195 = vst [vmem:[#allocation2 + $0x50] sm:$0xff] %v1179_v59  ;;  %v959_v57 = vadd.f32 %v958_v27, %v6729_v5  ;;  %v960_v2 = vpop.f32.mrb[25].mxu0  ;;  %v1080_v4 = vpop.f32.mrb[25].mxu1  ;;  %v1079_v0 = vadd.f32 %v1078_v60, %v663_v1 }
 0x16e   : > { %1196 = vst [vmem:[#allocation2 + $0x58] sm:$0xff] %v1180_v23  ;;  %v961_v21 = vadd.f32 %v960_v2, %v6729_v5  ;;  %v962_v53 = vpop.f32.mrb[26].mxu0  ;;  %v1082_v62 = vpop.f32.mrb[26].mxu1  ;;  %v1081_v33 = vadd.f32 %v1080_v4, %v663_v1 }
 0x16f   : > { %v963_v22 = vadd.f32 %v962_v53, %v6731_v6  ;;  %v1083_v63 = vadd.f32 %v1082_v62, %v668_v3  ;;  %v964_v29 = vpop.f32.mrb[27].mxu0  ;;  %v1084_v30 = vpop.f32.mrb[27].mxu1  ;;  %v1161_v39 = vmul.f32 0.17677669, %v959_v57 }
 0x170   : > { %v965_v61 = vadd.f32 %v964_v29, %v6731_v6  ;;  %v1085_v34 = vadd.f32 %v1084_v30, %v668_v3  ;;  %v1162_v47 = vmul.f32 0.17677669, %v961_v21  ;;  %v673_v55 = vpop.permute.xlu0 %672  ;;  %v678_v5 = vpop.permute.xlu1 %677 }
 0x171   : > { %v1163_v40 = vmul.f32 0.17677669, %v963_v22  ;;  %v1301_v45 = vpack.c.bf16 %v1083_v63, %v1079_v0 }
 0x172   : > { %v1164_v7 = vmul.f32 0.17677669, %v965_v61  ;;  %v1302_v48 = vpack.c.bf16 %v1085_v34, %v1081_v33 }
 0x173   : > { %v1181_v18 = vpack.c.bf16 %v1163_v40, %v1161_v39  ;;  %1317 = vst [vmem:[#allocation4 + $0x20] sm:$0xff] %v1301_v45 }
 0x174   : > { %v1182_v59 = vpack.c.bf16 %v1164_v7, %v1162_v47  ;;  %1318 = vst [vmem:[#allocation4 + $0x28] sm:$0xff] %v1302_v48  ;;  %v968_v23 = vpop.f32.mrb[28].mxu0  ;;  %v1088_v27 = vpop.f32.mrb[28].mxu1 }
 0x175   : > { %1197 = vst [vmem:[#allocation2 + $0x60] sm:$0xff] %v1181_v18  ;;  %v969_v1 = vadd.f32 %v968_v23, %v6733_v8  ;;  %v970_v60 = vpop.f32.mrb[29].mxu0  ;;  %v1090_v6 = vpop.f32.mrb[29].mxu1  ;;  %v1089_v4 = vadd.f32 %v1088_v27, %v673_v55 }
 0x176   : > { %1198 = vst [vmem:[#allocation2 + $0x68] sm:$0xff] %v1182_v59  ;;  %v971_v3 = vadd.f32 %v970_v60, %v6733_v8  ;;  %v972_v57 = vpop.f32.mrb[30].mxu0  ;;  %v1092_v2 = vpop.f32.mrb[30].mxu1  ;;  %v1091_v22 = vadd.f32 %v1090_v6, %v673_v55 }
 0x177   : > { %v973_v21 = vadd.f32 %v972_v57, %v6735_v9  ;;  %v1093_v53 = vadd.f32 %v1092_v2, %v678_v5  ;;  %v974_v62 = vpop.f32.mrb[31].mxu0  ;;  %v1094_v0 = vpop.f32.mrb[31].mxu1  ;;  %v1165_v30 = vmul.f32 0.17677669, %v969_v1 }
 0x178   : > { %v975_v63 = vadd.f32 %v974_v62, %v6735_v9  ;;  %v1095_v29 = vadd.f32 %v1094_v0, %v678_v5  ;;  %v1166_v34 = vmul.f32 0.17677669, %v971_v3  ;;  %v683_v45 = vpop.permute.xlu0 %682  ;;  %v688_v8 = vpop.permute.xlu1 %687 }
 0x179   : > { %v1167_v33 = vmul.f32 0.17677669, %v973_v21  ;;  %v1303_v61 = vpack.c.bf16 %v1093_v53, %v1089_v4 }
 0x17a   : > { %v1168_v39 = vmul.f32 0.17677669, %v975_v63  ;;  %v1304_v40 = vpack.c.bf16 %v1095_v29, %v1091_v22 }
 0x17b   : > { %v1183_v47 = vpack.c.bf16 %v1167_v33, %v1165_v30  ;;  %1319 = vst [vmem:[#allocation4 + $0x30] sm:$0xff] %v1303_v61 }
 0x17c   : > { %v1184_v7 = vpack.c.bf16 %v1168_v39, %v1166_v34  ;;  %1320 = vst [vmem:[#allocation4 + $0x38] sm:$0xff] %v1304_v40  ;;  %v978_v48 = vpop.f32.mrb[32].mxu0  ;;  %v1098_v18 = vpop.f32.mrb[32].mxu1 }
 0x17d   : > { %1199 = vst [vmem:[#allocation2 + $0x70] sm:$0xff] %v1183_v47  ;;  %v979_v55 = vadd.f32 %v978_v48, %v6737_v10  ;;  %v980_v59 = vpop.f32.mrb[33].mxu0  ;;  %v1100_v9 = vpop.f32.mrb[33].mxu1  ;;  %v1099_v1 = vadd.f32 %v1098_v18, %v683_v45 }
 0x17e   : > { %1200 = vst [vmem:[#allocation2 + $0x78] sm:$0xff] %v1184_v7  ;;  %v981_v5 = vadd.f32 %v980_v59, %v6737_v10  ;;  %v982_v23 = vpop.f32.mrb[34].mxu0  ;;  %v1102_v27 = vpop.f32.mrb[34].mxu1  ;;  %v1101_v4 = vadd.f32 %v1100_v9, %v683_v45 }
 0x17f   : > { %v983_v60 = vadd.f32 %v982_v23, %v6739_v11  ;;  %v1103_v6 = vadd.f32 %v1102_v27, %v688_v8  ;;  %v984_v3 = vpop.f32.mrb[35].mxu0  ;;  %v1104_v57 = vpop.f32.mrb[35].mxu1 }
 0x180   : > { %v5671_v2 = vpack.i.bf16 %v981_v5, %v979_v55  ;;  %v985_v21 = vadd.f32 %v984_v3, %v6739_v11  ;;  %v1105_v53 = vadd.f32 %v1104_v57, %v688_v8  ;;  %v693_v63 = vpop.permute.xlu0 %692  ;;  %v698_v29 = vpop.permute.xlu1 %697 }
 0x181   : > { %v1305_v62 = vpack.c.bf16 %v1103_v6, %v1099_v1 }
 0x182   : > { %v5673_v0 = vpack.i.bf16 %v985_v21, %v983_v60  ;;  %v1306_v22 = vpack.c.bf16 %v1105_v53, %v1101_v4  ;;  %5672 = vxpose.xlu0.b32.start [1/16] %v5671_v2, 128 }
 0x183   : > { %1321 = vst [vmem:[#allocation4 + $0x40] sm:$0xff] %v1305_v62 }
 0x184   : > { %1322 = vst [vmem:[#allocation4 + $0x48] sm:$0xff] %v1306_v22  ;;  %v988_v10 = vpop.f32.mrb[36].mxu0  ;;  %v1108_v30 = vpop.f32.mrb[36].mxu1 }
 0x185   : > { %v989_v33 = vadd.f32 %v988_v10, %v6741_v12  ;;  %v990_v61 = vpop.f32.mrb[37].mxu0  ;;  %v1110_v34 = vpop.f32.mrb[37].mxu1  ;;  %v1109_v11 = vadd.f32 %v1108_v30, %v693_v63 }
 0x186   : > { %v991_v39 = vadd.f32 %v990_v61, %v6741_v12  ;;  %v992_v40 = vpop.f32.mrb[38].mxu0  ;;  %v1112_v45 = vpop.f32.mrb[38].mxu1  ;;  %5674 = vxpose.xlu0.b32.cont [2/16] %v5673_v0, 128  ;;  %v1111_v55 = vadd.f32 %v1110_v34, %v693_v63 }
 0x187   : > { %v993_v8 = vadd.f32 %v992_v40, %v6743_v13  ;;  %v1113_v47 = vadd.f32 %v1112_v45, %v698_v29  ;;  %v994_v7 = vpop.f32.mrb[39].mxu0  ;;  %v1114_v48 = vpop.f32.mrb[39].mxu1 }
 0x188   : > { %v5675_v18 = vpack.i.bf16 %v991_v39, %v989_v33  ;;  %v995_v59 = vadd.f32 %v994_v7, %v6743_v13  ;;  %v1115_v9 = vadd.f32 %v1114_v48, %v698_v29  ;;  %v703_v1 = vpop.permute.xlu0 %702  ;;  %v708_v12 = vpop.permute.xlu1 %707 }
 0x189   : > { %v1307_v5 = vpack.c.bf16 %v1113_v47, %v1109_v11 }
 0x18a   : > { %v5677_v23 = vpack.i.bf16 %v995_v59, %v993_v8  ;;  %v1308_v27 = vpack.c.bf16 %v1115_v9, %v1111_v55  ;;  %5676 = vxpose.xlu0.b32.cont [3/16] %v5675_v18, 128 }
 0x18b   : > { %1323 = vst [vmem:[#allocation4 + $0x50] sm:$0xff] %v1307_v5 }
 0x18c   : > { %1324 = vst [vmem:[#allocation4 + $0x58] sm:$0xff] %v1308_v27  ;;  %v998_v60 = vpop.f32.mrb[40].mxu0  ;;  %v1118_v6 = vpop.f32.mrb[40].mxu1 }
 0x18d   : > { %v999_v3 = vadd.f32 %v998_v60, %v6745_v14  ;;  %v1000_v57 = vpop.f32.mrb[41].mxu0  ;;  %v1120_v2 = vpop.f32.mrb[41].mxu1  ;;  %v1119_v13 = vadd.f32 %v1118_v6, %v703_v1 }
 0x18e   : > { %v1001_v4 = vadd.f32 %v1000_v57, %v6745_v14  ;;  %v1002_v21 = vpop.f32.mrb[42].mxu0  ;;  %v1122_v53 = vpop.f32.mrb[42].mxu1  ;;  %5678 = vxpose.xlu0.b32.cont [4/16] %v5677_v23, 128  ;;  %v1121_v10 = vadd.f32 %v1120_v2, %v703_v1 }
 0x18f   : > { %v1003_v62 = vadd.f32 %v1002_v21, %v6747_v15  ;;  %v1123_v0 = vadd.f32 %v1122_v53, %v708_v12  ;;  %v1004_v22 = vpop.f32.mrb[43].mxu0  ;;  %v1124_v63 = vpop.f32.mrb[43].mxu1 }
 0x190   : > { %v5679_v29 = vpack.i.bf16 %v1001_v4, %v999_v3  ;;  %v1005_v30 = vadd.f32 %v1004_v22, %v6747_v15  ;;  %v1125_v33 = vadd.f32 %v1124_v63, %v708_v12  ;;  %v713_v40 = vpop.permute.xlu0 %712  ;;  %v718_v14 = vpop.permute.xlu1 %717 }
 0x191   : > { %v1309_v61 = vpack.c.bf16 %v1123_v0, %v1119_v13 }
 0x192   : > { %v5681_v34 = vpack.i.bf16 %v1005_v30, %v1003_v62  ;;  %v1310_v39 = vpack.c.bf16 %v1125_v33, %v1121_v10  ;;  %5680 = vxpose.xlu0.b32.cont [5/16] %v5679_v29, 128 }
 0x193   : > { %1325 = vst [vmem:[#allocation4 + $0x60] sm:$0xff] %v1309_v61 }
 0x194   : > { %1326 = vst [vmem:[#allocation4 + $0x68] sm:$0xff] %v1310_v39  ;;  %v1008_v45 = vpop.f32.mrb[44].mxu0  ;;  %v1128_v11 = vpop.f32.mrb[44].mxu1 }
 0x195   : > { %v1009_v8 = vadd.f32 %v1008_v45, %v6749_v16  ;;  %v1010_v47 = vpop.f32.mrb[45].mxu0  ;;  %v1130_v7 = vpop.f32.mrb[45].mxu1  ;;  %v1129_v15 = vadd.f32 %v1128_v11, %v713_v40 }
 0x196   : > { %v1011_v48 = vadd.f32 %v1010_v47, %v6749_v16  ;;  %v1012_v18 = vpop.f32.mrb[46].mxu0  ;;  %v1132_v55 = vpop.f32.mrb[46].mxu1  ;;  %5682 = vxpose.xlu0.b32.cont [6/16] %v5681_v34, 128  ;;  %v1131_v1 = vadd.f32 %v1130_v7, %v713_v40  ;;  %v6263_v16 = vmov 0.0  }
 0x197   : > { %v1013_v59 = vadd.f32 %v1012_v18, %v6751_v17  ;;  %v1133_v9 = vadd.f32 %v1132_v55, %v718_v14  ;;  %v1014_v5 = vpop.f32.mrb[47].mxu0  ;;  %v1134_v23 = vpop.f32.mrb[47].mxu1  ;;  %1330 = vst.msk [vmem:[#allocation6] sm:$0xff] %vm1329_vm0, %v6263_v16  ;;  %1331 = vst.msk [vmem:[#allocation6 + $0x8] sm:$0xff] %vm1329_vm0, %v6263_v16 }
 0x198   : > { %v5683_v27 = vpack.i.bf16 %v1011_v48, %v1009_v8  ;;  %v1015_v12 = vadd.f32 %v1014_v5, %v6751_v17  ;;  %v1135_v60 = vadd.f32 %v1134_v23, %v718_v14  ;;  %1332 = vst.msk [vmem:[#allocation6 + $0x10] sm:$0xff] %vm1329_vm0, %v6263_v16  ;;  %1333 = vst.msk [vmem:[#allocation6 + $0x18] sm:$0xff] %vm1329_vm0, %v6263_v16 }
 0x199   : > { %v1311_v6 = vpack.c.bf16 %v1133_v9, %v1129_v15  ;;  %1334 = vst.msk [vmem:[#allocation6 + $0x20] sm:$0xff] %vm1329_vm0, %v6263_v16  ;;  %1335 = vst.msk [vmem:[#allocation6 + $0x28] sm:$0xff] %vm1329_vm0, %v6263_v16 }
 0x19a   : > { %v5685_v3 = vpack.i.bf16 %v1015_v12, %v1013_v59  ;;  %v1312_v57 = vpack.c.bf16 %v1135_v60, %v1131_v1  ;;  %5684 = vxpose.xlu0.b32.cont [7/16] %v5683_v27, 128  ;;  %1336 = vst.msk [vmem:[#allocation6 + $0x30] sm:$0xff] %vm1329_vm0, %v6263_v16  ;;  %1337 = vst.msk [vmem:[#allocation6 + $0x38] sm:$0xff] %vm1329_vm0, %v6263_v16 }
 0x19b   : > { %1327 = vst [vmem:[#allocation4 + $0x70] sm:$0xff] %v1311_v6  ;;  %1338 = vst.msk [vmem:[#allocation6 + $0x40] sm:$0xff] %vm1329_vm0, %v6263_v16 }
 0x19c   : > { %1328 = vst [vmem:[#allocation4 + $0x78] sm:$0xff] %v1312_v57  ;;  %1339 = vst.msk [vmem:[#allocation6 + $0x48] sm:$0xff] %vm1329_vm0, %v6263_v16 }
 0x19d   : > { %1340 = vst.msk [vmem:[#allocation6 + $0x50] sm:$0xff] %vm1329_vm0, %v6263_v16  ;;  %1341 = vst.msk [vmem:[#allocation6 + $0x58] sm:$0xff] %vm1329_vm0, %v6263_v16 }
 0x19e   : > { %5686 = vxpose.xlu0.b32.cont [8/16] %v5685_v3, 128  ;;  %1342 = vst.msk [vmem:[#allocation6 + $0x60] sm:$0xff] %vm1329_vm0, %v6263_v16  ;;  %1343 = vst.msk [vmem:[#allocation6 + $0x68] sm:$0xff] %vm1329_vm0, %v6263_v16 }
 0x19f   : > { %1344 = vst.msk [vmem:[#allocation6 + $0x70] sm:$0xff] %vm1329_vm0, %v6263_v16  ;;  %1345 = vst.msk [vmem:[#allocation6 + $0x78] sm:$0xff] %vm1329_vm0, %v6263_v16 }
 0x1a2   : > { %5688 = vxpose.xlu0.b32.cont [9/16] %v5687_v35, 128 }
 0x1a6   : > { %5690 = vxpose.xlu0.b32.cont [10/16] %v5689_v41, 128 }
 0x1aa   : > { %5692 = vxpose.xlu0.b32.cont [11/16] %v5691_v19, 128 }
 0x1ae   : > { %5694 = vxpose.xlu0.b32.cont [12/16] %v5693_v25, 128 }
 0x1b2   : > { %5696 = vxpose.xlu0.b32.cont [13/16] %v5695_v49, 128 }
 0x1b6   : > { %5698 = vxpose.xlu0.b32.cont [14/16] %v5697_v56, 128 }
 0x1ba   : > { %5700 = vxpose.xlu0.b32.cont [15/16] %v5699_v43, 128 }
 0x1be   : > { %5702 = vxpose.xlu0.b32.end [16/16] %v5701_v52, 128 }
 0x202   : > { %v5703_v17 = vpop.trf.xlu0 }
 0x203   : > { %v5707_v24 = vunpack.i.h.bf16 %v5703_v17  ;;  %v5704_v28 = vunpack.i.l.bf16 %v5703_v17 }
 0x206   : > { %v5708_v32 = vpop.trf.xlu0 }
 0x207   : > { %v5712_v35 = vunpack.i.h.bf16 %v5708_v32  ;;  %v5709_v36 = vunpack.i.l.bf16 %v5708_v32 }
 0x209   : > { %v1265_v41 = vpack.c.bf16 %v5709_v36, %v5704_v28  ;;  %v1273_v50 = vpack.c.bf16 %v5712_v35, %v5707_v24 }
 0x20a   : > { %v5713_v54 = vpop.trf.xlu0 }
 0x20b   : > { %1281 = vst [vmem:[#allocation3] sm:$0xff] %v1265_v41  ;;  %1289 = vst [vmem:[#allocation3 + $0x40] sm:$0xff] %v1273_v50  ;;  %v5717_v58 = vunpack.i.h.bf16 %v5713_v54  ;;  %v5714_v19 = vunpack.i.l.bf16 %v5713_v54 }
 0x20e   : > { %v5718_v20 = vpop.trf.xlu0 }
 0x20f   : > { %v5722_v25 = vunpack.i.h.bf16 %v5718_v20  ;;  %v5719_v37 = vunpack.i.l.bf16 %v5718_v20 }
 0x211   : > { %v1266_v42 = vpack.c.bf16 %v5719_v37, %v5714_v19  ;;  %v1274_v46 = vpack.c.bf16 %v5722_v25, %v5717_v58 }
 0x212   : > { %v5723_v49 = vpop.trf.xlu0 }
 0x213   : > { %1282 = vst [vmem:[#allocation3 + $0x8] sm:$0xff] %v1266_v42  ;;  %1290 = vst [vmem:[#allocation3 + $0x48] sm:$0xff] %v1274_v46  ;;  %v5727_v51 = vunpack.i.h.bf16 %v5723_v49  ;;  %v5724_v56 = vunpack.i.l.bf16 %v5723_v49 }
 0x216   : > { %v5728_v26 = vpop.trf.xlu0 }
 0x217   : > { %v5732_v31 = vunpack.i.h.bf16 %v5728_v26  ;;  %v5729_v38 = vunpack.i.l.bf16 %v5728_v26 }
 0x219   : > { %v1267_v43 = vpack.c.bf16 %v5729_v38, %v5724_v56  ;;  %v1275_v44 = vpack.c.bf16 %v5732_v31, %v5727_v51 }
 0x21a   : > { %v5733_v52 = vpop.trf.xlu0 }
 0x21b   : > { %1283 = vst [vmem:[#allocation3 + $0x10] sm:$0xff] %v1267_v43  ;;  %1291 = vst [vmem:[#allocation3 + $0x50] sm:$0xff] %v1275_v44  ;;  %v5737_v2 = vunpack.i.h.bf16 %v5733_v52  ;;  %v5734_v4 = vunpack.i.l.bf16 %v5733_v52 }
 0x21e   : > { %v5738_v21 = vpop.trf.xlu0 }
 0x21f   : > { %v5742_v53 = vunpack.i.h.bf16 %v5738_v21  ;;  %v5739_v13 = vunpack.i.l.bf16 %v5738_v21 }
 0x221   : > { %v1268_v62 = vpack.c.bf16 %v5739_v13, %v5734_v4  ;;  %v1276_v0 = vpack.c.bf16 %v5742_v53, %v5737_v2 }
 0x222   : > { %v5743_v22 = vpop.trf.xlu0 }
 0x223   : > { %1284 = vst [vmem:[#allocation3 + $0x18] sm:$0xff] %v1268_v62  ;;  %1292 = vst [vmem:[#allocation3 + $0x58] sm:$0xff] %v1276_v0  ;;  %v5747_v63 = vunpack.i.h.bf16 %v5743_v22  ;;  %v5744_v29 = vunpack.i.l.bf16 %v5743_v22 }
 0x226   : > { %v5748_v10 = vpop.trf.xlu0 }
 0x227   : > { %v5752_v30 = vunpack.i.h.bf16 %v5748_v10  ;;  %v5749_v33 = vunpack.i.l.bf16 %v5748_v10 }
 0x229   : > { %v1269_v61 = vpack.c.bf16 %v5749_v33, %v5744_v29  ;;  %v1277_v34 = vpack.c.bf16 %v5752_v30, %v5747_v63 }
 0x22a   : > { %v5753_v39 = vpop.trf.xlu0 }
 0x22b   : > { %1285 = vst [vmem:[#allocation3 + $0x20] sm:$0xff] %v1269_v61  ;;  %1293 = vst [vmem:[#allocation3 + $0x60] sm:$0xff] %v1277_v34  ;;  %v5757_v40 = vunpack.i.h.bf16 %v5753_v39  ;;  %v5754_v14 = vunpack.i.l.bf16 %v5753_v39 }
 0x22e   : > { %v5758_v45 = vpop.trf.xlu0 }
 0x22f   : > { %v5762_v11 = vunpack.i.h.bf16 %v5758_v45  ;;  %v5759_v8 = vunpack.i.l.bf16 %v5758_v45 }
 0x231   : > { %v1270_v47 = vpack.c.bf16 %v5759_v8, %v5754_v14  ;;  %v1278_v7 = vpack.c.bf16 %v5762_v11, %v5757_v40 }
 0x232   : > { %v5763_v48 = vpop.trf.xlu0 }
 0x233   : > { %1286 = vst [vmem:[#allocation3 + $0x28] sm:$0xff] %v1270_v47  ;;  %1294 = vst [vmem:[#allocation3 + $0x68] sm:$0xff] %v1278_v7  ;;  %v5767_v18 = vunpack.i.h.bf16 %v5763_v48  ;;  %v5764_v55 = vunpack.i.l.bf16 %v5763_v48 }
 0x236   : > { %v5768_v15 = vpop.trf.xlu0 }
 0x237   : > { %v5772_v59 = vunpack.i.h.bf16 %v5768_v15  ;;  %v5769_v9 = vunpack.i.l.bf16 %v5768_v15 }
 0x239   : > { %v1271_v5 = vpack.c.bf16 %v5769_v9, %v5764_v55  ;;  %v1279_v23 = vpack.c.bf16 %v5772_v59, %v5767_v18 }
 0x23a   : > { %v5773_v27 = vpop.trf.xlu0 }
 0x23b   : > { %1287 = vst [vmem:[#allocation3 + $0x30] sm:$0xff] %v1271_v5  ;;  %1295 = vst [vmem:[#allocation3 + $0x70] sm:$0xff] %v1279_v23  ;;  %v5777_v1 = vunpack.i.h.bf16 %v5773_v27  ;;  %v5774_v12 = vunpack.i.l.bf16 %v5773_v27 }
 0x23e   : > { %v5778_v60 = vpop.trf.xlu0 }
 0x23f   : > { %v5782_v6 = vunpack.i.h.bf16 %v5778_v60  ;;  %v5779_v3 = vunpack.i.l.bf16 %v5778_v60 }
 0x241   : > { %v1272_v57 = vpack.c.bf16 %v5779_v3, %v5774_v12  ;;  %v1280_v16 = vpack.c.bf16 %v5782_v6, %v5777_v1 }
 0x243   : > { %1288 = vst [vmem:[#allocation3 + $0x38] sm:$0xff] %v1272_v57  ;;  %1296 = vst [vmem:[#allocation3 + $0x78] sm:$0xff] %v1280_v16 }
 0x244 PF: > { %s4856_s17 = sshll.u32 %s6241_s30, 7  ;;  %v6884_v17 = vld [vmem:[#allocation3] sm:$0xff]  ;;  %vm1373_vm1 = vcmask 261120   ;;  %v6892_v28 = vld [vmem:[#allocation3 + $0x10] sm:$0xff]  ;;  %s6264_s22 = smov 96   ;;  %v6905_v36 = vld [vmem:[#allocation3 + $0x8] sm:$0xff] }
 0x245   : > { %v6886_v24 = vld [vmem:[#allocation3 + $0x40] sm:$0xff]  ;;  %s1347_s25 = sshra.s32 %s4856_s17, 7  ;;  %5208 = vmatprep.mubr.msk.bf16.mxu0 %vm1373_vm1, %v6884_v17  ;;  %1848 = vrot.lane.b32.xlu0 %v6884_v17, %s6264_s22  ;;  %v6907_v41 = vld [vmem:[#allocation3 + $0x18] sm:$0xff]  ;;  %v6909_v50 = vld [vmem:[#allocation3 + $0x48] sm:$0xff]  ;;  %s6265_s21 = smov 64   ;;  %vm3685_vm2 = vcmask 7168  }
 0x246   : > { %5224 = vmatprep.mubr.msk.bf16.mxu1 %vm1373_vm1, %v6886_v24  ;;  %s6894_s24 = sshll.u32 %s1347_s25, 3  ;;  %1852 = vrot.lane.b32.xlu1 %v6892_v28, %s6264_s22  ;;  %v6915_v54 = vld [vmem:[#allocation3 + $0x50] sm:$0xff]  ;;  %v6917_v58 = vld [vmem:[#allocation3 + $0x20] sm:$0xff]  ;;  %v6919_v19 = vld [vmem:[#allocation3 + $0x28] sm:$0xff]  ;;  %s6266_s11 = smov 32  }
 0x247   : > { %s6901_s14 = scalar_lea.vmem [#allocation2], %s6894_s24  ;;  %v6933_v20 = vld [vmem:[#allocation3 + $0x30] sm:$0xff]  ;;  %v6941_v37 = vld [vmem:[#allocation3 + $0x58] sm:$0xff]  ;;  %v6943_v42 = vld [vmem:[#allocation3 + $0x60] sm:$0xff]  ;;  %p4932_p10 = scmp.ne.s32.totalorder %s6241_s30, 1 }
 0x248   : > { %v1351_v32 = vld [vmem:[%s6901_s14] sm:$0xff]  ;;  %v1352_v35 = vld [vmem:[%s6901_s14 + $0x10] sm:$0xff]  ;;  %v6961_v46 = vld [vmem:[#allocation3 + $0x68] sm:$0xff] }
 0x249   : > { %5204 = vmatprep.subr.bf16.mxu0 %v1351_v32  ;;  %5572 = vmatprep.subr.bf16.mxu1 %v1351_v32  ;;  %8884 = vst [vmem:[#allocation16_spill] sm:$0xff] %v6961_v46  ;;  %v6963_v49 = vld [vmem:[#allocation3 + $0x70] sm:$0xff]  ;;  %v1370_v29 = vld [vmem:[#allocation4 + $0x8] sm:$0xff] }
 0x24a   : > { %5205 = vmatpush3.bf16.msra.mxu0 %v1351_v32  ;;  %5574 = vmatpush3.bf16.msra.mxu1 %v1351_v32  ;;  %v6935_v25 = vld [vmem:[#allocation3 + $0x38] sm:$0xff]  ;;  %8885 = vst [vmem:[#allocation17_spill] sm:$0xff] %v6963_v49 }
 0x24b   : > { %5206 = vmatprep.subr.bf16.mxu0 %v1352_v35  ;;  %5573 = vmatprep.subr.bf16.mxu1 %v1352_v35  ;;  %v6977_v51 = vld [vmem:[#allocation3 + $0x78] sm:$0xff] }
 0x24c   : > { %1850 = vrot.lane.b32.xlu0 %v6905_v36, %s6264_s22  ;;  %1854 = vrot.lane.b32.xlu1 %v6907_v41, %s6264_s22  ;;  %8886 = vst [vmem:[#allocation18_spill] sm:$0xff] %v6977_v51 }
 0x24e   : > { %5207 = vmatpush3.bf16.msra.mxu0 %v1352_v35  ;;  %5575 = vmatpush3.bf16.msra.mxu1 %v1352_v35 }
 0x250   : > { %1856 = vrot.lane.b32.xlu0 %v6917_v58, %s6264_s22  ;;  %1858 = vrot.lane.b32.xlu1 %v6919_v19, %s6264_s22 }
 0x251   : > { %5209 = vmatmul.mubr.msk.bf16.vlgmr.msra.gmra.mrb[0].mxu0 %vm1373_vm1, %v6905_v36  ;;  %5225 = vmatmul.mubr.msk.bf16.vlgmr.msra.gmra.mrb[0].mxu1 %vm1373_vm1, %v6909_v50 }
 0x252   : > { %5212 = vmatprep.mubr.msk.bf16.mxu0 %vm1373_vm1, %v6892_v28  ;;  %5228 = vmatprep.mubr.msk.bf16.mxu1 %vm1373_vm1, %v6915_v54 }
 0x254   : > { %1860 = vrot.lane.b32.xlu0 %v6933_v20, %s6264_s22  ;;  %1862 = vrot.lane.b32.xlu1 %v6935_v25, %s6264_s22 }
 0x258   : > { %1864 = vrot.lane.b32.xlu0 %v6886_v24, %s6264_s22  ;;  %1866 = vrot.lane.b32.xlu1 %v6909_v50, %s6264_s22 }
 0x259   : > { %5213 = vmatmul.mubr.msk.bf16.gmra.mrb[4].mxu0 %vm1373_vm1, %v6907_v41  ;;  %5229 = vmatmul.mubr.msk.bf16.gmra.mrb[4].mxu1 %vm1373_vm1, %v6941_v37 }
 0x25a   : > { %5216 = vmatprep.mubr.msk.bf16.mxu0 %vm1373_vm1, %v6917_v58  ;;  %5232 = vmatprep.mubr.msk.bf16.mxu1 %vm1373_vm1, %v6943_v42 }
 0x25c   : > { %1868 = vrot.lane.b32.xlu0 %v6915_v54, %s6264_s22  ;;  %1870 = vrot.lane.b32.xlu1 %v6941_v37, %s6264_s22 }
 0x260   : > { %1872 = vrot.lane.b32.xlu0 %v6943_v42, %s6264_s22  ;;  %1874 = vrot.lane.b32.xlu1 %v6961_v46, %s6264_s22 }
 0x261   : > { %5217 = vmatmul.mubr.msk.bf16.gmra.mrb[8].mxu0 %vm1373_vm1, %v6919_v19  ;;  %5233 = vmatmul.mubr.msk.bf16.gmra.mrb[8].mxu1 %vm1373_vm1, %v6961_v46 }
 0x262   : > { %5220 = vmatprep.mubr.msk.bf16.mxu0 %vm1373_vm1, %v6933_v20  ;;  %5236 = vmatprep.mubr.msk.bf16.mxu1 %vm1373_vm1, %v6963_v49 }
 0x264   : > { %1876 = vrot.lane.b32.xlu0 %v6963_v49, %s6264_s22  ;;  %1878 = vrot.lane.b32.xlu1 %v6977_v51, %s6264_s22 }
 0x268   : > { %2338 = vrot.lane.b32.xlu0 %v6884_v17, %s6265_s21  ;;  %2340 = vrot.lane.b32.xlu1 %v6905_v36, %s6265_s21  ;;  %v8892_v17 = vld [vmem:[#allocation16_spill] sm:$0xff]  ;;  %v8894_v36 = vld [vmem:[#allocation18_spill] sm:$0xff] }
 0x269   : > { %5221 = vmatmul.mubr.msk.bf16.gmra.mrb[12].mxu0 %vm1373_vm1, %v6935_v25  ;;  %5237 = vmatmul.mubr.msk.bf16.gmra.mrb[12].mxu1 %vm1373_vm1, %v6977_v51 }
 0x26a   : > { %1801 = vmatprep.mubr.bf16.mxu1 %v1370_v29 }
 0x26c   : > { %2342 = vrot.lane.b32.xlu0 %v6892_v28, %s6265_s21  ;;  %2344 = vrot.lane.b32.xlu1 %v6907_v41, %s6265_s21  ;;  %v8893_v28 = vld [vmem:[#allocation17_spill] sm:$0xff] }
 0x270   : > { %2346 = vrot.lane.b32.xlu0 %v6917_v58, %s6265_s21  ;;  %2348 = vrot.lane.b32.xlu1 %v6919_v19, %s6265_s21 }
 0x274   : > { %2350 = vrot.lane.b32.xlu0 %v6933_v20, %s6265_s21  ;;  %2352 = vrot.lane.b32.xlu1 %v6935_v25, %s6265_s21 }
 0x278   : > { %2354 = vrot.lane.b32.xlu0 %v6886_v24, %s6265_s21  ;;  %2356 = vrot.lane.b32.xlu1 %v6909_v50, %s6265_s21 }
 0x27c   : > { %2358 = vrot.lane.b32.xlu0 %v6915_v54, %s6265_s21  ;;  %2360 = vrot.lane.b32.xlu1 %v6941_v37, %s6265_s21 }
 0x280   : > { %2362 = vrot.lane.b32.xlu0 %v6943_v42, %s6265_s21  ;;  %2364 = vrot.lane.b32.xlu1 %v8892_v17, %s6265_s21 }
 0x284   : > { %2366 = vrot.lane.b32.xlu0 %v8893_v28, %s6265_s21  ;;  %2368 = vrot.lane.b32.xlu1 %v8894_v36, %s6265_s21 }
 0x324   : > { %v6987_v56 = vpop.f32.mrb[0].mxu0  ;;  %v6989_v26 = vpop.f32.mrb[0].mxu1 }
 0x325   : > { %v6991_v31 = vpop.f32.mrb[1].mxu0  ;;  %v6993_v38 = vpop.f32.mrb[1].mxu1 }
 0x326   : > { %v6995_v43 = vpop.f32.mrb[2].mxu0  ;;  %v6997_v44 = vpop.f32.mrb[2].mxu1 }
 0x327   : > { %v6999_v52 = vpop.f32.mrb[3].mxu0  ;;  %v7001_v2 = vpop.f32.mrb[3].mxu1 }
 0x32c   : > { %v7003_v4 = vpop.f32.mrb[4].mxu0  ;;  %v7005_v21 = vpop.f32.mrb[4].mxu1 }
 0x32d   : > { %v1585_v53 = vmax.f32 %v6987_v56, %v7003_v4  ;;  %v7009_v13 = vpop.f32.mrb[5].mxu0  ;;  %v7011_v62 = vpop.f32.mrb[5].mxu1 }
 0x32e   : > { %v1583_v0 = vmax.f32 %v6991_v31, %v7009_v13  ;;  %v7015_v22 = vpop.f32.mrb[6].mxu0  ;;  %v7017_v63 = vpop.f32.mrb[6].mxu1 }
 0x32f   : > { %v1586_v10 = vmax.f32 %v6995_v43, %v7015_v22  ;;  %v7021_v30 = vpop.f32.mrb[7].mxu0  ;;  %v7023_v33 = vpop.f32.mrb[7].mxu1 }
 0x330   : > { %v1584_v61 = vmax.f32 %v6999_v52, %v7021_v30 }
 0x334   : > { %v7027_v34 = vpop.f32.mrb[8].mxu0  ;;  %v7029_v39 = vpop.f32.mrb[8].mxu1 }
 0x335   : > { %v1589_v40 = vmax.f32 %v1585_v53, %v7027_v34  ;;  %v7032_v14 = vpop.f32.mrb[9].mxu0  ;;  %v7034_v45 = vpop.f32.mrb[9].mxu1 }
 0x336   : > { %v1587_v11 = vmax.f32 %v1583_v0, %v7032_v14  ;;  %v7037_v8 = vpop.f32.mrb[10].mxu0  ;;  %v7039_v47 = vpop.f32.mrb[10].mxu1 }
 0x337   : > { %v1590_v7 = vmax.f32 %v1586_v10, %v7037_v8  ;;  %v7042_v48 = vpop.f32.mrb[11].mxu0  ;;  %v7044_v18 = vpop.f32.mrb[11].mxu1 }
 0x338   : > { %v1588_v55 = vmax.f32 %v1584_v61, %v7042_v48 }
 0x33c   : > { %v7047_v15 = vpop.f32.mrb[12].mxu0  ;;  %v7049_v59 = vpop.f32.mrb[12].mxu1 }
 0x33d   : > { %v1593_v9 = vmax.f32 %v1589_v40, %v7047_v15  ;;  %v7052_v5 = vpop.f32.mrb[13].mxu0  ;;  %v7054_v23 = vpop.f32.mrb[13].mxu1 }
 0x33e   : > { %v1591_v27 = vmax.f32 %v1587_v11, %v7052_v5  ;;  %v7057_v1 = vpop.f32.mrb[14].mxu0  ;;  %v7059_v12 = vpop.f32.mrb[14].mxu1 }
 0x33f   : > { %v1597_v60 = vmax.f32 %v1593_v9, %v6989_v26  ;;  %v1594_v6 = vmax.f32 %v1590_v7, %v7057_v1  ;;  %v7063_v3 = vpop.f32.mrb[15].mxu0  ;;  %v7065_v57 = vpop.f32.mrb[15].mxu1 }
 0x340   : > { %v1595_v16 = vmax.f32 %v1591_v27, %v6993_v38  ;;  %v1592_v32 = vmax.f32 %v1588_v55, %v7063_v3 }
 0x341   : > { %v1598_v35 = vmax.f32 %v1594_v6, %v6997_v44  ;;  %v1601_v53 = vmax.f32 %v1597_v60, %v7005_v21 }
 0x342   : > { %v1596_v0 = vmax.f32 %v1592_v32, %v7001_v2  ;;  %v1599_v29 = vmax.f32 %v1595_v16, %v7011_v62 }
 0x343   : > { %v1605_v10 = vmax.f32 %v1601_v53, %v7029_v39  ;;  %v1602_v61 = vmax.f32 %v1598_v35, %v7017_v63 }
 0x344   : > { %v1603_v40 = vmax.f32 %v1599_v29, %v7034_v45  ;;  %v1600_v11 = vmax.f32 %v1596_v0, %v7023_v33 }
 0x345   : > { %v1609_v7 = vmax.f32 %v1605_v10, %v7049_v59  ;;  %v1606_v55 = vmax.f32 %v1602_v61, %v7039_v47 }
 0x346   : > { %v1607_v9 = vmax.f32 %v1603_v40, %v7054_v23  ;;  %v1604_v27 = vmax.f32 %v1600_v11, %v7044_v18 }
 0x347   : > { %v1610_v60 = vmax.f32 %v1606_v55, %v7059_v12 }
 0x348   : > { %v1608_v6 = vmax.f32 %v1604_v27, %v7065_v57 }
 0x349   : > { %v1612_v16 = vmax.f32 %v1609_v7, %v1610_v60 }
 0x34a   : > { %v1611_v32 = vmax.f32 %v1607_v9, %v1608_v6 }
 0x34c   : > { %v1613_v53 = vmax.f32 %v1611_v32, %v1612_v16 }
 0x34e   : > { %v1614_v35 = vrot.slane %v1613_v53, 4 }
 0x350   : > { %v1615_v51 = vmax.f32 %v1613_v53, %v1614_v35 }
 0x352   : > { %v1616_v29 = vrot.slane %v1615_v51, 2 }
 0x354   : > { %v1617_v49 = vmax.f32 %v1615_v51, %v1616_v29 }
 0x356   : > { %v1618_v0 = vrot.slane %v1617_v49, 1 }
 0x358   : > { %v7083_v46 = vmax.f32 %v1617_v49, %v1618_v0 }
 0x35a   : > { %v1620_v10 = vsub.f32 %v6991_v31, %v7083_v46  ;;  %v1621_v61 = vsub.f32 %v6999_v52, %v7083_v46  ;;  %v1622_v40 = vsub.f32 %v6987_v56, %v7083_v46  ;;  %v1623_v11 = vsub.f32 %v6995_v43, %v7083_v46 }
 0x35b   : > { %v1624_v7 = vsub.f32 %v7009_v13, %v7083_v46  ;;  %v1625_v51 = vsub.f32 %v7021_v30, %v7083_v46  ;;  %v1626_v49 = vsub.f32 %v7003_v4, %v7083_v46  ;;  %v1627_v31 = vsub.f32 %v7015_v22, %v7083_v46 }
 0x35c   : > { %v1628_v52 = vsub.f32 %v7032_v14, %v7083_v46  ;;  %v1629_v56 = vsub.f32 %v7042_v48, %v7083_v46  ;;  %v1630_v43 = vsub.f32 %v7027_v34, %v7083_v46  ;;  %v1631_v13 = vsub.f32 %v7037_v8, %v7083_v46 }
 0x35d   : > { %v1632_v30 = vsub.f32 %v7052_v5, %v7083_v46  ;;  %v1633_v4 = vsub.f32 %v7063_v3, %v7083_v46  ;;  %v1634_v22 = vsub.f32 %v7047_v15, %v7083_v46  ;;  %v1635_v14 = vsub.f32 %v7057_v1, %v7083_v46 }
 0x35e   : > { %v1636_v48 = vsub.f32 %v6993_v38, %v7083_v46  ;;  %v1637_v34 = vsub.f32 %v7001_v2, %v7083_v46  ;;  %v1638_v8 = vsub.f32 %v6989_v26, %v7083_v46  ;;  %v1639_v5 = vsub.f32 %v6997_v44, %v7083_v46 }
 0x35f   : > { %v1640_v3 = vsub.f32 %v7011_v62, %v7083_v46  ;;  %v1641_v15 = vsub.f32 %v7023_v33, %v7083_v46  ;;  %v1642_v1 = vsub.f32 %v7005_v21, %v7083_v46  ;;  %v1643_v38 = vsub.f32 %v7017_v63, %v7083_v46 }
 0x360   : > { %v1644_v2 = vsub.f32 %v7034_v45, %v7083_v46  ;;  %v1645_v26 = vsub.f32 %v7044_v18, %v7083_v46  ;;  %v1646_v44 = vsub.f32 %v7029_v39, %v7083_v46  ;;  %v1652_v6 = vmul.f32 1.442695, %v1620_v10 }
 0x361   : > { %v1654_v16 = vmul.f32 1.442695, %v1621_v61  ;;  %v1656_v32 = vmul.f32 1.442695, %v1622_v40  ;;  %v1658_v53 = vmul.f32 1.442695, %v1623_v11 }
 0x362   : > { %5817 = vpow2.f32 %v1652_v6  ;;  %v1660_v35 = vmul.f32 1.442695, %v1624_v7  ;;  %v1662_v29 = vmul.f32 1.442695, %v1625_v51  ;;  %v1664_v0 = vmul.f32 1.442695, %v1626_v49 }
 0x363   : > { %5819 = vpow2.f32 %v1654_v16  ;;  %v1666_v55 = vmul.f32 1.442695, %v1627_v31  ;;  %v1668_v9 = vmul.f32 1.442695, %v1628_v52  ;;  %v1670_v62 = vmul.f32 1.442695, %v1629_v56 }
 0x364   : > { %5821 = vpow2.f32 %v1656_v32  ;;  %v1672_v27 = vmul.f32 1.442695, %v1630_v43  ;;  %v1674_v60 = vmul.f32 1.442695, %v1631_v13  ;;  %v1676_v10 = vmul.f32 1.442695, %v1632_v30 }
 0x365   : > { %5823 = vpow2.f32 %v1658_v53  ;;  %v1678_v61 = vmul.f32 1.442695, %v1633_v4  ;;  %v1680_v11 = vmul.f32 1.442695, %v1634_v22  ;;  %v1682_v51 = vmul.f32 1.442695, %v1635_v14 }
 0x366   : > { %5825 = vpow2.f32 %v1660_v35  ;;  %v1684_v31 = vmul.f32 1.442695, %v1636_v48  ;;  %v1686_v13 = vmul.f32 1.442695, %v1637_v34  ;;  %v1688_v4 = vmul.f32 1.442695, %v1638_v8 }
 0x367   : > { %5827 = vpow2.f32 %v1662_v29  ;;  %v1694_v8 = vmul.f32 1.442695, %v1641_v15  ;;  %v1698_v33 = vmul.f32 1.442695, %v1643_v38  ;;  %v1700_v21 = vmul.f32 1.442695, %v1644_v2 }
 0x368   : > { %5829 = vpow2.f32 %v1664_v0  ;;  %v1702_v63 = vmul.f32 1.442695, %v1645_v26  ;;  %v1704_v45 = vmul.f32 1.442695, %v1646_v44 }
 0x369   : > { %5831 = vpow2.f32 %v1666_v55 }
 0x36a   : > { %5833 = vpow2.f32 %v1668_v9  ;;  %v1692_v9 = vmul.f32 1.442695, %v1640_v3 }
 0x36b   : > { %5835 = vpow2.f32 %v1670_v62  ;;  %v1690_v62 = vmul.f32 1.442695, %v1639_v5  ;;  %v1696_v5 = vmul.f32 1.442695, %v1642_v1 }
 0x36c   : > { %v7149_v40 = vpop.eup %5817  ;;  %5837 = vpow2.f32 %v1672_v27 }
 0x36d   : > { %v7151_v7 = vpop.eup %5819  ;;  %5839 = vpow2.f32 %v1674_v60 }
 0x36e   : > { %v7153_v49 = vpop.eup %5821  ;;  %5841 = vpow2.f32 %v1676_v10  ;;  %v1716_v52 = vadd.f32 %v7151_v7, %v7149_v40  ;;  %v1753_v56 = vpack.c.bf16 %v7151_v7, %v7149_v40  ;;  %v8887_v10 = vsub.f32 %v7039_v47, %v7083_v46 }
 0x36f   : > { %v7159_v43 = vpop.eup %5823  ;;  %5843 = vpow2.f32 %v1678_v61  ;;  %v8888_v61 = vsub.f32 %v7054_v23, %v7083_v46 }
 0x370   : > { %v7161_v30 = vpop.eup %5825  ;;  %5845 = vpow2.f32 %v1680_v11  ;;  %v1717_v22 = vadd.f32 %v7153_v49, %v1716_v52  ;;  %v1754_v14 = vpack.c.bf16 %v7159_v43, %v7153_v49  ;;  %v1706_v18 = vmul.f32 1.442695, %v8887_v10 }
 0x371   : > { %v7166_v48 = vpop.eup %5827  ;;  %5847 = vpow2.f32 %v1682_v51  ;;  %v1708_v39 = vmul.f32 1.442695, %v8888_v61 }
 0x372   : > { %v7168_v55 = vpop.eup %5829  ;;  %5849 = vpow2.f32 %v1684_v31  ;;  %v1718_v27 = vadd.f32 %v7159_v43, %v1717_v22  ;;  %v1755_v34 = vpack.c.bf16 %v7166_v48, %v7161_v30  ;;  %v8889_v31 = vsub.f32 %v7065_v57, %v7083_v46 }
 0x373   : > { %v7173_v60 = vpop.eup %5831  ;;  %5851 = vpow2.f32 %v1686_v13  ;;  %v8890_v13 = vsub.f32 %v7049_v59, %v7083_v46 }
 0x374   : > { %v7178_v6 = vpop.eup %5833  ;;  %5853 = vpow2.f32 %v1688_v4  ;;  %v1719_v3 = vadd.f32 %v7161_v30, %v1718_v27  ;;  %v1756_v16 = vpack.c.bf16 %v7173_v60, %v7168_v55  ;;  %v1710_v47 = vmul.f32 1.442695, %v8889_v31 }
 0x375   : > { %v7186_v32 = vpop.eup %5835  ;;  %5855 = vpow2.f32 %v1690_v62  ;;  %v1712_v4 = vmul.f32 1.442695, %v8890_v13 }
 0x376   : > { %v7191_v15 = vpop.eup %5837  ;;  %5857 = vpow2.f32 %v1692_v9  ;;  %v1720_v1 = vadd.f32 %v7166_v48, %v1719_v3  ;;  %v1757_v53 = vpack.c.bf16 %v7186_v32, %v7178_v6  ;;  %v8891_v9 = vsub.f32 %v7059_v12, %v7083_v46 }
 0x377   : > { %v7199_v35 = vpop.eup %5839  ;;  %5859 = vpow2.f32 %v1694_v8 }
 0x378   : > { %v7204_v38 = vpop.eup %5841  ;;  %5861 = vpow2.f32 %v1696_v5  ;;  %v1721_v2 = vadd.f32 %v7168_v55, %v1720_v1  ;;  %v1758_v29 = vpack.c.bf16 %v7199_v35, %v7191_v15  ;;  %v1714_v27 = vmul.f32 1.442695, %v8891_v9 }
 0x379   : > { %v7212_v0 = vpop.eup %5843  ;;  %5863 = vpow2.f32 %v1698_v33 }
 0x37a   : > { %v7217_v26 = vpop.eup %5845  ;;  %5865 = vpow2.f32 %v1700_v21  ;;  %v1722_v44 = vadd.f32 %v7173_v60, %v1721_v2  ;;  %v1759_v11 = vpack.c.bf16 %v7212_v0, %v7204_v38 }
 0x37b   : > { %v7225_v51 = vpop.eup %5847  ;;  %5867 = vpow2.f32 %v1702_v63 }
 0x37c   : > { %v5850_v52 = vpop.eup %5849  ;;  %5869 = vpow2.f32 %v1704_v45  ;;  %v1723_v23 = vadd.f32 %v7178_v6, %v1722_v44  ;;  %v1760_v22 = vpack.c.bf16 %v7225_v51, %v7217_v26 }
 0x37d   : > { %v5852_v62 = vpop.eup %5851  ;;  %5871 = vpow2.f32 %v1706_v18 }
 0x37e   : > { %v5854_v8 = vpop.eup %5853  ;;  %5873 = vpow2.f32 %v1708_v39  ;;  %v1724_v57 = vadd.f32 %v7186_v32, %v1723_v23  ;;  %v1761_v5 = vpack.c.bf16 %v5852_v62, %v5850_v52  ;;  %v1369_v32 = vld [vmem:[#allocation4] sm:$0xff] }
 0x37f   : > { %v5856_v3 = vpop.eup %5855  ;;  %5875 = vpow2.f32 %v1710_v47 }
 0x380   : > { %v5858_v59 = vpop.eup %5857  ;;  %5877 = vpow2.f32 %v1712_v4  ;;  %v1725_v33 = vadd.f32 %v7191_v15, %v1724_v57  ;;  %4958 = vmatprep.subr.bf16.mxu1 %v1761_v5  ;;  %v1762_v21 = vpack.c.bf16 %v5856_v3, %v5854_v8  ;;  %v1853_v57 = vpop.permute.xlu1 %1852 }
 0x381   : > { %v5860_v1 = vpop.eup %5859  ;;  %5879 = vpow2.f32 %v1714_v27  ;;  %4959 = vmatpush3.bf16.msra.mxu1 %v1753_v56 }
 0x382   : > { %v5862_v46 = vpop.eup %5861  ;;  %v1726_v12 = vadd.f32 %v7199_v35, %v1725_v33  ;;  %4960 = vmatprep.subr.bf16.mxu1 %v1762_v21  ;;  %v1763_v63 = vpack.c.bf16 %v5860_v1, %v5858_v59 }
 0x383   : > { %v5864_v45 = vpop.eup %5863 }
 0x384   : > { %v5866_v2 = vpop.eup %5865  ;;  %v1727_v10 = vadd.f32 %v7204_v38, %v1726_v12  ;;  %v1764_v18 = vpack.c.bf16 %v5864_v45, %v5862_v46  ;;  %v1855_v5 = vpop.permute.xlu1 %1854 }
 0x385   : > { %v5868_v61 = vpop.eup %5867  ;;  %4961 = vmatpush3.bf16.msra.mxu1 %v1754_v14 }
 0x386   : > { %v5870_v39 = vpop.eup %5869  ;;  %v1728_v44 = vadd.f32 %v7212_v0, %v1727_v10  ;;  %4962 = vmatprep.subr.bf16.mxu1 %v1763_v63  ;;  %v1765_v40 = vpack.c.bf16 %v5868_v61, %v5866_v2  ;;  %v1849_v0 = vpop.permute.xlu0 %1848 }
 0x387   : > { %v5872_v7 = vpop.eup %5871 }
 0x388   : > { %v5874_v56 = vpop.eup %5873  ;;  %v1729_v31 = vadd.f32 %v7217_v26, %v1728_v44  ;;  %v1766_v47 = vpack.c.bf16 %v5872_v7, %v5870_v39 }
 0x389   : > { %v5876_v13 = vpop.eup %5875  ;;  %4963 = vmatpush3.bf16.msra.mxu1 %v1755_v34 }
 0x38a   : > { %v5878_v4 = vpop.eup %5877  ;;  %v1730_v23 = vadd.f32 %v7225_v51, %v1729_v31  ;;  %4964 = vmatprep.subr.bf16.mxu1 %v1764_v18  ;;  %v1767_v49 = vpack.c.bf16 %v5876_v13, %v5874_v56  ;;  %v1372_v51 = vld [vmem:[#allocation4 + $0x18] sm:$0xff] }
 0x38b   : > { %v5880_v43 = vpop.eup %5879 }
 0x38c   : > { %v1731_v14 = vadd.f32 %v5850_v52, %v1730_v23  ;;  %v1768_v9 = vpack.c.bf16 %v5880_v43, %v5878_v4  ;;  %v1827_v52 = vld [vmem:[%s6901_s14 + $0x30] sm:$0xff] }
 0x38d   : > { %4965 = vmatpush3.bf16.msra.mxu1 %v1756_v16  ;;  %v1826_v16 = vld [vmem:[%s6901_s14 + $0x20] sm:$0xff] }
 0x38e   : > { %v1732_v26 = vadd.f32 %v5852_v62, %v1731_v14  ;;  %4966 = vmatprep.subr.bf16.mxu1 %v1765_v40 }
 0x390   : > { %v1733_v27 = vadd.f32 %v5854_v8, %v1732_v26  ;;  %v1851_v8 = vpop.permute.xlu0 %1850 }
 0x391   : > { %4967 = vmatpush3.bf16.msra.mxu1 %v1757_v53 }
 0x392   : > { %v1734_v30 = vadd.f32 %v5856_v3, %v1733_v27  ;;  %4968 = vmatprep.subr.bf16.mxu1 %v1766_v47 }
 0x394   : > { %v1735_v48 = vadd.f32 %v5858_v59, %v1734_v30  ;;  %v1857_v3 = vpop.permute.xlu0 %1856  ;;  %v1859_v59 = vpop.permute.xlu1 %1858 }
 0x395   : > { %4969 = vmatpush3.bf16.msra.mxu1 %v1758_v29  ;;  %v1371_v29 = vld [vmem:[#allocation4 + $0x10] sm:$0xff] }
 0x396   : > { %v1736_v34 = vadd.f32 %v5860_v1, %v1735_v48  ;;  %4970 = vmatprep.subr.bf16.mxu1 %v1767_v49 }
 0x398   : > { %v1737_v55 = vadd.f32 %v5862_v46, %v1736_v34  ;;  %v1861_v33 = vpop.permute.xlu0 %1860  ;;  %v1863_v21 = vpop.permute.xlu1 %1862 }
 0x399   : > { %4971 = vmatpush3.bf16.msra.mxu1 %v1759_v11 }
 0x39a   : > { %v1738_v60 = vadd.f32 %v5864_v45, %v1737_v55  ;;  %4972 = vmatprep.subr.bf16.mxu1 %v1768_v9 }
 0x39c   : > { %v1739_v6 = vadd.f32 %v5866_v2, %v1738_v60  ;;  %v1865_v1 = vpop.permute.xlu0 %1864  ;;  %v1867_v46 = vpop.permute.xlu1 %1866 }
 0x39d   : > { %4973 = vmatpush3.bf16.msra.mxu1 %v1760_v22 }
 0x39e   : > { %v1740_v53 = vadd.f32 %v5868_v61, %v1739_v6  ;;  %5240 = vmatprep.subr.bf16.mxu1 %v1826_v16 }
 0x3a0   : > { %v1741_v62 = vadd.f32 %v5870_v39, %v1740_v53  ;;  %1802 = vmatmul.mubr.bf16.vlgmr.msra.gmra.mrb[16].mxu1 %v1369_v32  ;;  %v1869_v12 = vpop.permute.xlu0 %1868  ;;  %v1871_v63 = vpop.permute.xlu1 %1870 }
 0x3a1   : > { %1809 = vmatprep.mubr.bf16.mxu1 %v1372_v51  ;;  %5241 = vmatpush3.bf16.msra.mxu1 %v1826_v16 }
 0x3a2   : > { %v1742_v15 = vadd.f32 %v5872_v7, %v1741_v62  ;;  %5242 = vmatprep.subr.bf16.mxu1 %v1827_v52 }
 0x3a4   : > { %v1743_v35 = vadd.f32 %v5874_v56, %v1742_v15  ;;  %v1873_v45 = vpop.permute.xlu0 %1872  ;;  %v1875_v2 = vpop.permute.xlu1 %1874 }
 0x3a5   : > { %5243 = vmatpush3.bf16.msra.mxu1 %v1827_v52 }
 0x3a6   : > { %v1744_v38 = vadd.f32 %v5876_v13, %v1743_v35 }
 0x3a8   : > { %v1745_v11 = vadd.f32 %v5878_v4, %v1744_v38  ;;  %1810 = vmatmul.mubr.bf16.gmra.mrb[20].mxu1 %v1371_v29  ;;  %v1877_v10 = vpop.permute.xlu0 %1876  ;;  %v1879_v18 = vpop.permute.xlu1 %1878 }
 0x3a9   : > { %5244 = vmatprep.mubr.msk.bf16.mxu1 %vm1373_vm1, %v1849_v0 }
 0x3aa   : > { %v1746_v22 = vadd.f32 %v5880_v43, %v1745_v11 }
 0x3ac   : > { %v1747_v41 = vrot.slane %v1746_v22, 4 }
 0x3ae   : > { %v1748_v58 = vadd.f32 %v1747_v41, %v1746_v22 }
 0x3b0   : > { %5245 = vmatmul.mubr.msk.bf16.vlgmr.msra.gmra.mrb[24].mxu1 %vm1373_vm1, %v1851_v8  ;;  %v1749_v19 = vrot.slane %v1748_v58, 2 }
 0x3b1   : > { %5248 = vmatprep.mubr.msk.bf16.mxu1 %vm1373_vm1, %v1853_v57 }
 0x3b2   : > { %v1750_v20 = vadd.f32 %v1749_v19, %v1748_v58 }
 0x3b4   : > { %v1751_v25 = vrot.slane %v1750_v20, 1 }
 0x3b6   : > { %v1752_v24 = vadd.f32 %v1751_v25, %v1750_v20 }
 0x3b8   : > { %5249 = vmatmul.mubr.msk.bf16.gmra.mrb[28].mxu1 %vm1373_vm1, %v1855_v5  ;;  %5881 = vrcp.f32 %v1752_v24 }
 0x3b9   : > { %5252 = vmatprep.mubr.msk.bf16.mxu1 %vm1373_vm1, %v1857_v3 }
 0x3c0   : > { %5253 = vmatmul.mubr.msk.bf16.gmra.mrb[32].mxu1 %vm1373_vm1, %v1859_v59 }
 0x3c1   : > { %5256 = vmatprep.mubr.msk.bf16.mxu1 %vm1373_vm1, %v1861_v33 }
 0x3c2   : > { %v5882_v37 = vpop.eup %5881 }
 0x3c8   : > { %5257 = vmatmul.mubr.msk.bf16.gmra.mrb[36].mxu1 %vm1373_vm1, %v1863_v21 }
 0x3c9   : > { %5260 = vmatprep.mubr.msk.bf16.mxu1 %vm1373_vm1, %v1865_v1 }
 0x3d0   : > { %5261 = vmatmul.mubr.msk.bf16.gmra.mrb[40].mxu1 %vm1373_vm1, %v1867_v46 }
 0x3d1   : > { %5264 = vmatprep.mubr.msk.bf16.mxu1 %vm1373_vm1, %v1869_v12 }
 0x3d8   : > { %5265 = vmatmul.mubr.msk.bf16.gmra.mrb[44].mxu1 %vm1373_vm1, %v1871_v63 }
 0x3d9   : > { %5268 = vmatprep.mubr.msk.bf16.mxu1 %vm1373_vm1, %v1873_v45 }
 0x3e0   : > { %5269 = vmatmul.mubr.msk.bf16.gmra.mrb[48].mxu1 %vm1373_vm1, %v1875_v2  ;;  %v1829_v2 = vld [vmem:[#allocation4 + $0x28] sm:$0xff] }
 0x3e1   : > { %5272 = vmatprep.mubr.msk.bf16.mxu1 %vm1373_vm1, %v1877_v10  ;;  %2307 = vmatprep.mubr.bf16.mxu0 %v1829_v2 }
 0x3e8   : > { %5273 = vmatmul.mubr.msk.bf16.gmra.mrb[52].mxu1 %vm1373_vm1, %v1879_v18 }
 0x473   : > { %v4974_v50 = vpop.f32.mrb[16].mxu1 }
 0x474   : > { %v4975_v61 = vpop.f32.mrb[17].mxu1 }
 0x475   : > { %v4976_v54 = vadd.f32 %v4975_v61, %v4974_v50  ;;  %v4977_v39 = vpop.f32.mrb[18].mxu1 }
 0x476   : > { %v4978_v44 = vpop.f32.mrb[19].mxu1 }
 0x477   : > { %v1820_v42 = vmul.f32 %v5882_v37, %v4976_v54  ;;  %v4979_v40 = vadd.f32 %v4978_v44, %v4977_v39 }
 0x479   : > { %v1821_v7 = vmul.f32 %v5882_v37, %v4979_v40 }
 0x47b   : > { %v4980_v56 = vpop.f32.mrb[20].mxu1  ;;  %v7301_v31 = vpack.c.bf16 %v1821_v7, %v1820_v42 }
 0x47c   : > { %v4981_v47 = vpop.f32.mrb[21].mxu1 }
 0x47d   : > { %v4982_v13 = vadd.f32 %v4981_v47, %v4980_v56  ;;  %v4983_v4 = vpop.f32.mrb[22].mxu1 }
 0x47e   : > { %v4984_v23 = vpop.f32.mrb[23].mxu1 }
 0x47f   : > { %v1822_v49 = vmul.f32 %v5882_v37, %v4982_v13  ;;  %v4985_v43 = vadd.f32 %v4984_v23, %v4983_v4 }
 0x481   : > { %v1823_v14 = vmul.f32 %v5882_v37, %v4985_v43 }
 0x483   : > { %v7303_v9 = vpop.f32.mrb[24].mxu1  ;;  %v7305_v26 = vpack.c.bf16 %v1823_v14, %v1822_v49 }
 0x484   : > { %v7307_v27 = vpop.f32.mrb[25].mxu1 }
 0x485   : > { %v7309_v30 = vpop.f32.mrb[26].mxu1 }
 0x486   : > { %v7311_v48 = vpop.f32.mrb[27].mxu1 }
 0x48b   : > { %v7313_v34 = vpop.f32.mrb[28].mxu1 }
 0x48c   : > { %v2091_v55 = vmax.f32 %v7303_v9, %v7313_v34  ;;  %v7317_v60 = vpop.f32.mrb[29].mxu1 }
 0x48d   : > { %v2089_v16 = vmax.f32 %v7307_v27, %v7317_v60  ;;  %v7321_v6 = vpop.f32.mrb[30].mxu1 }
 0x48e   : > { %v2092_v32 = vmax.f32 %v7309_v30, %v7321_v6  ;;  %v7325_v53 = vpop.f32.mrb[31].mxu1 }
 0x48f   : > { %v2090_v51 = vmax.f32 %v7311_v48, %v7325_v53 }
 0x493   : > { %v7329_v52 = vpop.f32.mrb[32].mxu1 }
 0x494   : > { %v2095_v62 = vmax.f32 %v2091_v55, %v7329_v52  ;;  %v7332_v15 = vpop.f32.mrb[33].mxu1 }
 0x495   : > { %v2093_v35 = vmax.f32 %v2089_v16, %v7332_v15  ;;  %v7335_v29 = vpop.f32.mrb[34].mxu1 }
 0x496   : > { %v2096_v38 = vmax.f32 %v2092_v32, %v7335_v29  ;;  %v7338_v0 = vpop.f32.mrb[35].mxu1 }
 0x497   : > { %v2094_v11 = vmax.f32 %v2090_v51, %v7338_v0 }
 0x49b   : > { %v7341_v22 = vpop.f32.mrb[36].mxu1 }
 0x49c   : > { %v2099_v8 = vmax.f32 %v2095_v62, %v7341_v22  ;;  %v7344_v57 = vpop.f32.mrb[37].mxu1 }
 0x49d   : > { %v2097_v5 = vmax.f32 %v2093_v35, %v7344_v57  ;;  %v7347_v3 = vpop.f32.mrb[38].mxu1 }
 0x49e   : > { %v2100_v59 = vmax.f32 %v2096_v38, %v7347_v3  ;;  %v7350_v33 = vpop.f32.mrb[39].mxu1 }
 0x49f   : > { %v2098_v21 = vmax.f32 %v2094_v11, %v7350_v33 }
 0x4a3   : > { %v7353_v1 = vpop.f32.mrb[40].mxu1 }
 0x4a4   : > { %v2103_v46 = vmax.f32 %v2099_v8, %v7353_v1  ;;  %v7356_v12 = vpop.f32.mrb[41].mxu1 }
 0x4a5   : > { %v2101_v63 = vmax.f32 %v2097_v5, %v7356_v12  ;;  %v7359_v45 = vpop.f32.mrb[42].mxu1 }
 0x4a6   : > { %v2104_v10 = vmax.f32 %v2100_v59, %v7359_v45  ;;  %v7362_v18 = vpop.f32.mrb[43].mxu1 }
 0x4a7   : > { %v2102_v17 = vmax.f32 %v2098_v21, %v7362_v18 }
 0x4ab   : > { %v7365_v28 = vpop.f32.mrb[44].mxu1 }
 0x4ac   : > { %v2107_v36 = vmax.f32 %v2103_v46, %v7365_v28  ;;  %v7368_v41 = vpop.f32.mrb[45].mxu1 }
 0x4ad   : > { %v2105_v58 = vmax.f32 %v2101_v63, %v7368_v41  ;;  %v7371_v19 = vpop.f32.mrb[46].mxu1 }
 0x4ae   : > { %v2108_v20 = vmax.f32 %v2104_v10, %v7371_v19  ;;  %v7374_v25 = vpop.f32.mrb[47].mxu1 }
 0x4af   : > { %v2106_v24 = vmax.f32 %v2102_v17, %v7374_v25 }
 0x4b3   : > { %v7377_v50 = vpop.f32.mrb[48].mxu1 }
 0x4b4   : > { %v2111_v61 = vmax.f32 %v2107_v36, %v7377_v50  ;;  %v7380_v54 = vpop.f32.mrb[49].mxu1 }
 0x4b5   : > { %v2109_v39 = vmax.f32 %v2105_v58, %v7380_v54  ;;  %v7383_v37 = vpop.f32.mrb[50].mxu1 }
 0x4b6   : > { %v2112_v44 = vmax.f32 %v2108_v20, %v7383_v37  ;;  %v7386_v42 = vpop.f32.mrb[51].mxu1 }
 0x4b7   : > { %v2110_v40 = vmax.f32 %v2106_v24, %v7386_v42 }
 0x4bb   : > { %v7389_v7 = vpop.f32.mrb[52].mxu1 }
 0x4bc   : > { %v2115_v56 = vmax.f32 %v2111_v61, %v7389_v7  ;;  %v7392_v47 = vpop.f32.mrb[53].mxu1 }
 0x4bd   : > { %v2113_v13 = vmax.f32 %v2109_v39, %v7392_v47  ;;  %v7395_v4 = vpop.f32.mrb[54].mxu1 }
 0x4be   : > { %v2116_v23 = vmax.f32 %v2112_v44, %v7395_v4  ;;  %v7398_v49 = vpop.f32.mrb[55].mxu1 }
 0x4bf   : > { %v2114_v43 = vmax.f32 %v2110_v40, %v7398_v49 }
 0x4c0   : > { %v2118_v14 = vmax.f32 %v2115_v56, %v2116_v23 }
 0x4c1   : > { %v2117_v55 = vmax.f32 %v2113_v13, %v2114_v43 }
 0x4c3   : > { %v2119_v16 = vmax.f32 %v2117_v55, %v2118_v14 }
 0x4c5   : > { %v2120_v32 = vrot.slane %v2119_v16, 4 }
 0x4c7   : > { %v2121_v51 = vmax.f32 %v2119_v16, %v2120_v32 }
 0x4c9   : > { %v2122_v62 = vrot.slane %v2121_v51, 2 }
 0x4cb   : > { %v2123_v35 = vmax.f32 %v2121_v51, %v2122_v62 }
 0x4cd   : > { %v2124_v38 = vrot.slane %v2123_v35, 1 }
 0x4cf   : > { %v7401_v11 = vmax.f32 %v2123_v35, %v2124_v38 }
 0x4d1   : > { %v2126_v8 = vsub.f32 %v7307_v27, %v7401_v11  ;;  %v2127_v5 = vsub.f32 %v7311_v48, %v7401_v11  ;;  %v2128_v59 = vsub.f32 %v7303_v9, %v7401_v11  ;;  %v2129_v21 = vsub.f32 %v7309_v30, %v7401_v11 }
 0x4d2   : > { %v2130_v46 = vsub.f32 %v7317_v60, %v7401_v11  ;;  %v2131_v63 = vsub.f32 %v7325_v53, %v7401_v11  ;;  %v2132_v2 = vsub.f32 %v7313_v34, %v7401_v11  ;;  %v2133_v27 = vsub.f32 %v7321_v6, %v7401_v11 }
 0x4d3   : > { %v2134_v48 = vsub.f32 %v7332_v15, %v7401_v11  ;;  %v2135_v9 = vsub.f32 %v7338_v0, %v7401_v11  ;;  %v2136_v30 = vsub.f32 %v7329_v52, %v7401_v11  ;;  %v2137_v60 = vsub.f32 %v7335_v29, %v7401_v11 }
 0x4d4   : > { %v2138_v53 = vsub.f32 %v7344_v57, %v7401_v11  ;;  %v2139_v34 = vsub.f32 %v7350_v33, %v7401_v11  ;;  %v2140_v6 = vsub.f32 %v7341_v22, %v7401_v11  ;;  %v2141_v15 = vsub.f32 %v7347_v3, %v7401_v11 }
 0x4d5   : > { %v2142_v0 = vsub.f32 %v7356_v12, %v7401_v11  ;;  %v2143_v52 = vsub.f32 %v7362_v18, %v7401_v11  ;;  %v2144_v29 = vsub.f32 %v7353_v1, %v7401_v11  ;;  %v2145_v57 = vsub.f32 %v7359_v45, %v7401_v11 }
 0x4d6   : > { %v2146_v33 = vsub.f32 %v7368_v41, %v7401_v11  ;;  %v2147_v22 = vsub.f32 %v7374_v25, %v7401_v11  ;;  %v2148_v3 = vsub.f32 %v7365_v28, %v7401_v11  ;;  %v2149_v12 = vsub.f32 %v7371_v19, %v7401_v11 }
 0x4d7   : > { %v2150_v10 = vsub.f32 %v7380_v54, %v7401_v11  ;;  %v2151_v1 = vsub.f32 %v7386_v42, %v7401_v11  ;;  %v2152_v45 = vsub.f32 %v7377_v50, %v7401_v11  ;;  %v2153_v18 = vsub.f32 %v7383_v37, %v7401_v11 }
 0x4d8   : > { %v2154_v17 = vsub.f32 %v7392_v47, %v7401_v11  ;;  %v2155_v36 = vsub.f32 %v7398_v49, %v7401_v11  ;;  %v2156_v41 = vsub.f32 %v7389_v7, %v7401_v11  ;;  %v2157_v58 = vsub.f32 %v7395_v4, %v7401_v11 }
 0x4d9   : > { %v2158_v20 = vmul.f32 1.442695, %v2126_v8  ;;  %v2160_v24 = vmul.f32 1.442695, %v2127_v5  ;;  %v2162_v61 = vmul.f32 1.442695, %v2128_v59 }
 0x4da   : > { %v2164_v39 = vmul.f32 1.442695, %v2129_v21  ;;  %v2166_v44 = vmul.f32 1.442695, %v2130_v46  ;;  %v2168_v40 = vmul.f32 1.442695, %v2131_v63 }
 0x4db   : > { %5883 = vpow2.f32 %v2158_v20  ;;  %v2170_v56 = vmul.f32 1.442695, %v2132_v2  ;;  %v2172_v13 = vmul.f32 1.442695, %v2133_v27  ;;  %v2174_v23 = vmul.f32 1.442695, %v2134_v48 }
 0x4dc   : > { %5885 = vpow2.f32 %v2160_v24  ;;  %v2176_v43 = vmul.f32 1.442695, %v2135_v9  ;;  %v2178_v14 = vmul.f32 1.442695, %v2136_v30  ;;  %v2180_v55 = vmul.f32 1.442695, %v2137_v60 }
 0x4dd   : > { %5887 = vpow2.f32 %v2162_v61  ;;  %v2182_v16 = vmul.f32 1.442695, %v2138_v53  ;;  %v2184_v32 = vmul.f32 1.442695, %v2139_v34  ;;  %v2186_v62 = vmul.f32 1.442695, %v2140_v6 }
 0x4de   : > { %5889 = vpow2.f32 %v2164_v39  ;;  %v2188_v38 = vmul.f32 1.442695, %v2141_v15  ;;  %v2190_v5 = vmul.f32 1.442695, %v2142_v0  ;;  %v2192_v63 = vmul.f32 1.442695, %v2143_v52 }
 0x4df   : > { %5891 = vpow2.f32 %v2166_v44  ;;  %v2194_v27 = vmul.f32 1.442695, %v2144_v29  ;;  %v2196_v60 = vmul.f32 1.442695, %v2145_v57  ;;  %v2198_v34 = vmul.f32 1.442695, %v2146_v33 }
 0x4e0   : > { %5893 = vpow2.f32 %v2168_v40  ;;  %v2200_v52 = vmul.f32 1.442695, %v2147_v22  ;;  %v2202_v57 = vmul.f32 1.442695, %v2148_v3  ;;  %v2204_v25 = vmul.f32 1.442695, %v2149_v12 }
 0x4e1   : > { %5895 = vpow2.f32 %v2170_v56  ;;  %v2206_v28 = vmul.f32 1.442695, %v2150_v10  ;;  %v2208_v19 = vmul.f32 1.442695, %v2151_v1  ;;  %v2210_v54 = vmul.f32 1.442695, %v2152_v45 }
 0x4e2   : > { %5897 = vpow2.f32 %v2172_v13  ;;  %v2212_v42 = vmul.f32 1.442695, %v2153_v18  ;;  %v2214_v50 = vmul.f32 1.442695, %v2154_v17  ;;  %v2216_v37 = vmul.f32 1.442695, %v2155_v36 }
 0x4e3   : > { %5899 = vpow2.f32 %v2174_v23  ;;  %v2218_v23 = vmul.f32 1.442695, %v2156_v41 }
 0x4e4   : > { %5901 = vpow2.f32 %v2176_v43 }
 0x4e5   : > { %v7467_v51 = vpop.eup %5883  ;;  %5903 = vpow2.f32 %v2178_v14  ;;  %v2220_v14 = vmul.f32 1.442695, %v2157_v58 }
 0x4e6   : > { %v7469_v35 = vpop.eup %5885  ;;  %5905 = vpow2.f32 %v2180_v55 }
 0x4e7   : > { %v7471_v8 = vpop.eup %5887  ;;  %5907 = vpow2.f32 %v2182_v16  ;;  %v2222_v59 = vadd.f32 %v7469_v35, %v7467_v51  ;;  %v2259_v21 = vpack.c.bf16 %v7469_v35, %v7467_v51 }
 0x4e8   : > { %v7477_v46 = vpop.eup %5889  ;;  %5909 = vpow2.f32 %v2184_v32 }
 0x4e9   : > { %v7479_v2 = vpop.eup %5891  ;;  %5911 = vpow2.f32 %v2186_v62  ;;  %v2223_v48 = vadd.f32 %v7471_v8, %v2222_v59  ;;  %v2260_v9 = vpack.c.bf16 %v7477_v46, %v7471_v8 }
 0x4ea   : > { %v7484_v30 = vpop.eup %5893  ;;  %5913 = vpow2.f32 %v2188_v38 }
 0x4eb   : > { %v7486_v53 = vpop.eup %5895  ;;  %5915 = vpow2.f32 %v2190_v5  ;;  %v2224_v6 = vadd.f32 %v7477_v46, %v2223_v48  ;;  %v2261_v15 = vpack.c.bf16 %v7484_v30, %v7479_v2 }
 0x4ec   : > { %v7491_v0 = vpop.eup %5897  ;;  %5917 = vpow2.f32 %v2192_v63 }
 0x4ed   : > { %v7496_v29 = vpop.eup %5899  ;;  %5919 = vpow2.f32 %v2194_v27  ;;  %v2225_v33 = vadd.f32 %v7479_v2, %v2224_v6  ;;  %v2262_v20 = vpack.c.bf16 %v7491_v0, %v7486_v53 }
 0x4ee   : > { %v7504_v24 = vpop.eup %5901  ;;  %5921 = vpow2.f32 %v2196_v60 }
 0x4ef   : > { %v7509_v22 = vpop.eup %5903  ;;  %5923 = vpow2.f32 %v2198_v34  ;;  %v2226_v3 = vadd.f32 %v7484_v30, %v2225_v33  ;;  %v2263_v61 = vpack.c.bf16 %v7504_v24, %v7496_v29 }
 0x4f0   : > { %v7517_v39 = vpop.eup %5905  ;;  %5925 = vpow2.f32 %v2200_v52 }
 0x4f1   : > { %v7522_v12 = vpop.eup %5907  ;;  %5927 = vpow2.f32 %v2202_v57  ;;  %v2227_v10 = vadd.f32 %v7486_v53, %v2226_v3  ;;  %v2264_v44 = vpack.c.bf16 %v7517_v39, %v7509_v22 }
 0x4f2   : > { %v7530_v40 = vpop.eup %5909  ;;  %5929 = vpow2.f32 %v2204_v25 }
 0x4f3   : > { %v7535_v1 = vpop.eup %5911  ;;  %5931 = vpow2.f32 %v2206_v28  ;;  %v2228_v45 = vadd.f32 %v7491_v0, %v2227_v10  ;;  %v2265_v56 = vpack.c.bf16 %v7530_v40, %v7522_v12 }
 0x4f4   : > { %v7543_v13 = vpop.eup %5913  ;;  %5933 = vpow2.f32 %v2208_v19  ;;  %v1831_v19 = vld [vmem:[#allocation4 + $0x38] sm:$0xff] }
 0x4f5   : > { %v5916_v18 = vpop.eup %5915  ;;  %5935 = vpow2.f32 %v2210_v54  ;;  %v2229_v47 = vadd.f32 %v7496_v29, %v2228_v45  ;;  %v2266_v17 = vpack.c.bf16 %v7543_v13, %v7535_v1  ;;  %v2333_v54 = vld [vmem:[%s6901_s14 + $0x50] sm:$0xff] }
 0x4f6   : > { %v5918_v43 = vpop.eup %5917  ;;  %5937 = vpow2.f32 %v2212_v42 }
 0x4f7   : > { %v5920_v55 = vpop.eup %5919  ;;  %5939 = vpow2.f32 %v2214_v50  ;;  %v2230_v49 = vadd.f32 %v7504_v24, %v2229_v47  ;;  %v2267_v36 = vpack.c.bf16 %v5918_v43, %v5916_v18  ;;  %v1828_v24 = vld [vmem:[#allocation4 + $0x20] sm:$0xff]  ;;  %v2341_v50 = vpop.permute.xlu1 %2340 }
 0x4f8   : > { %v5922_v16 = vpop.eup %5921  ;;  %5941 = vpow2.f32 %v2216_v37 }
 0x4f9   : > { %v5924_v7 = vpop.eup %5923  ;;  %5943 = vpow2.f32 %v2218_v23  ;;  %v2231_v41 = vadd.f32 %v7509_v22, %v2230_v49  ;;  %5004 = vmatprep.subr.bf16.mxu0 %v2267_v36  ;;  %v2268_v32 = vpack.c.bf16 %v5922_v16, %v5920_v55 }
 0x4fa   : > { %v5926_v62 = vpop.eup %5925  ;;  %5945 = vpow2.f32 %v2220_v14  ;;  %5005 = vmatpush3.bf16.msra.mxu0 %v2259_v21 }
 0x4fb   : > { %v5928_v4 = vpop.eup %5927  ;;  %v2232_v11 = vadd.f32 %v7517_v39, %v2231_v41  ;;  %5006 = vmatprep.subr.bf16.mxu0 %v2268_v32  ;;  %v2269_v58 = vpack.c.bf16 %v5926_v62, %v5924_v7  ;;  %v6082_v41 = vld [vmem:[#allocation3 + $0x8] sm:$0xff]  ;;  %v6083_v32 = vld [vmem:[#allocation3 + $0x10] sm:$0xff] }
 0x4fc   : > { %v5930_v38 = vpop.eup %5929  ;;  %2830 = vrot.lane.b32.xlu1 %v6082_v41, %s6266_s11 }
 0x4fd   : > { %v5932_v5 = vpop.eup %5931  ;;  %v2233_v59 = vadd.f32 %v7522_v12, %v2232_v11  ;;  %v2270_v63 = vpack.c.bf16 %v5930_v38, %v5928_v4  ;;  %v6086_v11 = vld [vmem:[#allocation3 + $0x28] sm:$0xff] }
 0x4fe   : > { %v5934_v27 = vpop.eup %5933  ;;  %5007 = vmatpush3.bf16.msra.mxu0 %v2260_v9 }
 0x4ff   : > { %v5936_v48 = vpop.eup %5935  ;;  %v2234_v60 = vadd.f32 %v7530_v40, %v2233_v59  ;;  %5008 = vmatprep.subr.bf16.mxu0 %v2269_v58  ;;  %v2271_v51 = vpack.c.bf16 %v5934_v27, %v5932_v5  ;;  %v2339_v40 = vpop.permute.xlu0 %2338  ;;  %v6087_v58 = vld [vmem:[#allocation3 + $0x30] sm:$0xff]  ;;  %v6090_v59 = vld [vmem:[#allocation3 + $0x48] sm:$0xff] }
 0x500   : > { %v5938_v35 = vpop.eup %5937 }
 0x501   : > { %v5940_v21 = vpop.eup %5939  ;;  %v2235_v34 = vadd.f32 %v7535_v1, %v2234_v60  ;;  %v2272_v6 = vpack.c.bf16 %v5938_v35, %v5936_v48  ;;  %v6094_v60 = vld [vmem:[#allocation3 + $0x68] sm:$0xff] }
 0x502   : > { %v5942_v52 = vpop.eup %5941  ;;  %5009 = vmatpush3.bf16.msra.mxu0 %v2261_v15 }
 0x503   : > { %v5944_v57 = vpop.eup %5943  ;;  %v2236_v33 = vadd.f32 %v7543_v13, %v2235_v34  ;;  %5010 = vmatprep.subr.bf16.mxu0 %v2270_v63  ;;  %v2273_v8 = vpack.c.bf16 %v5942_v52, %v5940_v21  ;;  %v2343_v45 = vpop.permute.xlu0 %2342  ;;  %v6091_v63 = vld [vmem:[#allocation3 + $0x50] sm:$0xff] }
 0x504   : > { %v5946_v46 = vpop.eup %5945 }
 0x505   : > { %v2237_v9 = vadd.f32 %v5916_v18, %v2236_v33  ;;  %v2274_v25 = vpack.c.bf16 %v5946_v46, %v5944_v57 }
 0x506   : > { %5011 = vmatpush3.bf16.msra.mxu0 %v2262_v20  ;;  %v2332_v20 = vld [vmem:[%s6901_s14 + $0x40] sm:$0xff] }
 0x507   : > { %v2238_v28 = vadd.f32 %v5918_v43, %v2237_v9  ;;  %5012 = vmatprep.subr.bf16.mxu0 %v2271_v51  ;;  %v2347_v13 = vpop.permute.xlu0 %2346  ;;  %v6095_v51 = vld [vmem:[#allocation3 + $0x70] sm:$0xff] }
 0x509   : > { %v2239_v3 = vadd.f32 %v5920_v55, %v2238_v28 }
 0x50a   : > { %5013 = vmatpush3.bf16.msra.mxu0 %v2263_v61 }
 0x50b   : > { %v2240_v2 = vadd.f32 %v5922_v16, %v2239_v3  ;;  %5014 = vmatprep.subr.bf16.mxu0 %v2272_v6  ;;  %v2351_v18 = vpop.permute.xlu0 %2350 }
 0x50d   : > { %v2241_v30 = vadd.f32 %v5924_v7, %v2240_v2  ;;  %v6081_v7 = vld [vmem:[#allocation3] sm:$0xff] }
 0x50e   : > { %5015 = vmatpush3.bf16.msra.mxu0 %v2264_v44  ;;  %v1830_v44 = vld [vmem:[#allocation4 + $0x30] sm:$0xff]  ;;  %2828 = vrot.lane.b32.xlu0 %v6081_v7, %s6266_s11 }
 0x50f   : > { %v2242_v15 = vadd.f32 %v5926_v62, %v2241_v30  ;;  %5016 = vmatprep.subr.bf16.mxu0 %v2273_v8  ;;  %v2355_v47 = vpop.permute.xlu0 %2354  ;;  %v6084_v62 = vld [vmem:[#allocation3 + $0x18] sm:$0xff] }
 0x510   : > { %2834 = vrot.lane.b32.xlu1 %v6084_v62, %s6266_s11 }
 0x511   : > { %v2243_v53 = vadd.f32 %v5928_v4, %v2242_v15  ;;  %v6085_v4 = vld [vmem:[#allocation3 + $0x20] sm:$0xff] }
 0x512   : > { %5017 = vmatpush3.bf16.msra.mxu0 %v2265_v56  ;;  %v2345_v56 = vpop.permute.xlu1 %2344  ;;  %2832 = vrot.lane.b32.xlu0 %v6083_v32, %s6266_s11 }
 0x513   : > { %v2244_v0 = vadd.f32 %v5930_v38, %v2243_v53  ;;  %5018 = vmatprep.subr.bf16.mxu0 %v2274_v25  ;;  %v2359_v43 = vpop.permute.xlu0 %2358  ;;  %v6088_v38 = vld [vmem:[#allocation3 + $0x38] sm:$0xff] }
 0x514   : > { %2838 = vrot.lane.b32.xlu1 %v6086_v11, %s6266_s11 }
 0x515   : > { %v2245_v29 = vadd.f32 %v5932_v5, %v2244_v0  ;;  %v6089_v5 = vld [vmem:[#allocation3 + $0x40] sm:$0xff] }
 0x516   : > { %5019 = vmatpush3.bf16.msra.mxu0 %v2266_v17  ;;  %v2349_v37 = vpop.permute.xlu1 %2348  ;;  %2836 = vrot.lane.b32.xlu0 %v6085_v4, %s6266_s11 }
 0x517   : > { %v2246_v61 = vadd.f32 %v5934_v27, %v2245_v29  ;;  %5276 = vmatprep.subr.bf16.mxu0 %v2332_v20  ;;  %v2363_v55 = vpop.permute.xlu0 %2362  ;;  %v6092_v27 = vld [vmem:[#allocation3 + $0x58] sm:$0xff] }
 0x518   : > { %2842 = vrot.lane.b32.xlu1 %v6088_v38, %s6266_s11 }
 0x519   : > { %v2247_v10 = vadd.f32 %v5936_v48, %v2246_v61  ;;  %2308 = vmatmul.mubr.bf16.vlgmr.msra.gmra.mrb[16].mxu0 %v1828_v24  ;;  %v6093_v48 = vld [vmem:[#allocation3 + $0x60] sm:$0xff] }
 0x51a   : > { %2315 = vmatprep.mubr.bf16.mxu0 %v1831_v19  ;;  %5277 = vmatpush3.bf16.msra.mxu0 %v2332_v20  ;;  %v2353_v23 = vpop.permute.xlu1 %2352 }
 0x51b   : > { %v2248_v22 = vadd.f32 %v5938_v35, %v2247_v10  ;;  %5278 = vmatprep.subr.bf16.mxu0 %v2333_v54  ;;  %v2367_v36 = vpop.permute.xlu0 %2366  ;;  %2840 = vrot.lane.b32.xlu0 %v6087_v58, %s6266_s11  ;;  %v6096_v35 = vld [vmem:[#allocation3 + $0x78] sm:$0xff] }
 0x51c   : > { %2846 = vrot.lane.b32.xlu1 %v6090_v59, %s6266_s11 }
 0x51d   : > { %v2249_v39 = vadd.f32 %v5940_v21, %v2248_v22 }
 0x51e   : > { %5279 = vmatpush3.bf16.msra.mxu0 %v2333_v54  ;;  %v2357_v17 = vpop.permute.xlu1 %2356 }
 0x51f   : > { %v2250_v12 = vadd.f32 %v5942_v52, %v2249_v39  ;;  %2844 = vrot.lane.b32.xlu0 %v6089_v5, %s6266_s11 }
 0x520   : > { %2850 = vrot.lane.b32.xlu1 %v6092_v27, %s6266_s11 }
 0x521   : > { %v2251_v42 = vadd.f32 %v5944_v57, %v2250_v12  ;;  %2316 = vmatmul.mubr.bf16.gmra.mrb[20].mxu0 %v1830_v44 }
 0x522   : > { %5280 = vmatprep.mubr.msk.bf16.mxu0 %vm1373_vm1, %v2339_v40  ;;  %v2361_v14 = vpop.permute.xlu1 %2360 }
 0x523   : > { %v7588_v1 = vadd.f32 %v5946_v46, %v2251_v42  ;;  %2848 = vrot.lane.b32.xlu0 %v6091_v63, %s6266_s11 }
 0x524   : > { %2854 = vrot.lane.b32.xlu1 %v6094_v60, %s6266_s11 }
 0x525   : > { %v2253_v21 = vrot.slane %v7588_v1, 4 }
 0x526   : > { %v2365_v49 = vpop.permute.xlu1 %2364 }
 0x527   : > { %2852 = vrot.lane.b32.xlu0 %v6093_v48, %s6266_s11  ;;  %v2254_v34 = vadd.f32 %v2253_v21, %v7588_v1  ;;  %v2335_v48 = vld [vmem:[#allocation4 + $0x48] sm:$0xff] }
 0x528   : > { %2858 = vrot.lane.b32.xlu1 %v6096_v35, %s6266_s11  ;;  %2797 = vmatprep.mubr.bf16.mxu1 %v2335_v48 }
 0x529   : > { %5281 = vmatmul.mubr.msk.bf16.vlgmr.msra.gmra.mrb[24].mxu0 %vm1373_vm1, %v2341_v50  ;;  %v2255_v6 = vrot.slane %v2254_v34, 2 }
 0x52a   : > { %5284 = vmatprep.mubr.msk.bf16.mxu0 %vm1373_vm1, %v2343_v45  ;;  %v2369_v16 = vpop.permute.xlu1 %2368 }
 0x52b   : > { %2856 = vrot.lane.b32.xlu0 %v6095_v51, %s6266_s11  ;;  %v2256_v52 = vadd.f32 %v2255_v6, %v2254_v34  ;;  %s8295_s11 = scalar_lea.vmem %s6432_s20, %s6894_s24  ;;  %s8302_s20 = scalar_lea.vmem [#allocation5], %s6894_s24 }
 0x52d   : > { %v2257_v57 = vrot.slane %v2256_v52, 1 }
 0x52f   : > { %v2258_v33 = vadd.f32 %v2257_v57, %v2256_v52 }
 0x531   : > { %5285 = vmatmul.mubr.msk.bf16.gmra.mrb[28].mxu0 %vm1373_vm1, %v2345_v56  ;;  %5947 = vrcp.f32 %v2258_v33 }
 0x532   : > { %5288 = vmatprep.mubr.msk.bf16.mxu0 %vm1373_vm1, %v2347_v13 }
 0x539   : > { %5289 = vmatmul.mubr.msk.bf16.gmra.mrb[32].mxu0 %vm1373_vm1, %v2349_v37 }
 0x53a   : > { %5292 = vmatprep.mubr.msk.bf16.mxu0 %vm1373_vm1, %v2351_v18 }
 0x53b   : > { %v5948_v28 = vpop.eup %5947 }
 0x541   : > { %5293 = vmatmul.mubr.msk.bf16.gmra.mrb[36].mxu0 %vm1373_vm1, %v2353_v23 }
 0x542   : > { %5296 = vmatprep.mubr.msk.bf16.mxu0 %vm1373_vm1, %v2355_v47 }
 0x549   : > { %5297 = vmatmul.mubr.msk.bf16.gmra.mrb[40].mxu0 %vm1373_vm1, %v2357_v17 }
 0x54a   : > { %5300 = vmatprep.mubr.msk.bf16.mxu0 %vm1373_vm1, %v2359_v43 }
 0x551   : > { %5301 = vmatmul.mubr.msk.bf16.gmra.mrb[44].mxu0 %vm1373_vm1, %v2361_v14 }
 0x552   : > { %5304 = vmatprep.mubr.msk.bf16.mxu0 %vm1373_vm1, %v2363_v55 }
 0x559   : > { %5305 = vmatmul.mubr.msk.bf16.gmra.mrb[48].mxu0 %vm1373_vm1, %v2365_v49 }
 0x55a   : > { %5308 = vmatprep.mubr.msk.bf16.mxu0 %vm1373_vm1, %v2367_v36 }
 0x561   : > { %5309 = vmatmul.mubr.msk.bf16.gmra.mrb[52].mxu0 %vm1373_vm1, %v2369_v16 }
 0x5ec   : > { %v5020_v8 = vpop.f32.mrb[16].mxu0 }
 0x5ed   : > { %v5021_v46 = vpop.f32.mrb[17].mxu0 }
 0x5ee   : > { %v5022_v9 = vadd.f32 %v5021_v46, %v5020_v8  ;;  %v5023_v25 = vpop.f32.mrb[18].mxu0 }
 0x5ef   : > { %v5024_v3 = vpop.f32.mrb[19].mxu0 }
 0x5f0   : > { %v2326_v2 = vmul.f32 %v5948_v28, %v5022_v9  ;;  %v5025_v30 = vadd.f32 %v5024_v3, %v5023_v25 }
 0x5f2   : > { %v2327_v15 = vmul.f32 %v5948_v28, %v5025_v30 }
 0x5f4   : > { %v5026_v53 = vpop.f32.mrb[20].mxu0  ;;  %v7623_v0 = vpack.c.bf16 %v2327_v15, %v2326_v2 }
 0x5f5   : > { %v5027_v20 = vpop.f32.mrb[21].mxu0 }
 0x5f6   : > { %v5028_v29 = vadd.f32 %v5027_v20, %v5026_v53  ;;  %v5029_v24 = vpop.f32.mrb[22].mxu0 }
 0x5f7   : > { %v5030_v61 = vpop.f32.mrb[23].mxu0 }
 0x5f8   : > { %v2328_v19 = vmul.f32 %v5948_v28, %v5028_v29  ;;  %v5031_v54 = vadd.f32 %v5030_v61, %v5029_v24 }
 0x5fa   : > { %v2329_v10 = vmul.f32 %v5948_v28, %v5031_v54 }
 0x5fc   : > { %v7625_v22 = vpop.f32.mrb[24].mxu0  ;;  %v7627_v39 = vpack.c.bf16 %v2329_v10, %v2328_v19 }
 0x5fd   : > { %v7629_v44 = vpop.f32.mrb[25].mxu0 }
 0x5fe   : > { %v7631_v12 = vpop.f32.mrb[26].mxu0 }
 0x5ff   : > { %v7633_v40 = vpop.f32.mrb[27].mxu0 }
 0x604   : > { %v7635_v42 = vpop.f32.mrb[28].mxu0 }
 0x605   : > { %v2581_v1 = vmax.f32 %v7625_v22, %v7635_v42  ;;  %v7639_v50 = vpop.f32.mrb[29].mxu0 }
 0x606   : > { %v2579_v45 = vmax.f32 %v7629_v44, %v7639_v50  ;;  %v7643_v56 = vpop.f32.mrb[30].mxu0 }
 0x607   : > { %v2582_v13 = vmax.f32 %v7631_v12, %v7643_v56  ;;  %v7647_v37 = vpop.f32.mrb[31].mxu0 }
 0x608   : > { %v2580_v18 = vmax.f32 %v7633_v40, %v7647_v37 }
 0x60c   : > { %v7651_v23 = vpop.f32.mrb[32].mxu0 }
 0x60d   : > { %v2585_v47 = vmax.f32 %v2581_v1, %v7651_v23  ;;  %v7654_v17 = vpop.f32.mrb[33].mxu0 }
 0x60e   : > { %v2583_v43 = vmax.f32 %v2579_v45, %v7654_v17  ;;  %v7657_v14 = vpop.f32.mrb[34].mxu0 }
 0x60f   : > { %v2586_v55 = vmax.f32 %v2582_v13, %v7657_v14  ;;  %v7660_v49 = vpop.f32.mrb[35].mxu0 }
 0x610   : > { %v2584_v36 = vmax.f32 %v2580_v18, %v7660_v49 }
 0x614   : > { %v7663_v16 = vpop.f32.mrb[36].mxu0 }
 0x615   : > { %v2589_v7 = vmax.f32 %v2585_v47, %v7663_v16  ;;  %v7666_v41 = vpop.f32.mrb[37].mxu0 }
 0x616   : > { %v2587_v32 = vmax.f32 %v2583_v43, %v7666_v41  ;;  %v7669_v62 = vpop.f32.mrb[38].mxu0 }
 0x617   : > { %v2590_v4 = vmax.f32 %v2586_v55, %v7669_v62  ;;  %v7672_v11 = vpop.f32.mrb[39].mxu0 }
 0x618   : > { %v2588_v58 = vmax.f32 %v2584_v36, %v7672_v11 }
 0x61c   : > { %v7675_v38 = vpop.f32.mrb[40].mxu0 }
 0x61d   : > { %v2593_v5 = vmax.f32 %v2589_v7, %v7675_v38  ;;  %v7678_v59 = vpop.f32.mrb[41].mxu0 }
 0x61e   : > { %v2591_v63 = vmax.f32 %v2587_v32, %v7678_v59  ;;  %v7681_v27 = vpop.f32.mrb[42].mxu0 }
 0x61f   : > { %v2594_v60 = vmax.f32 %v2590_v4, %v7681_v27  ;;  %v7684_v51 = vpop.f32.mrb[43].mxu0 }
 0x620   : > { %v2592_v35 = vmax.f32 %v2588_v58, %v7684_v51 }
 0x624   : > { %v7687_v21 = vpop.f32.mrb[44].mxu0 }
 0x625   : > { %v2597_v34 = vmax.f32 %v2593_v5, %v7687_v21  ;;  %v7690_v6 = vpop.f32.mrb[45].mxu0 }
 0x626   : > { %v2595_v52 = vmax.f32 %v2591_v63, %v7690_v6  ;;  %v7693_v57 = vpop.f32.mrb[46].mxu0 }
 0x627   : > { %v2598_v33 = vmax.f32 %v2594_v60, %v7693_v57  ;;  %v7696_v8 = vpop.f32.mrb[47].mxu0 }
 0x628   : > { %v2596_v46 = vmax.f32 %v2592_v35, %v7696_v8 }
 0x62c   : > { %v7699_v9 = vpop.f32.mrb[48].mxu0 }
 0x62d   : > { %v2601_v25 = vmax.f32 %v2597_v34, %v7699_v9  ;;  %v7702_v28 = vpop.f32.mrb[49].mxu0 }
 0x62e   : > { %v2599_v3 = vmax.f32 %v2595_v52, %v7702_v28  ;;  %v7705_v2 = vpop.f32.mrb[50].mxu0 }
 0x62f   : > { %v2602_v30 = vmax.f32 %v2598_v33, %v7705_v2  ;;  %v7708_v15 = vpop.f32.mrb[51].mxu0 }
 0x630   : > { %v2600_v53 = vmax.f32 %v2596_v46, %v7708_v15 }
 0x634   : > { %v7711_v20 = vpop.f32.mrb[52].mxu0 }
 0x635   : > { %v2605_v29 = vmax.f32 %v2601_v25, %v7711_v20  ;;  %v7714_v24 = vpop.f32.mrb[53].mxu0 }
 0x636   : > { %v2603_v61 = vmax.f32 %v2599_v3, %v7714_v24  ;;  %v7717_v19 = vpop.f32.mrb[54].mxu0 }
 0x637   : > { %v2606_v54 = vmax.f32 %v2602_v30, %v7717_v19  ;;  %v7720_v10 = vpop.f32.mrb[55].mxu0 }
 0x638   : > { %v2604_v1 = vmax.f32 %v2600_v53, %v7720_v10 }
 0x639   : > { %v2608_v45 = vmax.f32 %v2605_v29, %v2606_v54 }
 0x63a   : > { %v2607_v13 = vmax.f32 %v2603_v61, %v2604_v1 }
 0x63c   : > { %v2609_v18 = vmax.f32 %v2607_v13, %v2608_v45 }
 0x63e   : > { %v2610_v47 = vrot.slane %v2609_v18, 4 }
 0x640   : > { %v2611_v43 = vmax.f32 %v2609_v18, %v2610_v47 }
 0x642   : > { %v2612_v55 = vrot.slane %v2611_v43, 2 }
 0x644   : > { %v2613_v36 = vmax.f32 %v2611_v43, %v2612_v55 }
 0x646   : > { %v2614_v7 = vrot.slane %v2613_v36, 1 }
 0x648   : > { %v7723_v32 = vmax.f32 %v2613_v36, %v2614_v7 }
 0x64a   : > { %v2616_v4 = vsub.f32 %v7629_v44, %v7723_v32  ;;  %v2617_v58 = vsub.f32 %v7633_v40, %v7723_v32  ;;  %v2618_v5 = vsub.f32 %v7625_v22, %v7723_v32  ;;  %v2619_v63 = vsub.f32 %v7631_v12, %v7723_v32 }
 0x64b   : > { %v2620_v48 = vsub.f32 %v7639_v50, %v7723_v32  ;;  %v2621_v60 = vsub.f32 %v7647_v37, %v7723_v32  ;;  %v2622_v35 = vsub.f32 %v7635_v42, %v7723_v32  ;;  %v2623_v44 = vsub.f32 %v7643_v56, %v7723_v32 }
 0x64c   : > { %v2624_v40 = vsub.f32 %v7654_v17, %v7723_v32  ;;  %v2625_v22 = vsub.f32 %v7660_v49, %v7723_v32  ;;  %v2626_v12 = vsub.f32 %v7651_v23, %v7723_v32  ;;  %v2627_v50 = vsub.f32 %v7657_v14, %v7723_v32 }
 0x64d   : > { %v2628_v37 = vsub.f32 %v7666_v41, %v7723_v32  ;;  %v2629_v42 = vsub.f32 %v7672_v11, %v7723_v32  ;;  %v2630_v56 = vsub.f32 %v7663_v16, %v7723_v32  ;;  %v2631_v17 = vsub.f32 %v7669_v62, %v7723_v32 }
 0x64e   : > { %v2632_v49 = vsub.f32 %v7678_v59, %v7723_v32  ;;  %v2633_v23 = vsub.f32 %v7684_v51, %v7723_v32  ;;  %v2634_v14 = vsub.f32 %v7675_v38, %v7723_v32  ;;  %v2635_v41 = vsub.f32 %v7681_v27, %v7723_v32 }
 0x64f   : > { %v2636_v11 = vsub.f32 %v7690_v6, %v7723_v32  ;;  %v2637_v16 = vsub.f32 %v7696_v8, %v7723_v32  ;;  %v2638_v62 = vsub.f32 %v7687_v21, %v7723_v32  ;;  %v2639_v59 = vsub.f32 %v7693_v57, %v7723_v32 }
 0x650   : > { %v2640_v51 = vsub.f32 %v7702_v28, %v7723_v32  ;;  %v2641_v38 = vsub.f32 %v7708_v15, %v7723_v32  ;;  %v2642_v27 = vsub.f32 %v7699_v9, %v7723_v32  ;;  %v2643_v34 = vsub.f32 %v7705_v2, %v7723_v32 }
 0x651   : > { %v2644_v6 = vsub.f32 %v7714_v24, %v7723_v32  ;;  %v2645_v52 = vsub.f32 %v7720_v10, %v7723_v32  ;;  %v2646_v33 = vsub.f32 %v7711_v20, %v7723_v32  ;;  %v2647_v46 = vsub.f32 %v7717_v19, %v7723_v32 }
 0x652   : > { %v2648_v25 = vmul.f32 1.442695, %v2616_v4  ;;  %v2650_v3 = vmul.f32 1.442695, %v2617_v58  ;;  %v2652_v30 = vmul.f32 1.442695, %v2618_v5 }
 0x653   : > { %v2654_v53 = vmul.f32 1.442695, %v2619_v63  ;;  %v2656_v29 = vmul.f32 1.442695, %v2620_v48  ;;  %v2658_v61 = vmul.f32 1.442695, %v2621_v60 }
 0x654   : > { %5949 = vpow2.f32 %v2648_v25  ;;  %v2660_v54 = vmul.f32 1.442695, %v2622_v35  ;;  %v2662_v1 = vmul.f32 1.442695, %v2623_v44  ;;  %v2664_v45 = vmul.f32 1.442695, %v2624_v40 }
 0x655   : > { %5951 = vpow2.f32 %v2650_v3  ;;  %v2666_v13 = vmul.f32 1.442695, %v2625_v22  ;;  %v2668_v18 = vmul.f32 1.442695, %v2626_v12  ;;  %v2670_v47 = vmul.f32 1.442695, %v2627_v50 }
 0x656   : > { %5953 = vpow2.f32 %v2652_v30  ;;  %v2672_v43 = vmul.f32 1.442695, %v2628_v37  ;;  %v2674_v55 = vmul.f32 1.442695, %v2629_v42  ;;  %v2676_v7 = vmul.f32 1.442695, %v2630_v56 }
 0x657   : > { %5955 = vpow2.f32 %v2654_v53  ;;  %v2678_v58 = vmul.f32 1.442695, %v2631_v17  ;;  %v2680_v63 = vmul.f32 1.442695, %v2632_v49  ;;  %v2682_v44 = vmul.f32 1.442695, %v2633_v23 }
 0x658   : > { %5957 = vpow2.f32 %v2656_v29  ;;  %v2684_v22 = vmul.f32 1.442695, %v2634_v14  ;;  %v2686_v42 = vmul.f32 1.442695, %v2635_v41  ;;  %v2688_v17 = vmul.f32 1.442695, %v2636_v11 }
 0x659   : > { %5959 = vpow2.f32 %v2658_v61  ;;  %v2690_v14 = vmul.f32 1.442695, %v2637_v16  ;;  %v2692_v41 = vmul.f32 1.442695, %v2638_v62  ;;  %v2694_v8 = vmul.f32 1.442695, %v2639_v59 }
 0x65a   : > { %5961 = vpow2.f32 %v2660_v54  ;;  %v2696_v21 = vmul.f32 1.442695, %v2640_v51  ;;  %v2698_v57 = vmul.f32 1.442695, %v2641_v38  ;;  %v2700_v28 = vmul.f32 1.442695, %v2642_v27 }
 0x65b   : > { %5963 = vpow2.f32 %v2662_v1  ;;  %v2702_v15 = vmul.f32 1.442695, %v2643_v34  ;;  %v2704_v9 = vmul.f32 1.442695, %v2644_v6  ;;  %v2706_v2 = vmul.f32 1.442695, %v2645_v52 }
 0x65c   : > { %5965 = vpow2.f32 %v2664_v45 }
 0x65d   : > { %5967 = vpow2.f32 %v2666_v13 }
 0x65e   : > { %v7789_v36 = vpop.eup %5949  ;;  %5969 = vpow2.f32 %v2668_v18  ;;  %v2708_v18 = vmul.f32 1.442695, %v2646_v33 }
 0x65f   : > { %v7791_v4 = vpop.eup %5951  ;;  %5971 = vpow2.f32 %v2670_v47 }
 0x660   : > { %v7793_v5 = vpop.eup %5953  ;;  %5973 = vpow2.f32 %v2672_v43  ;;  %v2712_v48 = vadd.f32 %v7791_v4, %v7789_v36  ;;  %v2749_v60 = vpack.c.bf16 %v7791_v4, %v7789_v36  ;;  %v2710_v43 = vmul.f32 1.442695, %v2647_v46 }
 0x661   : > { %v7799_v35 = vpop.eup %5955  ;;  %5975 = vpow2.f32 %v2674_v55 }
 0x662   : > { %v7801_v40 = vpop.eup %5957  ;;  %5977 = vpow2.f32 %v2676_v7  ;;  %v2713_v12 = vadd.f32 %v7793_v5, %v2712_v48  ;;  %v2750_v50 = vpack.c.bf16 %v7799_v35, %v7793_v5 }
 0x663   : > { %v7806_v37 = vpop.eup %5959  ;;  %5979 = vpow2.f32 %v2678_v58 }
 0x664   : > { %v7808_v56 = vpop.eup %5961  ;;  %5981 = vpow2.f32 %v2680_v63  ;;  %v2714_v49 = vadd.f32 %v7799_v35, %v2713_v12  ;;  %v2751_v23 = vpack.c.bf16 %v7806_v37, %v7801_v40 }
 0x665   : > { %v7813_v25 = vpop.eup %5963  ;;  %5983 = vpow2.f32 %v2682_v44 }
 0x666   : > { %v7818_v3 = vpop.eup %5965  ;;  %5985 = vpow2.f32 %v2684_v22  ;;  %v2715_v11 = vadd.f32 %v7801_v40, %v2714_v49  ;;  %v2752_v30 = vpack.c.bf16 %v7813_v25, %v7808_v56 }
 0x667   : > { %v7826_v53 = vpop.eup %5967  ;;  %5987 = vpow2.f32 %v2686_v42 }
 0x668   : > { %v7831_v16 = vpop.eup %5969  ;;  %5989 = vpow2.f32 %v2688_v17  ;;  %v2716_v62 = vadd.f32 %v7806_v37, %v2715_v11  ;;  %v2753_v29 = vpack.c.bf16 %v7826_v53, %v7818_v3 }
 0x669   : > { %v7839_v61 = vpop.eup %5971  ;;  %5991 = vpow2.f32 %v2690_v14 }
 0x66a   : > { %v7844_v59 = vpop.eup %5973  ;;  %5993 = vpow2.f32 %v2692_v41  ;;  %v2717_v51 = vadd.f32 %v7808_v56, %v2716_v62  ;;  %v2754_v54 = vpack.c.bf16 %v7839_v61, %v7831_v16 }
 0x66b   : > { %v7852_v1 = vpop.eup %5975  ;;  %5995 = vpow2.f32 %v2694_v8 }
 0x66c   : > { %v7857_v38 = vpop.eup %5977  ;;  %5997 = vpow2.f32 %v2696_v21  ;;  %v2718_v27 = vadd.f32 %v7813_v25, %v2717_v51  ;;  %v2755_v45 = vpack.c.bf16 %v7852_v1, %v7844_v59  ;;  %v2337_v51 = vld [vmem:[#allocation4 + $0x58] sm:$0xff] }
 0x66d   : > { %v7865_v13 = vpop.eup %5979  ;;  %5999 = vpow2.f32 %v2698_v57 }
 0x66e   : > { %v5982_v34 = vpop.eup %5981  ;;  %6001 = vpow2.f32 %v2700_v28  ;;  %v2719_v24 = vadd.f32 %v7818_v3, %v2718_v27  ;;  %v2756_v6 = vpack.c.bf16 %v7865_v13, %v7857_v38 }
 0x66f   : > { %v5984_v47 = vpop.eup %5983  ;;  %6003 = vpow2.f32 %v2702_v15  ;;  %v2823_v15 = vld [vmem:[%s6901_s14 + $0x70] sm:$0xff] }
 0x670   : > { %v5986_v55 = vpop.eup %5985  ;;  %6005 = vpow2.f32 %v2704_v9  ;;  %v2720_v10 = vadd.f32 %v7826_v53, %v2719_v24  ;;  %v2757_v52 = vpack.c.bf16 %v5984_v47, %v5982_v34  ;;  %v2334_v53 = vld [vmem:[#allocation4 + $0x40] sm:$0xff] }
 0x671   : > { %v5988_v7 = vpop.eup %5987  ;;  %6007 = vpow2.f32 %v2706_v2 }
 0x672   : > { %v5990_v20 = vpop.eup %5989  ;;  %6009 = vpow2.f32 %v2708_v18  ;;  %v2721_v33 = vadd.f32 %v7831_v16, %v2720_v10  ;;  %5050 = vmatprep.subr.bf16.mxu1 %v2757_v52  ;;  %v2758_v58 = vpack.c.bf16 %v5988_v7, %v5986_v55 }
 0x673   : > { %v5992_v63 = vpop.eup %5991  ;;  %6011 = vpow2.f32 %v2710_v43  ;;  %5051 = vmatpush3.bf16.msra.mxu1 %v2749_v60 }
 0x674   : > { %v5994_v19 = vpop.eup %5993  ;;  %v2722_v32 = vadd.f32 %v7839_v61, %v2721_v33  ;;  %5052 = vmatprep.subr.bf16.mxu1 %v2758_v58  ;;  %v2759_v46 = vpack.c.bf16 %v5992_v63, %v5990_v20 }
 0x675   : > { %v5996_v48 = vpop.eup %5995 }
 0x676   : > { %v5998_v44 = vpop.eup %5997  ;;  %v2723_v22 = vadd.f32 %v7844_v59, %v2722_v32  ;;  %v2760_v12 = vpack.c.bf16 %v5996_v48, %v5994_v19 }
 0x677   : > { %v6000_v42 = vpop.eup %5999  ;;  %5053 = vmatpush3.bf16.msra.mxu1 %v2750_v50 }
 0x678   : > { %v6002_v17 = vpop.eup %6001  ;;  %v2724_v49 = vadd.f32 %v7852_v1, %v2723_v22  ;;  %5054 = vmatprep.subr.bf16.mxu1 %v2759_v46  ;;  %v2761_v36 = vpack.c.bf16 %v6000_v42, %v5998_v44  ;;  %v2829_v1 = vpop.permute.xlu0 %2828 }
 0x679   : > { %v6004_v4 = vpop.eup %6003 }
 0x67a   : > { %v6006_v60 = vpop.eup %6005  ;;  %v2725_v14 = vadd.f32 %v7857_v38, %v2724_v49  ;;  %v2762_v41 = vpack.c.bf16 %v6004_v4, %v6002_v17 }
 0x67b   : > { %v6008_v11 = vpop.eup %6007  ;;  %5055 = vmatpush3.bf16.msra.mxu1 %v2751_v23 }
 0x67c   : > { %v6010_v8 = vpop.eup %6009  ;;  %v2726_v21 = vadd.f32 %v7865_v13, %v2725_v14  ;;  %5056 = vmatprep.subr.bf16.mxu1 %v2760_v12  ;;  %v2763_v5 = vpack.c.bf16 %v6008_v11, %v6006_v60  ;;  %v2833_v13 = vpop.permute.xlu0 %2832 }
 0x67d   : > { %v6012_v35 = vpop.eup %6011 }
 0x67e   : > { %v2727_v50 = vadd.f32 %v5982_v34, %v2726_v21  ;;  %v2764_v62 = vpack.c.bf16 %v6012_v35, %v6010_v8 }
 0x67f   : > { %5057 = vmatpush3.bf16.msra.mxu1 %v2752_v30  ;;  %v2822_v30 = vld [vmem:[%s6901_s14 + $0x60] sm:$0xff] }
 0x680   : > { %v2728_v57 = vadd.f32 %v5984_v47, %v2727_v50  ;;  %5058 = vmatprep.subr.bf16.mxu1 %v2761_v36  ;;  %v2837_v34 = vpop.permute.xlu0 %2836 }
 0x682   : > { %v2729_v28 = vadd.f32 %v5986_v55, %v2728_v57 }
 0x683   : > { %5059 = vmatpush3.bf16.msra.mxu1 %v2753_v29 }
 0x684   : > { %v2730_v40 = vadd.f32 %v5988_v7, %v2729_v28  ;;  %5060 = vmatprep.subr.bf16.mxu1 %v2762_v41  ;;  %v2841_v24 = vpop.permute.xlu0 %2840 }
 0x686   : > { %v2731_v37 = vadd.f32 %v5990_v20, %v2730_v40 }
 0x687   : > { %5061 = vmatpush3.bf16.msra.mxu1 %v2754_v54  ;;  %v2336_v54 = vld [vmem:[#allocation4 + $0x50] sm:$0xff] }
 0x688   : > { %v2732_v23 = vadd.f32 %v5992_v63, %v2731_v37  ;;  %5062 = vmatprep.subr.bf16.mxu1 %v2763_v5  ;;  %v2845_v47 = vpop.permute.xlu0 %2844 }
 0x68a   : > { %v2733_v56 = vadd.f32 %v5994_v19, %v2732_v23 }
 0x68b   : > { %5063 = vmatpush3.bf16.msra.mxu1 %v2755_v45  ;;  %v2831_v45 = vpop.permute.xlu1 %2830 }
 0x68c   : > { %v2734_v25 = vadd.f32 %v5996_v48, %v2733_v56  ;;  %5064 = vmatprep.subr.bf16.mxu1 %v2764_v62  ;;  %v2849_v55 = vpop.permute.xlu0 %2848 }
 0x68e   : > { %v2735_v3 = vadd.f32 %v5998_v44, %v2734_v25 }
 0x68f   : > { %5065 = vmatpush3.bf16.msra.mxu1 %v2756_v6  ;;  %v2835_v2 = vpop.permute.xlu1 %2834 }
 0x690   : > { %v2736_v29 = vadd.f32 %v6000_v42, %v2735_v3  ;;  %5312 = vmatprep.subr.bf16.mxu1 %v2822_v30  ;;  %v2853_v52 = vpop.permute.xlu0 %2852 }
 0x692   : > { %v2737_v38 = vadd.f32 %v6002_v17, %v2736_v29  ;;  %2798 = vmatmul.mubr.bf16.vlgmr.msra.gmra.mrb[56].mxu1 %v2334_v53 }
 0x693   : > { %2805 = vmatprep.mubr.bf16.mxu1 %v2337_v51  ;;  %5313 = vmatpush3.bf16.msra.mxu1 %v2822_v30  ;;  %v2839_v18 = vpop.permute.xlu1 %2838 }
 0x694   : > { %v2738_v16 = vadd.f32 %v6004_v4, %v2737_v38  ;;  %5314 = vmatprep.subr.bf16.mxu1 %v2823_v15  ;;  %v2857_v20 = vpop.permute.xlu0 %2856 }
 0x696   : > { %v2739_v61 = vadd.f32 %v6006_v60, %v2738_v16 }
 0x697   : > { %5315 = vmatpush3.bf16.msra.mxu1 %v2823_v15  ;;  %v2843_v6 = vpop.permute.xlu1 %2842 }
 0x698   : > { %v2740_v59 = vadd.f32 %v6008_v11, %v2739_v61 }
 0x69a   : > { %v2741_v9 = vadd.f32 %v6010_v8, %v2740_v59  ;;  %2806 = vmatmul.mubr.bf16.gmra.mrb[60].mxu1 %v2336_v54 }
 0x69b   : > { %5316 = vmatprep.mubr.msk.bf16.mxu1 %vm1373_vm1, %v2829_v1  ;;  %v2847_v43 = vpop.permute.xlu1 %2846 }
 0x69c   : > { %v2742_v27 = vadd.f32 %v6012_v35, %v2741_v9 }
 0x69e   : > { %v2743_v58 = vrot.slane %v2742_v27, 4 }
 0x69f   : > { %v2851_v10 = vpop.permute.xlu1 %2850 }
 0x6a0   : > { %v2744_v63 = vadd.f32 %v2743_v58, %v2742_v27 }
 0x6a2   : > { %5317 = vmatmul.mubr.msk.bf16.vlgmr.msra.gmra.mrb[64].mxu1 %vm1373_vm1, %v2831_v45  ;;  %v2745_v19 = vrot.slane %v2744_v63, 2 }
 0x6a3   : > { %5320 = vmatprep.mubr.msk.bf16.mxu1 %vm1373_vm1, %v2833_v13  ;;  %v2855_v7 = vpop.permute.xlu1 %2854 }
 0x6a4   : > { %v2746_v32 = vadd.f32 %v2745_v19, %v2744_v63 }
 0x6a6   : > { %v2747_v46 = vrot.slane %v2746_v32, 1 }
 0x6a7   : > { %v2859_v33 = vpop.permute.xlu1 %2858 }
 0x6a8   : > { %v2748_v48 = vadd.f32 %v2747_v46, %v2746_v32 }
 0x6aa   : > { %5321 = vmatmul.mubr.msk.bf16.gmra.mrb[68].mxu1 %vm1373_vm1, %v2835_v2  ;;  %6013 = vrcp.f32 %v2748_v48 }
 0x6ab   : > { %5324 = vmatprep.mubr.msk.bf16.mxu1 %vm1373_vm1, %v2837_v34 }
 0x6b2   : > { %5325 = vmatmul.mubr.msk.bf16.gmra.mrb[72].mxu1 %vm1373_vm1, %v2839_v18 }
 0x6b3   : > { %5328 = vmatprep.mubr.msk.bf16.mxu1 %vm1373_vm1, %v2841_v24 }
 0x6b4   : > { %v6014_v17 = vpop.eup %6013 }
 0x6ba   : > { %5329 = vmatmul.mubr.msk.bf16.gmra.mrb[76].mxu1 %vm1373_vm1, %v2843_v6 }
 0x6bb   : > { %5332 = vmatprep.mubr.msk.bf16.mxu1 %vm1373_vm1, %v2845_v47 }
 0x6c2   : > { %5333 = vmatmul.mubr.msk.bf16.gmra.mrb[80].mxu1 %vm1373_vm1, %v2847_v43 }
 0x6c3   : > { %5336 = vmatprep.mubr.msk.bf16.mxu1 %vm1373_vm1, %v2849_v55 }
 0x6ca   : > { %5337 = vmatmul.mubr.msk.bf16.gmra.mrb[84].mxu1 %vm1373_vm1, %v2851_v10 }
 0x6cb   : > { %5340 = vmatprep.mubr.msk.bf16.mxu1 %vm1373_vm1, %v2853_v52 }
 0x6d2   : > { %5341 = vmatmul.mubr.msk.bf16.gmra.mrb[88].mxu1 %vm1373_vm1, %v2855_v7 }
 0x6d3   : > { %5344 = vmatprep.mubr.msk.bf16.mxu1 %vm1373_vm1, %v2857_v20  ;;  %v2825_v20 = vld [vmem:[#allocation4 + $0x68] sm:$0xff] }
 0x6d4   : > { %3287 = vmatprep.mubr.bf16.mxu0 %v2825_v20 }
 0x6da   : > { %5345 = vmatmul.mubr.msk.bf16.gmra.mrb[92].mxu1 %vm1373_vm1, %v2859_v33 }
 0x765   : > { %v5066_v44 = vpop.f32.mrb[56].mxu1 }
 0x766   : > { %v5067_v22 = vpop.f32.mrb[57].mxu1 }
 0x767   : > { %v5068_v12 = vadd.f32 %v5067_v22, %v5066_v44  ;;  %v5069_v42 = vpop.f32.mrb[58].mxu1 }
 0x768   : > { %v5070_v49 = vpop.f32.mrb[59].mxu1 }
 0x769   : > { %v2816_v36 = vmul.f32 %v6014_v17, %v5068_v12  ;;  %v5071_v4 = vadd.f32 %v5070_v49, %v5069_v42 }
 0x76b   : > { %v2817_v60 = vmul.f32 %v6014_v17, %v5071_v4 }
 0x76d   : > { %v5072_v14 = vpop.f32.mrb[60].mxu1  ;;  %v7925_v41 = vpack.c.bf16 %v2817_v60, %v2816_v36 }
 0x76e   : > { %v5073_v11 = vpop.f32.mrb[61].mxu1 }
 0x76f   : > { %v5074_v8 = vadd.f32 %v5073_v11, %v5072_v14  ;;  %v5075_v21 = vpop.f32.mrb[62].mxu1 }
 0x770   : > { %v5076_v5 = vpop.f32.mrb[63].mxu1 }
 0x771   : > { %v2818_v35 = vmul.f32 %v6014_v17, %v5074_v8  ;;  %v5077_v50 = vadd.f32 %v5076_v5, %v5075_v21 }
 0x773   : > { %v2819_v62 = vmul.f32 %v6014_v17, %v5077_v50 }
 0x775   : > { %v7927_v57 = vpop.f32.mrb[64].mxu1  ;;  %v7929_v28 = vpack.c.bf16 %v2819_v62, %v2818_v35 }
 0x776   : > { %v7931_v40 = vpop.f32.mrb[65].mxu1 }
 0x777   : > { %v7933_v37 = vpop.f32.mrb[66].mxu1 }
 0x778   : > { %v7935_v23 = vpop.f32.mrb[67].mxu1 }
 0x77d   : > { %v7937_v56 = vpop.f32.mrb[68].mxu1 }
 0x77e   : > { %v3071_v25 = vmax.f32 %v7927_v57, %v7937_v56  ;;  %v7941_v30 = vpop.f32.mrb[69].mxu1 }
 0x77f   : > { %v3069_v3 = vmax.f32 %v7931_v40, %v7941_v30  ;;  %v7945_v53 = vpop.f32.mrb[70].mxu1 }
 0x780   : > { %v3072_v29 = vmax.f32 %v7933_v37, %v7945_v53  ;;  %v7949_v51 = vpop.f32.mrb[71].mxu1 }
 0x781   : > { %v3070_v15 = vmax.f32 %v7935_v23, %v7949_v51 }
 0x785   : > { %v7953_v38 = vpop.f32.mrb[72].mxu1 }
 0x786   : > { %v3075_v16 = vmax.f32 %v3071_v25, %v7953_v38  ;;  %v7956_v61 = vpop.f32.mrb[73].mxu1 }
 0x787   : > { %v3073_v54 = vmax.f32 %v3069_v3, %v7956_v61  ;;  %v7959_v59 = vpop.f32.mrb[74].mxu1 }
 0x788   : > { %v3076_v1 = vmax.f32 %v3072_v29, %v7959_v59  ;;  %v7962_v9 = vpop.f32.mrb[75].mxu1 }
 0x789   : > { %v3074_v27 = vmax.f32 %v3070_v15, %v7962_v9 }
 0x78d   : > { %v7965_v45 = vpop.f32.mrb[76].mxu1 }
 0x78e   : > { %v3079_v13 = vmax.f32 %v3075_v16, %v7965_v45  ;;  %v7968_v2 = vpop.f32.mrb[77].mxu1 }
 0x78f   : > { %v3077_v34 = vmax.f32 %v3073_v54, %v7968_v2  ;;  %v7971_v18 = vpop.f32.mrb[78].mxu1 }
 0x790   : > { %v3080_v24 = vmax.f32 %v3076_v1, %v7971_v18  ;;  %v7974_v6 = vpop.f32.mrb[79].mxu1 }
 0x791   : > { %v3078_v47 = vmax.f32 %v3074_v27, %v7974_v6 }
 0x795   : > { %v7977_v43 = vpop.f32.mrb[80].mxu1 }
 0x796   : > { %v3083_v55 = vmax.f32 %v3079_v13, %v7977_v43  ;;  %v7980_v10 = vpop.f32.mrb[81].mxu1 }
 0x797   : > { %v3081_v52 = vmax.f32 %v3077_v34, %v7980_v10  ;;  %v7983_v7 = vpop.f32.mrb[82].mxu1 }
 0x798   : > { %v3084_v33 = vmax.f32 %v3080_v24, %v7983_v7  ;;  %v7986_v58 = vpop.f32.mrb[83].mxu1 }
 0x799   : > { %v3082_v63 = vmax.f32 %v3078_v47, %v7986_v58 }
 0x79d   : > { %v7989_v19 = vpop.f32.mrb[84].mxu1 }
 0x79e   : > { %v3087_v32 = vmax.f32 %v3083_v55, %v7989_v19  ;;  %v7992_v46 = vpop.f32.mrb[85].mxu1 }
 0x79f   : > { %v3085_v48 = vmax.f32 %v3081_v52, %v7992_v46  ;;  %v7995_v44 = vpop.f32.mrb[86].mxu1 }
 0x7a0   : > { %v3088_v22 = vmax.f32 %v3084_v33, %v7995_v44  ;;  %v7998_v12 = vpop.f32.mrb[87].mxu1 }
 0x7a1   : > { %v3086_v42 = vmax.f32 %v3082_v63, %v7998_v12 }
 0x7a5   : > { %v8001_v17 = vpop.f32.mrb[88].mxu1 }
 0x7a6   : > { %v3091_v49 = vmax.f32 %v3087_v32, %v8001_v17  ;;  %v8004_v36 = vpop.f32.mrb[89].mxu1 }
 0x7a7   : > { %v3089_v4 = vmax.f32 %v3085_v48, %v8004_v36  ;;  %v8007_v60 = vpop.f32.mrb[90].mxu1 }
 0x7a8   : > { %v3092_v14 = vmax.f32 %v3088_v22, %v8007_v60  ;;  %v8010_v11 = vpop.f32.mrb[91].mxu1 }
 0x7a9   : > { %v3090_v8 = vmax.f32 %v3086_v42, %v8010_v11 }
 0x7ad   : > { %v8013_v21 = vpop.f32.mrb[92].mxu1 }
 0x7ae   : > { %v3095_v5 = vmax.f32 %v3091_v49, %v8013_v21  ;;  %v8016_v35 = vpop.f32.mrb[93].mxu1 }
 0x7af   : > { %v3093_v50 = vmax.f32 %v3089_v4, %v8016_v35  ;;  %v8019_v62 = vpop.f32.mrb[94].mxu1 }
 0x7b0   : > { %v3096_v25 = vmax.f32 %v3092_v14, %v8019_v62  ;;  %v8022_v3 = vpop.f32.mrb[95].mxu1 }
 0x7b1   : > { %v3094_v29 = vmax.f32 %v3090_v8, %v8022_v3 }
 0x7b2   : > { %v3098_v15 = vmax.f32 %v3095_v5, %v3096_v25 }
 0x7b3   : > { %v3097_v16 = vmax.f32 %v3093_v50, %v3094_v29 }
 0x7b5   : > { %v3099_v54 = vmax.f32 %v3097_v16, %v3098_v15 }
 0x7b7   : > { %v3100_v1 = vrot.slane %v3099_v54, 4 }
 0x7b9   : > { %v3101_v27 = vmax.f32 %v3099_v54, %v3100_v1 }
 0x7bb   : > { %v3102_v13 = vrot.slane %v3101_v27, 2 }
 0x7bd   : > { %v3103_v34 = vmax.f32 %v3101_v27, %v3102_v13 }
 0x7bf   : > { %v3104_v24 = vrot.slane %v3103_v34, 1 }
 0x7c1   : > { %v8025_v47 = vmax.f32 %v3103_v34, %v3104_v24 }
 0x7c3   : > { %v3106_v55 = vsub.f32 %v7931_v40, %v8025_v47  ;;  %v3107_v52 = vsub.f32 %v7935_v23, %v8025_v47  ;;  %v3108_v20 = vsub.f32 %v7927_v57, %v8025_v47  ;;  %v3109_v33 = vsub.f32 %v7933_v37, %v8025_v47 }
 0x7c4   : > { %v3110_v63 = vsub.f32 %v7941_v30, %v8025_v47  ;;  %v3111_v32 = vsub.f32 %v7949_v51, %v8025_v47  ;;  %v3112_v48 = vsub.f32 %v7937_v56, %v8025_v47  ;;  %v3113_v40 = vsub.f32 %v7945_v53, %v8025_v47 }
 0x7c5   : > { %v3114_v23 = vsub.f32 %v7956_v61, %v8025_v47  ;;  %v3115_v57 = vsub.f32 %v7962_v9, %v8025_v47  ;;  %v3116_v37 = vsub.f32 %v7953_v38, %v8025_v47  ;;  %v3117_v30 = vsub.f32 %v7959_v59, %v8025_v47 }
 0x7c6   : > { %v3118_v51 = vsub.f32 %v7968_v2, %v8025_v47  ;;  %v3119_v56 = vsub.f32 %v7974_v6, %v8025_v47  ;;  %v3120_v53 = vsub.f32 %v7965_v45, %v8025_v47  ;;  %v3121_v61 = vsub.f32 %v7971_v18, %v8025_v47 }
 0x7c7   : > { %v3122_v9 = vsub.f32 %v7980_v10, %v8025_v47  ;;  %v3123_v38 = vsub.f32 %v7986_v58, %v8025_v47  ;;  %v3124_v59 = vsub.f32 %v7977_v43, %v8025_v47  ;;  %v3125_v2 = vsub.f32 %v7983_v7, %v8025_v47 }
 0x7c8   : > { %v3126_v6 = vsub.f32 %v7992_v46, %v8025_v47  ;;  %v3127_v45 = vsub.f32 %v7998_v12, %v8025_v47  ;;  %v3128_v18 = vsub.f32 %v7989_v19, %v8025_v47  ;;  %v3129_v10 = vsub.f32 %v7995_v44, %v8025_v47 }
 0x7c9   : > { %v3130_v58 = vsub.f32 %v8004_v36, %v8025_v47  ;;  %v3131_v43 = vsub.f32 %v8010_v11, %v8025_v47  ;;  %v3132_v7 = vsub.f32 %v8001_v17, %v8025_v47  ;;  %v3133_v46 = vsub.f32 %v8007_v60, %v8025_v47 }
 0x7ca   : > { %v3134_v22 = vsub.f32 %v8016_v35, %v8025_v47  ;;  %v3135_v42 = vsub.f32 %v8022_v3, %v8025_v47  ;;  %v3136_v49 = vsub.f32 %v8013_v21, %v8025_v47  ;;  %v3137_v4 = vsub.f32 %v8019_v62, %v8025_v47 }
 0x7cb   : > { %v3138_v14 = vmul.f32 1.442695, %v3106_v55  ;;  %v3140_v8 = vmul.f32 1.442695, %v3107_v52  ;;  %v3142_v5 = vmul.f32 1.442695, %v3108_v20 }
 0x7cc   : > { %v3144_v50 = vmul.f32 1.442695, %v3109_v33  ;;  %v3146_v25 = vmul.f32 1.442695, %v3110_v63  ;;  %v3148_v29 = vmul.f32 1.442695, %v3111_v32 }
 0x7cd   : > { %6015 = vpow2.f32 %v3138_v14  ;;  %v3150_v15 = vmul.f32 1.442695, %v3112_v48  ;;  %v3152_v16 = vmul.f32 1.442695, %v3113_v40  ;;  %v3154_v54 = vmul.f32 1.442695, %v3114_v23 }
 0x7ce   : > { %6017 = vpow2.f32 %v3140_v8  ;;  %v3156_v1 = vmul.f32 1.442695, %v3115_v57  ;;  %v3158_v27 = vmul.f32 1.442695, %v3116_v37  ;;  %v3160_v13 = vmul.f32 1.442695, %v3117_v30 }
 0x7cf   : > { %6019 = vpow2.f32 %v3142_v5  ;;  %v3162_v34 = vmul.f32 1.442695, %v3118_v51  ;;  %v3164_v24 = vmul.f32 1.442695, %v3119_v56  ;;  %v3166_v52 = vmul.f32 1.442695, %v3120_v53 }
 0x7d0   : > { %6021 = vpow2.f32 %v3144_v50  ;;  %v3168_v33 = vmul.f32 1.442695, %v3121_v61  ;;  %v3170_v32 = vmul.f32 1.442695, %v3122_v9  ;;  %v3172_v57 = vmul.f32 1.442695, %v3123_v38 }
 0x7d1   : > { %6023 = vpow2.f32 %v3146_v25  ;;  %v3174_v30 = vmul.f32 1.442695, %v3124_v59  ;;  %v3176_v61 = vmul.f32 1.442695, %v3125_v2  ;;  %v3178_v14 = vmul.f32 1.442695, %v3126_v6 }
 0x7d2   : > { %6025 = vpow2.f32 %v3148_v29  ;;  %v3180_v59 = vmul.f32 1.442695, %v3127_v45  ;;  %v3182_v2 = vmul.f32 1.442695, %v3128_v18  ;;  %v3184_v12 = vmul.f32 1.442695, %v3129_v10 }
 0x7d3   : > { %6027 = vpow2.f32 %v3150_v15  ;;  %v3186_v19 = vmul.f32 1.442695, %v3130_v58  ;;  %v3188_v44 = vmul.f32 1.442695, %v3131_v43  ;;  %v3190_v36 = vmul.f32 1.442695, %v3132_v7 }
 0x7d4   : > { %6029 = vpow2.f32 %v3152_v16  ;;  %v3192_v11 = vmul.f32 1.442695, %v3133_v46  ;;  %v3194_v17 = vmul.f32 1.442695, %v3134_v22  ;;  %v3196_v60 = vmul.f32 1.442695, %v3135_v42 }
 0x7d5   : > { %6031 = vpow2.f32 %v3154_v54 }
 0x7d6   : > { %6033 = vpow2.f32 %v3156_v1 }
 0x7d7   : > { %v8091_v55 = vpop.eup %6015  ;;  %6035 = vpow2.f32 %v3158_v27 }
 0x7d8   : > { %v8093_v20 = vpop.eup %6017  ;;  %6037 = vpow2.f32 %v3160_v13 }
 0x7d9   : > { %v8095_v63 = vpop.eup %6019  ;;  %6039 = vpow2.f32 %v3162_v34  ;;  %v3202_v48 = vadd.f32 %v8093_v20, %v8091_v55  ;;  %v3239_v40 = vpack.c.bf16 %v8093_v20, %v8091_v55  ;;  %v3198_v34 = vmul.f32 1.442695, %v3136_v49 }
 0x7da   : > { %v8101_v23 = vpop.eup %6021  ;;  %6041 = vpow2.f32 %v3164_v24 }
 0x7db   : > { %v8103_v37 = vpop.eup %6023  ;;  %6043 = vpow2.f32 %v3166_v52  ;;  %v3203_v51 = vadd.f32 %v8095_v63, %v3202_v48  ;;  %v3240_v56 = vpack.c.bf16 %v8101_v23, %v8095_v63  ;;  %v3200_v52 = vmul.f32 1.442695, %v3137_v4 }
 0x7dc   : > { %v8108_v53 = vpop.eup %6025  ;;  %6045 = vpow2.f32 %v3168_v33 }
 0x7dd   : > { %v8110_v9 = vpop.eup %6027  ;;  %6047 = vpow2.f32 %v3170_v32  ;;  %v3204_v8 = vadd.f32 %v8101_v23, %v3203_v51  ;;  %v3241_v38 = vpack.c.bf16 %v8108_v53, %v8103_v37 }
 0x7de   : > { %v8115_v5 = vpop.eup %6029  ;;  %6049 = vpow2.f32 %v3172_v57 }
 0x7df   : > { %v8120_v50 = vpop.eup %6031  ;;  %6051 = vpow2.f32 %v3174_v30  ;;  %v3205_v6 = vadd.f32 %v8103_v37, %v3204_v8  ;;  %v3242_v25 = vpack.c.bf16 %v8115_v5, %v8110_v9 }
 0x7e0   : > { %v8128_v29 = vpop.eup %6033  ;;  %6053 = vpow2.f32 %v3176_v61 }
 0x7e1   : > { %v8133_v45 = vpop.eup %6035  ;;  %6055 = vpow2.f32 %v3178_v14  ;;  %v3206_v18 = vadd.f32 %v8108_v53, %v3205_v6  ;;  %v3243_v15 = vpack.c.bf16 %v8128_v29, %v8120_v50 }
 0x7e2   : > { %v8141_v16 = vpop.eup %6037  ;;  %6057 = vpow2.f32 %v3180_v59 }
 0x7e3   : > { %v8146_v10 = vpop.eup %6039  ;;  %6059 = vpow2.f32 %v3182_v2  ;;  %v3207_v58 = vadd.f32 %v8110_v9, %v3206_v18  ;;  %v3244_v54 = vpack.c.bf16 %v8141_v16, %v8133_v45 }
 0x7e4   : > { %v8154_v1 = vpop.eup %6041  ;;  %6061 = vpow2.f32 %v3184_v12 }
 0x7e5   : > { %v8159_v43 = vpop.eup %6043  ;;  %6063 = vpow2.f32 %v3186_v19  ;;  %v3208_v7 = vadd.f32 %v8115_v5, %v3207_v58  ;;  %v3245_v27 = vpack.c.bf16 %v8154_v1, %v8146_v10 }
 0x7e6   : > { %v8167_v13 = vpop.eup %6045  ;;  %6065 = vpow2.f32 %v3188_v44 }
 0x7e7   : > { %v6048_v46 = vpop.eup %6047  ;;  %6067 = vpow2.f32 %v3190_v36  ;;  %v3209_v35 = vadd.f32 %v8120_v50, %v3208_v7  ;;  %v3246_v22 = vpack.c.bf16 %v8167_v13, %v8159_v43  ;;  %v2824_v50 = vld [vmem:[#allocation4 + $0x60] sm:$0xff] }
 0x7e8   : > { %v6050_v24 = vpop.eup %6049  ;;  %6069 = vpow2.f32 %v3192_v11  ;;  %v3332_v7 = vld [vmem:[%s8844_s4 + $0x20] sm:$0xff] }
 0x7e9   : > { %v6052_v33 = vpop.eup %6051  ;;  %6071 = vpow2.f32 %v3194_v17  ;;  %v3210_v3 = vadd.f32 %v8128_v29, %v3209_v35  ;;  %v3247_v42 = vpack.c.bf16 %v6050_v24, %v6048_v46  ;;  %v2827_v29 = vld [vmem:[#allocation4 + $0x78] sm:$0xff]  ;;  %v3338_v35 = vld [vmem:[%s8844_s4 + $0x50] sm:$0xff] }
 0x7ea   : > { %v6054_v32 = vpop.eup %6053  ;;  %6073 = vpow2.f32 %v3196_v60  ;;  %v3335_v60 = vld [vmem:[%s8844_s4 + $0x38] sm:$0xff] }
 0x7eb   : > { %v6056_v21 = vpop.eup %6055  ;;  %6075 = vpow2.f32 %v3198_v34  ;;  %v3211_v49 = vadd.f32 %v8133_v45, %v3210_v3  ;;  %5096 = vmatprep.subr.bf16.mxu0 %v3247_v42  ;;  %v3248_v48 = vpack.c.bf16 %v6054_v32, %v6052_v33  ;;  %v3337_v34 = vld [vmem:[%s8844_s4 + $0x48] sm:$0xff]  ;;  %v3343_v3 = vld [vmem:[%s8844_s4 + $0x78] sm:$0xff] }
 0x7ec   : > { %v6058_v57 = vpop.eup %6057  ;;  %6077 = vpow2.f32 %v3200_v52  ;;  %5097 = vmatpush3.bf16.msra.mxu0 %v3239_v40  ;;  %v3341_v52 = vld [vmem:[%s8844_s4 + $0x68] sm:$0xff] }
 0x7ed   : > { %v6060_v62 = vpop.eup %6059  ;;  %v3212_v47 = vadd.f32 %v8141_v16, %v3211_v49  ;;  %5098 = vmatprep.subr.bf16.mxu0 %v3248_v48  ;;  %v3249_v4 = vpack.c.bf16 %v6058_v57, %v6056_v21 }
 0x7ee   : > { %v6062_v30 = vpop.eup %6061 }
 0x7ef   : > { %v6064_v51 = vpop.eup %6063  ;;  %v3213_v61 = vadd.f32 %v8146_v10, %v3212_v47  ;;  %v3250_v14 = vpack.c.bf16 %v6062_v30, %v6060_v62  ;;  %v2826_v10 = vld [vmem:[#allocation4 + $0x70] sm:$0xff] }
 0x7f0   : > { %v6066_v8 = vpop.eup %6065  ;;  %5099 = vmatpush3.bf16.msra.mxu0 %v3240_v56 }
 0x7f1   : > { %v6068_v59 = vpop.eup %6067  ;;  %v3214_v2 = vadd.f32 %v8154_v1, %v3213_v61  ;;  %5100 = vmatprep.subr.bf16.mxu0 %v3249_v4  ;;  %v3251_v55 = vpack.c.bf16 %v6066_v8, %v6064_v51 }
 0x7f2   : > { %v6070_v20 = vpop.eup %6069 }
 0x7f3   : > { %v6072_v40 = vpop.eup %6071  ;;  %v3215_v6 = vadd.f32 %v8159_v43, %v3214_v2  ;;  %v3252_v12 = vpack.c.bf16 %v6070_v20, %v6068_v59 }
 0x7f4   : > { %v6074_v19 = vpop.eup %6073  ;;  %5101 = vmatpush3.bf16.msra.mxu0 %v3241_v38 }
 0x7f5   : > { %v6076_v18 = vpop.eup %6075  ;;  %v3216_v44 = vadd.f32 %v8167_v13, %v3215_v6  ;;  %5102 = vmatprep.subr.bf16.mxu0 %v3250_v14  ;;  %v3253_v63 = vpack.c.bf16 %v6074_v19, %v6072_v40  ;;  %v3334_v13 = vld [vmem:[%s8844_s4 + $0x30] sm:$0xff] }
 0x7f6   : > { %v6078_v23 = vpop.eup %6077 }
 0x7f7   : > { %v3217_v56 = vadd.f32 %v6048_v46, %v3216_v44  ;;  %v3254_v36 = vpack.c.bf16 %v6078_v23, %v6076_v18  ;;  %v3336_v46 = vld [vmem:[%s8844_s4 + $0x40] sm:$0xff] }
 0x7f8   : > { %5103 = vmatpush3.bf16.msra.mxu0 %v3242_v25 }
 0x7f9   : > { %v3218_v58 = vadd.f32 %v6050_v24, %v3217_v56  ;;  %5104 = vmatprep.subr.bf16.mxu0 %v3251_v55  ;;  %v3340_v24 = vld [vmem:[%s8844_s4 + $0x60] sm:$0xff]  ;;  %v5811_v56 = vld [vmem:[%s8843_s3 + $0x10] sm:$0xff]  }
 0x7fb   : > { %v3219_v11 = vadd.f32 %v6052_v33, %v3218_v58  ;;  %v3342_v33 = vld [vmem:[%s8844_s4 + $0x70] sm:$0xff]  ;;  %v5813_v58 = vld [vmem:[%s8843_s3 + $0x20] sm:$0xff]  }
 0x7fc   : > { %5105 = vmatpush3.bf16.msra.mxu0 %v3243_v15 }
 0x7fd   : > { %v3220_v37 = vadd.f32 %v6054_v32, %v3219_v11  ;;  %5106 = vmatprep.subr.bf16.mxu0 %v3252_v12  ;;  %v5814_v11 = vld [vmem:[%s8843_s3 + $0x28] sm:$0xff]  }
 0x7ff   : > { %v3221_v53 = vadd.f32 %v6056_v21, %v3220_v37  ;;  %v5815_v37 = vld [vmem:[%s8843_s3 + $0x30] sm:$0xff]  }
 0x800   : > { %5107 = vmatpush3.bf16.msra.mxu0 %v3244_v54 }
 0x801   : > { %v3222_v38 = vadd.f32 %v6058_v57, %v3221_v53  ;;  %5108 = vmatprep.subr.bf16.mxu0 %v3253_v63  ;;  %v5816_v53 = vld [vmem:[%s8843_s3 + $0x38] sm:$0xff]  }
 0x803   : > { %v3223_v43 = vadd.f32 %v6060_v62, %v3222_v38 }
 0x804   : > { %5109 = vmatpush3.bf16.msra.mxu0 %v3245_v27  ;;  %v3333_v27 = vld [vmem:[%s8844_s4 + $0x28] sm:$0xff] }
 0x805   : > { %v3224_v9 = vadd.f32 %v6062_v30, %v3223_v43  ;;  %5110 = vmatprep.subr.bf16.mxu0 %v3254_v36  ;;  %v5812_v36 = vld [vmem:[%s8843_s3 + $0x18] sm:$0xff]  }
 0x807   : > { %v3225_v5 = vadd.f32 %v6064_v51, %v3224_v9 }
 0x808   : > { %5111 = vmatpush3.bf16.msra.mxu0 %v3246_v22  ;;  %v3339_v22 = vld [vmem:[%s8844_s4 + $0x58] sm:$0xff] }
 0x809   : > { %v3226_v25 = vadd.f32 %v6066_v8, %v3225_v5  ;;  %5348 = vmatprep.subr.bf16.mxu0 %v7301_v31 }
 0x80b   : > { %v3227_v15 = vadd.f32 %v6068_v59, %v3226_v25  ;;  %3288 = vmatmul.mubr.bf16.vlgmr.msra.gmra.mrb[56].mxu0 %v2824_v50 }
 0x80c   : > { %5349 = vmatpush3.bf16.msra.mxu0 %v7301_v31  ;;  %3295 = vmatprep.mubr.bf16.mxu0 %v2827_v29  ;;  %v5809_v31 = vld [vmem:[%s8843_s3] sm:$0xff]  }
 0x80d   : > { %v3228_v45 = vadd.f32 %v6070_v20, %v3227_v15  ;;  %5350 = vmatprep.subr.bf16.mxu0 %v7305_v26  ;;  %v3573_v15 = vld [vmem:[%s8295_s11 + $0x20] sm:$0xff] }
 0x80f   : > { %v3229_v16 = vadd.f32 %v6072_v40, %v3228_v45 }
 0x810   : > { %5351 = vmatpush3.bf16.msra.mxu0 %v7305_v26  ;;  %v3329_v26 = vld [vmem:[%s8844_s4 + $0x8] sm:$0xff] }
 0x811   : > { %v3230_v54 = vadd.f32 %v6074_v19, %v3229_v16  ;;  %5352 = vmatprep.subr.bf16.mxu0 %v7623_v0 }
 0x813   : > { %v3231_v1 = vadd.f32 %v6076_v18, %v3230_v54  ;;  %3296 = vmatmul.mubr.bf16.gmra.mrb[60].mxu0 %v2826_v10  ;;  %v3571_v54 = vld [vmem:[%s8295_s11] sm:$0xff] }
 0x814   : > { %5353 = vmatpush3.bf16.msra.mxu0 %v7623_v0  ;;  %5364 = vmatprep.mubr.bf16.mxu0 %v5809_v31  ;;  %v3328_v0 = vld [vmem:[%s8844_s4] sm:$0xff] }
 0x815   : > { %v3232_v17 = vadd.f32 %v6078_v23, %v3231_v1  ;;  %5354 = vmatprep.subr.bf16.mxu0 %v7627_v39  ;;  %v5810_v23 = vld [vmem:[%s8843_s3 + $0x8] sm:$0xff]  }
 0x817   : > { %v3233_v42 = vrot.slane %v3232_v17, 4 }
 0x818   : > { %5355 = vmatpush3.bf16.msra.mxu0 %v7627_v39  ;;  %v6267_v39 = vmov 0  }
 0x819   : > { %5356 = vmatprep.subr.bf16.mxu0 %v7925_v41  ;;  %5808 = vset.pattern.permute.xlu1 %v6267_v39  ;;  %v3234_v32 = vadd.f32 %v3233_v42, %v3232_v17 }
 0x81a   : > { %5807 = vset.pattern.permute.xlu0 %v6267_v39  ;;  %3351 = vperm.xlu1 %5808, %v3329_v26   ;;  %v3574_v26 = vld [vmem:[%s8295_s11 + $0x30] sm:$0xff] }
 0x81b   : > { %3346 = vperm.xlu0 %5807, %v3328_v0   ;;  %v3235_v21 = vrot.slane %v3234_v32, 2 }
 0x81c   : > { %5357 = vmatpush3.bf16.msra.mxu0 %v7925_v41  ;;  %v3330_v41 = vld [vmem:[%s8844_s4 + $0x10] sm:$0xff] }
 0x81d   : > { %5358 = vmatprep.subr.bf16.mxu0 %v7929_v28  ;;  %v3236_v49 = vadd.f32 %v3235_v21, %v3234_v32  ;;  %v3578_v32 = vld [vmem:[%s8295_s11 + $0x70] sm:$0xff] }
 0x81e   : > { %3356 = vperm.xlu1 %5808, %v3330_v41  }
 0x81f   : > { %v3237_v48 = vrot.slane %v3236_v49, 1 }
 0x820   : > { %5359 = vmatpush3.bf16.msra.mxu0 %v7929_v28  ;;  %v3331_v28 = vld [vmem:[%s8844_s4 + $0x18] sm:$0xff] }
 0x821   : > { %3361 = vperm.xlu0 %5807, %v3331_v28   ;;  %v3238_v57 = vadd.f32 %v3237_v48, %v3236_v49  ;;  %v3572_v28 = vld [vmem:[%s8295_s11 + $0x10] sm:$0xff] }
 0x822   : > { %3366 = vperm.xlu1 %5808, %v3332_v7  }
 0x823   : > { %6079 = vrcp.f32 %v3238_v57  ;;  %v3576_v57 = vld [vmem:[%s8295_s11 + $0x50] sm:$0xff] }
 0x825   : > { %3371 = vperm.xlu0 %5807, %v3333_v27  }
 0x826   : > { %3376 = vperm.xlu1 %5808, %v3334_v13  }
 0x829   : > { %3381 = vperm.xlu0 %5807, %v3335_v60  }
 0x82a   : > { %3386 = vperm.xlu1 %5808, %v3336_v46  }
 0x82d   : > { %3391 = vperm.xlu0 %5807, %v3337_v34   ;;  %v6080_v51 = vpop.eup %6079 }
 0x82e   : > { %3396 = vperm.xlu1 %5808, %v3338_v35  }
 0x831   : > { %3401 = vperm.xlu0 %5807, %v3339_v22   ;;  %v3577_v22 = vld [vmem:[%s8295_s11 + $0x60] sm:$0xff] }
 0x832   : > { %3406 = vperm.xlu1 %5808, %v3340_v24  }
 0x835   : > { %3411 = vperm.xlu0 %5807, %v3341_v52  }
 0x836   : > { %3416 = vperm.xlu1 %5808, %v3342_v33   ;;  %v3575_v33 = vld [vmem:[%s8295_s11 + $0x40] sm:$0xff] }
 0x839   : > { %3421 = vperm.xlu0 %5807, %v3343_v3  }
 0x899   : > { %v3352_v38 = vpop.permute.xlu1 %3351 }
 0x89a   : > { %v3347_v43 = vpop.permute.xlu0 %3346 }
 0x89d   : > { %v3357_v9 = vpop.permute.xlu1 %3356 }
 0x8a0   : > { %v3362_v5 = vpop.permute.xlu0 %3361 }
 0x8a1   : > { %v3367_v50 = vpop.permute.xlu1 %3366 }
 0x8a4   : > { %v3372_v25 = vpop.permute.xlu0 %3371 }
 0x8a5   : > { %v3377_v45 = vpop.permute.xlu1 %3376 }
 0x8a8   : > { %v3382_v31 = vpop.permute.xlu0 %3381 }
 0x8a9   : > { %v3387_v46 = vpop.permute.xlu1 %3386 }
 0x8ac   : > { %v3392_v35 = vpop.permute.xlu0 %3391 }
 0x8de   : > { %v5112_v62 = vpop.f32.mrb[56].mxu0 }
 0x8df   : > { %v5113_v47 = vpop.f32.mrb[57].mxu0 }
 0x8e0   : > { %v5114_v4 = vadd.f32 %v5113_v47, %v5112_v62  ;;  %v5115_v30 = vpop.f32.mrb[58].mxu0  ;;  %v3397_v47 = vpop.permute.xlu1 %3396 }
 0x8e1   : > { %v5116_v61 = vpop.f32.mrb[59].mxu0 }
 0x8e2   : > { %v3306_v14 = vmul.f32 %v6080_v51, %v5114_v4  ;;  %v5117_v8 = vadd.f32 %v5116_v61, %v5115_v30 }
 0x8e4   : > { %v3307_v59 = vmul.f32 %v6080_v51, %v5117_v8  ;;  %v3581_v8 = vld [vmem:[%s8295_s11 + $0xa0] sm:$0xff] }
 0x8e6   : > { %v5118_v2 = vpop.f32.mrb[60].mxu0  ;;  %v3310_v55 = vpack.c.bf16 %v3307_v59, %v3306_v14 }
 0x8e7   : > { %v5119_v20 = vpop.f32.mrb[61].mxu0 }
 0x8e8   : > { %v5120_v40 = vadd.f32 %v5119_v20, %v5118_v2  ;;  %v5121_v6 = vpop.f32.mrb[62].mxu0  ;;  %5360 = vmatprep.subr.bf16.mxu0 %v3310_v55 }
 0x8e9   : > { %v5122_v12 = vpop.f32.mrb[63].mxu0  ;;  %5361 = vmatpush3.bf16.msra.mxu0 %v3310_v55  ;;  %v3579_v55 = vld [vmem:[%s8295_s11 + $0x80] sm:$0xff] }
 0x8ea   : > { %v3308_v19 = vmul.f32 %v6080_v51, %v5120_v40  ;;  %v5123_v18 = vadd.f32 %v5122_v12, %v5121_v6  ;;  %v3582_v6 = vld [vmem:[%s8295_s11 + $0xb0] sm:$0xff]  ;;  %v3407_v12 = vpop.permute.xlu1 %3406 }
 0x8ec   : > { %v3309_v44 = vmul.f32 %v6080_v51, %v5123_v18  ;;  %v3402_v51 = vpop.permute.xlu0 %3401 }
 0x8ee   : > { %v3311_v63 = vpack.c.bf16 %v3309_v44, %v3308_v19 }
 0x8f0   : > { %5362 = vmatprep.subr.bf16.mxu0 %v3311_v63 }
 0x8f1   : > { %5363 = vmatpush3.bf16.msra.mxu0 %v3311_v63  ;;  %v3580_v63 = vld [vmem:[%s8295_s11 + $0x90] sm:$0xff] }
 0x8f4   : > { %5365 = vmatmul.mubr.bf16.vlgmr.msra.gmra.mrb[64].mxu0 %v5810_v23 }
 0x8f5   : > { %5368 = vmatprep.mubr.bf16.mxu0 %v5811_v56  ;;  %v3412_v56 = vpop.permute.xlu0 %3411 }
 0x8fc   : > { %5369 = vmatmul.mubr.bf16.gmra.mrb[68].mxu0 %v5812_v36 }
 0x8fd   : > { %5372 = vmatprep.mubr.bf16.mxu0 %v5813_v58 }
 0x904   : > { %5373 = vmatmul.mubr.bf16.gmra.mrb[72].mxu0 %v5814_v11 }
 0x905   : > { %5376 = vmatprep.mubr.bf16.mxu0 %v5815_v37 }
 0x90c   : > { %5377 = vmatmul.mubr.bf16.gmra.mrb[76].mxu0 %v5816_v53  ;;  %v3417_v53 = vpop.permute.xlu1 %3416 }
 0x9c7   : > { %v5366_v29 = vpop.f32.mrb[64].mxu0 }
 0x9c8   : > { %v3515_v16 = vadd.f32 %v5366_v29, %v3357_v9  ;;  %v3506_v10 = vpop.f32.mrb[65].mxu0  ;;  %v3422_v29 = vpop.permute.xlu0 %3421 }
 0x9c9   : > { %v3507_v1 = vadd.f32 %v3506_v10, %v3347_v43  ;;  %v5367_v17 = vpop.f32.mrb[66].mxu0  ;;  %v3584_v10 = vld [vmem:[%s8295_s11 + $0xd0] sm:$0xff] }
 0x9ca   : > { %v3518_v0 = vadd.f32 %v5367_v17, %v3362_v5  ;;  %v3509_v39 = vpop.f32.mrb[67].mxu0  ;;  %v3589_v41 = vadd.f32 %v3573_v15, %v3515_v16  ;;  %v3583_v5 = vld [vmem:[%s8295_s11 + $0xc0] sm:$0xff]  ;;  %v3586_v15 = vld [vmem:[%s8295_s11 + $0xf0] sm:$0xff] }
 0x9cb   : > { %v3510_v7 = vadd.f32 %v3509_v39, %v3352_v38  ;;  %v3587_v27 = vadd.f32 %v3571_v54, %v3507_v1  ;;  %v3585_v38 = vld [vmem:[%s8295_s11 + $0xe0] sm:$0xff] }
 0x9cc   : > { %3641 = vadd.xlane.f32.xlu0 %v3589_v41  ;;  %3607 = vst [vmem:[%s8302_s20 + $0x20] sm:$0xff] %v3589_v41  ;;  %v3590_v13 = vadd.f32 %v3574_v26, %v3518_v0  ;;  %v3623_v0 = vld [vmem:[#allocation6 + $0x10] sm:$0xff]  ;;  %v3621_v39 = vld [vmem:[#allocation6] sm:$0xff] }
 0x9cd   : > { %3637 = vadd.xlane.f32.xlu1 %v3587_v27  ;;  %3605 = vst [vmem:[%s8302_s20] sm:$0xff] %v3587_v27  ;;  %v3588_v60 = vadd.f32 %v3572_v28, %v3510_v7 }
 0x9ce   : > { %3608 = vst [vmem:[%s8302_s20 + $0x30] sm:$0xff] %v3590_v13 }
 0x9cf   : > { %v5370_v34 = vpop.f32.mrb[68].mxu0  ;;  %3606 = vst [vmem:[%s8302_s20 + $0x10] sm:$0xff] %v3588_v60 }
 0x9d0   : > { %v3522_v24 = vpop.f32.mrb[69].mxu0  ;;  %v3531_v52 = vadd.f32 %v5370_v34, %v3377_v45  ;;  %3639 = vadd.xlane.f32.xlu0 %v3588_v60  ;;  %v3624_v60 = vld [vmem:[#allocation6 + $0x18] sm:$0xff] }
 0x9d1   : > { %v3523_v3 = vadd.f32 %v3522_v24, %v3367_v50  ;;  %v5371_v42 = vpop.f32.mrb[70].mxu0  ;;  %3643 = vadd.xlane.f32.xlu1 %v3590_v13  ;;  %v3622_v13 = vld [vmem:[#allocation6 + $0x8] sm:$0xff]  ;;  %v3627_v24 = vld [vmem:[#allocation6 + $0x30] sm:$0xff] }
 0x9d2   : > { %v3534_v21 = vadd.f32 %v5371_v42, %v3382_v31  ;;  %v3525_v49 = vpop.f32.mrb[71].mxu0  ;;  %v3593_v48 = vadd.f32 %v3577_v22, %v3531_v52 }
 0x9d3   : > { %v3526_v62 = vadd.f32 %v3525_v49, %v3372_v25  ;;  %v3591_v4 = vadd.f32 %v3575_v33, %v3523_v3  ;;  %v3628_v33 = vld [vmem:[#allocation6 + $0x38] sm:$0xff] }
 0x9d4   : > { %3611 = vst [vmem:[%s8302_s20 + $0x60] sm:$0xff] %v3593_v48  ;;  %3649 = vadd.xlane.f32.xlu0 %v3593_v48  ;;  %v3594_v30 = vadd.f32 %v3578_v32, %v3534_v21  ;;  %v3625_v32 = vld [vmem:[#allocation6 + $0x20] sm:$0xff]  ;;  %v3626_v48 = vld [vmem:[#allocation6 + $0x28] sm:$0xff] }
 0x9d5   : > { %3609 = vst [vmem:[%s8302_s20 + $0x40] sm:$0xff] %v3591_v4  ;;  %v3592_v61 = vadd.f32 %v3576_v57, %v3526_v62 }
 0x9d6   : > { %3612 = vst [vmem:[%s8302_s20 + $0x70] sm:$0xff] %v3594_v30  ;;  %3651 = vadd.xlane.f32.xlu1 %v3594_v30 }
 0x9d7   : > { %v5374_v14 = vpop.f32.mrb[72].mxu0  ;;  %3610 = vst [vmem:[%s8302_s20 + $0x50] sm:$0xff] %v3592_v61 }
 0x9d8   : > { %v3538_v59 = vpop.f32.mrb[73].mxu0  ;;  %v3547_v2 = vadd.f32 %v5374_v14, %v3397_v47  ;;  %3645 = vadd.xlane.f32.xlu0 %v3591_v4  ;;  %v3631_v47 = vld [vmem:[#allocation6 + $0x50] sm:$0xff] }
 0x9d9   : > { %v3539_v20 = vadd.f32 %v3538_v59, %v3387_v46  ;;  %v5375_v40 = vpop.f32.mrb[74].mxu0 }
 0x9da   : > { %v3550_v19 = vadd.f32 %v5375_v40, %v3402_v51  ;;  %3647 = vadd.xlane.f32.xlu1 %v3592_v61  ;;  %v3541_v18 = vpop.f32.mrb[75].mxu0  ;;  %v3597_v44 = vadd.f32 %v3581_v8, %v3547_v2  ;;  %v3632_v51 = vld [vmem:[#allocation6 + $0x58] sm:$0xff]  ;;  %v3629_v8 = vld [vmem:[#allocation6 + $0x40] sm:$0xff] }
 0x9db   : > { %v3542_v23 = vadd.f32 %v3541_v18, %v3392_v35  ;;  %v3595_v36 = vadd.f32 %v3579_v55, %v3539_v20  ;;  %v3630_v55 = vld [vmem:[#allocation6 + $0x48] sm:$0xff] }
 0x9dc   : > { %3615 = vst [vmem:[%s8302_s20 + $0xa0] sm:$0xff] %v3597_v44  ;;  %3657 = vadd.xlane.f32.xlu0 %v3597_v44  ;;  %v3598_v58 = vadd.f32 %v3582_v6, %v3550_v19  ;;  %v3634_v18 = vld [vmem:[#allocation6 + $0x68] sm:$0xff] }
 0x9dd   : > { %3613 = vst [vmem:[%s8302_s20 + $0x80] sm:$0xff] %v3595_v36  ;;  %v3596_v11 = vadd.f32 %v3580_v63, %v3542_v23  ;;  %v3635_v23 = vld [vmem:[#allocation6 + $0x70] sm:$0xff] }
 0x9de   : > { %3616 = vst [vmem:[%s8302_s20 + $0xb0] sm:$0xff] %v3598_v58  ;;  %3659 = vadd.xlane.f32.xlu1 %v3598_v58  ;;  %v3636_v58 = vld [vmem:[#allocation6 + $0x78] sm:$0xff] }
 0x9df   : > { %v5378_v37 = vpop.f32.mrb[76].mxu0  ;;  %3614 = vst [vmem:[%s8302_s20 + $0x90] sm:$0xff] %v3596_v11 }
 0x9e0   : > { %v3554_v43 = vpop.f32.mrb[77].mxu0  ;;  %3653 = vadd.xlane.f32.xlu0 %v3595_v36  ;;  %v3563_v9 = vadd.f32 %v5378_v37, %v3417_v53 }
 0x9e1   : > { %v5379_v50 = vpop.f32.mrb[78].mxu0  ;;  %v3555_v25 = vadd.f32 %v3554_v43, %v3407_v12  ;;  %v3633_v12 = vld [vmem:[#allocation6 + $0x60] sm:$0xff] }
 0x9e2   : > { %v3557_v45 = vpop.f32.mrb[79].mxu0  ;;  %3655 = vadd.xlane.f32.xlu1 %v3596_v11  ;;  %v3566_v16 = vadd.f32 %v5379_v50, %v3422_v29  ;;  %v3601_v54 = vadd.f32 %v3585_v38, %v3563_v9 }
 0x9e3   : > { %v3558_v1 = vadd.f32 %v3557_v45, %v3412_v56  ;;  %v3599_v17 = vadd.f32 %v3583_v5, %v3555_v25 }
 0x9e4   : > { %3619 = vst [vmem:[%s8302_s20 + $0xe0] sm:$0xff] %v3601_v54  ;;  %v3602_v31 = vadd.f32 %v3586_v15, %v3566_v16 }
 0x9e5   : > { %3617 = vst [vmem:[%s8302_s20 + $0xc0] sm:$0xff] %v3599_v17  ;;  %3661 = vadd.xlane.f32.xlu0 %v3599_v17  ;;  %v3600_v26 = vadd.f32 %v3584_v10, %v3558_v1 }
 0x9e6   : > { %3620 = vst [vmem:[%s8302_s20 + $0xf0] sm:$0xff] %v3602_v31 }
 0x9e7   : > { %3618 = vst [vmem:[%s8302_s20 + $0xd0] sm:$0xff] %v3600_v26  ;;  %3663 = vadd.xlane.f32.xlu1 %v3600_v26 }
 0x9e9   : > { %3665 = vadd.xlane.f32.xlu0 %v3601_v54 }
 0x9eb   : > { %3667 = vadd.xlane.f32.xlu1 %v3602_v31 }
 0xa59   : > { %v3642_v41 = vpop.xlane.xlu0 %3641 }
 0xa5a   : > { %v3671_v28 = vadd.f32 %v3642_v41, %v3623_v0  ;;  %v3638_v7 = vpop.xlane.xlu1 %3637 }
 0xa5b   : > { %v3669_v27 = vadd.f32 %v3638_v7, %v3621_v39 }
 0xa5c   : > { %3688 = vst.msk [vmem:[#allocation6 + $0x10] sm:$0xff] %vm3685_vm2, %v3671_v28 }
 0xa5d   : > { %3686 = vst.msk [vmem:[#allocation6] sm:$0xff] %vm3685_vm2, %v3669_v27  ;;  %v3640_v46 = vpop.xlane.xlu0 %3639 }
 0xa5e   : > { %v3670_v34 = vadd.f32 %v3640_v46, %v3622_v13  ;;  %v3644_v35 = vpop.xlane.xlu1 %3643 }
 0xa5f   : > { %v3672_v22 = vadd.f32 %v3644_v35, %v3624_v60 }
 0xa60   : > { %3687 = vst.msk [vmem:[#allocation6 + $0x8] sm:$0xff] %vm3685_vm2, %v3670_v34 }
 0xa61   : > { %3689 = vst.msk [vmem:[#allocation6 + $0x18] sm:$0xff] %vm3685_vm2, %v3672_v22  ;;  %v3650_v52 = vpop.xlane.xlu0 %3649 }
 0xa62   : > { %v3675_v3 = vadd.f32 %v3650_v52, %v3627_v24 }
 0xa63   : > { %v3652_v42 = vpop.xlane.xlu1 %3651 }
 0xa64   : > { %3692 = vst.msk [vmem:[#allocation6 + $0x30] sm:$0xff] %vm3685_vm2, %v3675_v3  ;;  %v3676_v21 = vadd.f32 %v3652_v42, %v3628_v33 }
 0xa65   : > { %v3646_v49 = vpop.xlane.xlu0 %3645 }
 0xa66   : > { %3693 = vst.msk [vmem:[#allocation6 + $0x38] sm:$0xff] %vm3685_vm2, %v3676_v21  ;;  %v3673_v57 = vadd.f32 %v3646_v49, %v3625_v32 }
 0xa67   : > { %v3648_v62 = vpop.xlane.xlu1 %3647 }
 0xa68   : > { %3690 = vst.msk [vmem:[#allocation6 + $0x20] sm:$0xff] %vm3685_vm2, %v3673_v57  ;;  %v3674_v4 = vadd.f32 %v3648_v62, %v3626_v48 }
 0xa69   : > { %v3658_v30 = vpop.xlane.xlu0 %3657 }
 0xa6a   : > { %3691 = vst.msk [vmem:[#allocation6 + $0x28] sm:$0xff] %vm3685_vm2, %v3674_v4  ;;  %v3679_v61 = vadd.f32 %v3658_v30, %v3631_v47 }
 0xa6b   : > { %v3660_v14 = vpop.xlane.xlu1 %3659 }
 0xa6c   : > { %3696 = vst.msk [vmem:[#allocation6 + $0x50] sm:$0xff] %vm3685_vm2, %v3679_v61  ;;  %v3680_v59 = vadd.f32 %v3660_v14, %v3632_v51 }
 0xa6d   : > { %v3654_v2 = vpop.xlane.xlu0 %3653 }
 0xa6e   : > { %3697 = vst.msk [vmem:[#allocation6 + $0x58] sm:$0xff] %vm3685_vm2, %v3680_v59  ;;  %v3677_v20 = vadd.f32 %v3654_v2, %v3629_v8 }
 0xa6f   : > { %v3656_v40 = vpop.xlane.xlu1 %3655 }
 0xa70   : > { %3694 = vst.msk [vmem:[#allocation6 + $0x40] sm:$0xff] %vm3685_vm2, %v3677_v20  ;;  %v3678_v6 = vadd.f32 %v3656_v40, %v3630_v55 }
 0xa72   : > { %3695 = vst.msk [vmem:[#allocation6 + $0x48] sm:$0xff] %vm3685_vm2, %v3678_v6  ;;  %v3662_v19 = vpop.xlane.xlu0 %3661 }
 0xa73   : > { %v3681_v44 = vadd.f32 %v3662_v19, %v3633_v12 }
 0xa74   : > { %v3664_v63 = vpop.xlane.xlu1 %3663 }
 0xa75   : > { %3698 = vst.msk [vmem:[#allocation6 + $0x60] sm:$0xff] %vm3685_vm2, %v3681_v44  ;;  %v3682_v56 = vadd.f32 %v3664_v63, %v3634_v18  ;;  %3705 = sbr.rel (%p4932_p10) target bundleno = 3643 (0xe3b), region = 64 }
 0xa76   : > { %v3666_v36 = vpop.xlane.xlu0 %3665 }
 0xa77   : > { %3699 = vst.msk [vmem:[#allocation6 + $0x68] sm:$0xff] %vm3685_vm2, %v3682_v56  ;;  %v3683_v11 = vadd.f32 %v3666_v36, %v3635_v23 }
 0xa78   : > { %v3668_v37 = vpop.xlane.xlu1 %3667 }
 0xa79   : > { %3700 = vst.msk [vmem:[#allocation6 + $0x70] sm:$0xff] %vm3685_vm2, %v3683_v11  ;;  %v3684_v53 = vadd.f32 %v3668_v37, %v3636_v58 }
 0xa7b   : > { %3701 = vst.msk [vmem:[#allocation6 + $0x78] sm:$0xff] %vm3685_vm2, %v3684_v53 }
 0xa7c   : > { %v3722_v38 = vld [vmem:[#allocation6] sm:$0xff]  ;;  %v3723_v43 = vld [vmem:[#allocation6 + $0x8] sm:$0xff]  ;;  %v3724_v9 = vld [vmem:[#allocation6 + $0x10] sm:$0xff]  ;;  %v6268_v4 = vmov 0  }
 0xa7d   : > { %v5492_v5 = vpack.c.bf16 %v3723_v43, %v3722_v38  ;;  %v3725_v50 = vld [vmem:[#allocation6 + $0x18] sm:$0xff]  ;;  %v3726_v29 = vld [vmem:[#allocation6 + $0x20] sm:$0xff]  ;;  %v3727_v15 = vld [vmem:[#allocation6 + $0x28] sm:$0xff]  ;;  %6097 = vset.pattern.permute.xlu0 %v6268_v4  ;;  %6098 = vset.pattern.permute.xlu1 %v6268_v4 }
 0xa7e   : > { %v5496_v25 = vpack.c.bf16 %v3725_v50, %v3724_v9  ;;  %v5500_v45 = vpack.c.bf16 %v3727_v15, %v3726_v29  ;;  %v3706_v16 = vld [vmem:[#allocation7] sm:$0xff]  ;;  %v3728_v10 = vld [vmem:[#allocation6 + $0x30] sm:$0xff]  ;;  %v3729_v54 = vld [vmem:[#allocation6 + $0x38] sm:$0xff] }
 0xa7f   : > { %5493 = vmatprep.subr.bf16.mxu0 %v5492_v5  ;;  %5412 = vmatprep.mubr.f32.mxu0 %v3706_v16  ;;  %v5504_v1 = vpack.c.bf16 %v3729_v54, %v3728_v10  ;;  %v3730_v17 = vld [vmem:[#allocation6 + $0x40] sm:$0xff]  ;;  %v3731_v31 = vld [vmem:[#allocation6 + $0x48] sm:$0xff]  ;;  %v3732_v0 = vld [vmem:[#allocation6 + $0x50] sm:$0xff] }
 0xa80   : > { %5495 = vmatpush3.bf16.msra.mxu0 %v5492_v5  ;;  %5468 = vmatprep.mubr.f32.mxu1 %v3706_v16  ;;  %v5508_v26 = vpack.c.bf16 %v3731_v31, %v3730_v17  ;;  %v3733_v39 = vld [vmem:[#allocation6 + $0x58] sm:$0xff]  ;;  %v3734_v28 = vld [vmem:[#allocation6 + $0x60] sm:$0xff]  ;;  %v3735_v7 = vld [vmem:[#allocation6 + $0x68] sm:$0xff] }
 0xa81   : > { %5497 = vmatprep.subr.bf16.mxu0 %v5496_v25  ;;  %v5512_v41 = vpack.c.bf16 %v3733_v39, %v3732_v0  ;;  %v5516_v27 = vpack.c.bf16 %v3735_v7, %v3734_v28  ;;  %v3736_v13 = vld [vmem:[#allocation6 + $0x70] sm:$0xff]  ;;  %v8349_v34 = vld [vmem:[#allocation7 + $0x8] sm:$0xff]  ;;  %v8355_v22 = vld [vmem:[#allocation7 + $0x18] sm:$0xff] }
 0xa82   : > { %v3737_v60 = vld [vmem:[#allocation6 + $0x78] sm:$0xff]  ;;  %v8351_v35 = vld [vmem:[#allocation7 + $0x10] sm:$0xff]  ;;  %v8357_v24 = vld [vmem:[#allocation7 + $0x20] sm:$0xff] }
 0xa83   : > { %v5520_v46 = vpack.c.bf16 %v3737_v60, %v3736_v13  ;;  %v8361_v52 = vld [vmem:[#allocation7 + $0x28] sm:$0xff]  ;;  %v8363_v33 = vld [vmem:[#allocation7 + $0x30] sm:$0xff]  ;;  %v8367_v3 = vld [vmem:[#allocation7 + $0x38] sm:$0xff] }
 0xa84   : > { %5499 = vmatpush3.bf16.msra.mxu0 %v5496_v25  ;;  %v8369_v42 = vld [vmem:[#allocation7 + $0x40] sm:$0xff]  ;;  %v8373_v32 = vld [vmem:[#allocation7 + $0x48] sm:$0xff]  ;;  %v8375_v21 = vld [vmem:[#allocation7 + $0x50] sm:$0xff] }
 0xa85   : > { %5501 = vmatprep.subr.bf16.mxu0 %v5500_v45  ;;  %v8379_v49 = vld [vmem:[#allocation7 + $0x58] sm:$0xff]  ;;  %v8381_v48 = vld [vmem:[#allocation7 + $0x60] sm:$0xff]  ;;  %v8385_v57 = vld [vmem:[#allocation7 + $0x68] sm:$0xff] }
 0xa86   : > { %v8387_v62 = vld [vmem:[#allocation7 + $0x70] sm:$0xff]  ;;  %v8391_v47 = vld [vmem:[#allocation7 + $0x78] sm:$0xff]  ;;  %v3899_v16 = vld [vmem:[#allocation5] sm:$0xff] }
 0xa87   : > { %v3900_v10 = vld [vmem:[#allocation5 + $0x8] sm:$0xff]  ;;  %v3905_v31 = vld [vmem:[#allocation5 + $0x30] sm:$0xff]  ;;  %v3902_v39 = vld [vmem:[#allocation5 + $0x18] sm:$0xff] }
 0xa88   : > { %5503 = vmatpush3.bf16.msra.mxu0 %v5500_v45  ;;  %v3901_v0 = vld [vmem:[#allocation5 + $0x10] sm:$0xff] }
 0xa89   : > { %5505 = vmatprep.subr.bf16.mxu0 %v5504_v1 }
 0xa8c   : > { %5507 = vmatpush3.bf16.msra.mxu0 %v5504_v1 }
 0xa8d   : > { %5509 = vmatprep.subr.bf16.mxu0 %v5508_v26 }
 0xa90   : > { %5511 = vmatpush3.bf16.msra.mxu0 %v5508_v26  ;;  %v3906_v26 = vld [vmem:[#allocation5 + $0x38] sm:$0xff] }
 0xa91   : > { %5513 = vmatprep.subr.bf16.mxu0 %v5512_v41 }
 0xa94   : > { %5515 = vmatpush3.bf16.msra.mxu0 %v5512_v41 }
 0xa95   : > { %5517 = vmatprep.subr.bf16.mxu0 %v5516_v27 }
 0xa98   : > { %5519 = vmatpush3.bf16.msra.mxu0 %v5516_v27 }
 0xa99   : > { %5521 = vmatprep.subr.bf16.mxu0 %v5520_v46 }
 0xa9c   : > { %5523 = vmatpush3.bf16.msra.mxu0 %v5520_v46 }
 0xa9f   : > { %5413 = vmatmul.mubr.f32.vlgmr.msra.gmra.mrb[0].mxu0 %v8349_v34 }
 0xaa0   : > { %5415 = vmatprep.mubr.f32.mxu0 %v8351_v35 }
 0xaa3   : > { %5416 = vmatmul.mubr.f32.gmra.mrb[2].mxu0 %v8355_v22 }
 0xaa4   : > { %5418 = vmatprep.mubr.f32.mxu0 %v8357_v24 }
 0xaa7   : > { %5419 = vmatmul.mubr.f32.gmra.mrb[4].mxu0 %v8361_v52 }
 0xaa8   : > { %5421 = vmatprep.mubr.f32.mxu0 %v8363_v33 }
 0xaab   : > { %5422 = vmatmul.mubr.f32.gmra.mrb[6].mxu0 %v8367_v3 }
 0xaac   : > { %5424 = vmatprep.mubr.f32.mxu0 %v8369_v42 }
 0xaaf   : > { %5425 = vmatmul.mubr.f32.gmra.mrb[8].mxu0 %v8373_v32 }
 0xab0   : > { %5427 = vmatprep.mubr.f32.mxu0 %v8375_v21 }
 0xab3   : > { %5428 = vmatmul.mubr.f32.gmra.mrb[10].mxu0 %v8379_v49 }
 0xab4   : > { %5430 = vmatprep.mubr.f32.mxu0 %v8381_v48 }
 0xab7   : > { %5431 = vmatmul.mubr.f32.gmra.mrb[12].mxu0 %v8385_v57 }
 0xab8   : > { %5433 = vmatprep.mubr.f32.mxu0 %v8387_v62 }
 0xabb   : > { %5434 = vmatmul.mubr.f32.gmra.mrb[14].mxu0 %v8391_v47 }
 0xb72   : > { %v5414_v30 = vpop.f32.mrb[0].mxu0 }
 0xb73   : > { %v3804_v51 = vpop.f32.mrb[1].mxu0  ;;  %v3884_v2 = vmul.f32 0.0009765625, %v5414_v30  ;;  %v3903_v30 = vld [vmem:[#allocation5 + $0x20] sm:$0xff] }
 0xb74   : > { %v3883_v61 = vmul.f32 0.0009765625, %v3804_v51  ;;  %v3904_v51 = vld [vmem:[#allocation5 + $0x28] sm:$0xff] }
 0xb76   : > { %3933 = vperm.xlu0 %6097, %v3883_v61   ;;  %v5417_v14 = vpop.f32.mrb[2].mxu0 }
 0xb77   : > { %v3886_v8 = vmul.f32 0.0009765625, %v5417_v14  ;;  %v3814_v59 = vpop.f32.mrb[3].mxu0  ;;  %v3907_v14 = vld [vmem:[#allocation5 + $0x40] sm:$0xff] }
 0xb78   : > { %v3885_v20 = vmul.f32 0.0009765625, %v3814_v59 }
 0xb79   : > { %3948 = vperm.xlu1 %6098, %v3886_v8   ;;  %v3908_v8 = vld [vmem:[#allocation5 + $0x48] sm:$0xff] }
 0xb7a   : > { %3938 = vperm.xlu0 %6097, %v3884_v2   ;;  %v5420_v55 = vpop.f32.mrb[4].mxu0 }
 0xb7b   : > { %v3824_v40 = vpop.f32.mrb[5].mxu0  ;;  %v3888_v12 = vmul.f32 0.0009765625, %v5420_v55 }
 0xb7c   : > { %v3887_v6 = vmul.f32 0.0009765625, %v3824_v40 }
 0xb7d   : > { %3943 = vperm.xlu1 %6098, %v3885_v20  }
 0xb7e   : > { %3953 = vperm.xlu0 %6097, %v3887_v6   ;;  %v5423_v19 = vpop.f32.mrb[6].mxu0 }
 0xb7f   : > { %v3834_v18 = vpop.f32.mrb[7].mxu0  ;;  %v3890_v63 = vmul.f32 0.0009765625, %v5423_v19 }
 0xb80   : > { %v3889_v44 = vmul.f32 0.0009765625, %v3834_v18 }
 0xb81   : > { %3958 = vperm.xlu1 %6098, %v3888_v12  }
 0xb82   : > { %3963 = vperm.xlu0 %6097, %v3889_v44   ;;  %v5426_v23 = vpop.f32.mrb[8].mxu0 }
 0xb83   : > { %v3844_v56 = vpop.f32.mrb[9].mxu0  ;;  %v3892_v58 = vmul.f32 0.0009765625, %v5426_v23  ;;  %v3909_v23 = vld [vmem:[#allocation5 + $0x50] sm:$0xff] }
 0xb84   : > { %v3891_v36 = vmul.f32 0.0009765625, %v3844_v56  ;;  %v3910_v56 = vld [vmem:[#allocation5 + $0x58] sm:$0xff] }
 0xb85   : > { %3968 = vperm.xlu1 %6098, %v3890_v63  }
 0xb86   : > { %3973 = vperm.xlu0 %6097, %v3891_v36   ;;  %v5429_v11 = vpop.f32.mrb[10].mxu0 }
 0xb87   : > { %v3854_v37 = vpop.f32.mrb[11].mxu0  ;;  %v3894_v38 = vmul.f32 0.0009765625, %v5429_v11  ;;  %v3912_v11 = vld [vmem:[#allocation5 + $0x68] sm:$0xff] }
 0xb88   : > { %v3893_v53 = vmul.f32 0.0009765625, %v3854_v37 }
 0xb89   : > { %3978 = vperm.xlu1 %6098, %v3892_v58   ;;  %v3911_v58 = vld [vmem:[#allocation5 + $0x60] sm:$0xff] }
 0xb8a   : > { %3983 = vperm.xlu0 %6097, %v3893_v53   ;;  %v5432_v43 = vpop.f32.mrb[12].mxu0 }
 0xb8b   : > { %v3864_v9 = vpop.f32.mrb[13].mxu0  ;;  %v3896_v50 = vmul.f32 0.0009765625, %v5432_v43 }
 0xb8c   : > { %v3895_v5 = vmul.f32 0.0009765625, %v3864_v9 }
 0xb8d   : > { %3988 = vperm.xlu1 %6098, %v3894_v38  }
 0xb8e   : > { %3993 = vperm.xlu0 %6097, %v3895_v5   ;;  %v5435_v25 = vpop.f32.mrb[14].mxu0 }
 0xb8f   : > { %v3874_v29 = vpop.f32.mrb[15].mxu0  ;;  %v3898_v45 = vmul.f32 0.0009765625, %v5435_v25 }
 0xb90   : > { %v3897_v15 = vmul.f32 0.0009765625, %v3874_v29 }
 0xb91   : > { %3998 = vperm.xlu1 %6098, %v3896_v50  }
 0xb92   : > { %4003 = vperm.xlu0 %6097, %v3897_v15  }
 0xb95   : > { %4008 = vperm.xlu1 %6098, %v3898_v45  }
 0xbf5   : > { %v3934_v54 = vpop.permute.xlu0 %3933 }
 0xbf6   : > { %v8394_v1 = vsub.f32 %v3899_v16, %v3934_v54  ;;  %v8396_v17 = vsub.f32 %v3900_v10, %v3934_v54  ;;  %v3913_v16 = vld [vmem:[#allocation5 + $0x70] sm:$0xff]  ;;  %v3914_v10 = vld [vmem:[#allocation5 + $0x78] sm:$0xff] }
 0xbf8   : > { %v3949_v41 = vpop.permute.xlu1 %3948  ;;  %v4043_v28 = vmul.f32 %v8394_v1, %v8394_v1  ;;  %v4044_v7 = vmul.f32 %v8396_v17, %v8396_v17 }
 0xbf9   : > { %v8402_v27 = vsub.f32 %v3905_v31, %v3949_v41  ;;  %v8404_v13 = vsub.f32 %v3906_v26, %v3949_v41  ;;  %v3939_v60 = vpop.permute.xlu0 %3938  ;;  %v3915_v31 = vld [vmem:[#allocation5 + $0x80] sm:$0xff]  ;;  %v3916_v26 = vld [vmem:[#allocation5 + $0x88] sm:$0xff] }
 0xbfa   : > { %v8406_v46 = vsub.f32 %v3901_v0, %v3939_v60  ;;  %v8408_v4 = vsub.f32 %v3902_v39, %v3939_v60  ;;  %v4075_v61 = vadd.f32 %v4044_v7, %v4043_v28 }
 0xbfb   : > { %v4049_v59 = vmul.f32 %v8402_v27, %v8402_v27  ;;  %v4050_v2 = vmul.f32 %v8404_v13, %v8404_v13 }
 0xbfc   : > { %v3944_v55 = vpop.permute.xlu1 %3943  ;;  %4076 = vadd.xlane.f32.xlu0 %v4075_v61  ;;  %v4045_v20 = vmul.f32 %v8406_v46, %v8406_v46  ;;  %v4046_v40 = vmul.f32 %v8408_v4, %v8408_v4 }
 0xbfd   : > { %v8418_v6 = vsub.f32 %v3903_v30, %v3944_v55  ;;  %v8420_v12 = vsub.f32 %v3904_v51, %v3944_v55  ;;  %v3954_v19 = vpop.permute.xlu0 %3953  ;;  %v4084_v18 = vadd.f32 %v4050_v2, %v4049_v59  ;;  %v3917_v59 = vld [vmem:[#allocation5 + $0x90] sm:$0xff]  ;;  %v3918_v2 = vld [vmem:[#allocation5 + $0x98] sm:$0xff] }
 0xbfe   : > { %v8422_v44 = vsub.f32 %v3907_v14, %v3954_v19  ;;  %v8424_v63 = vsub.f32 %v3908_v8, %v3954_v19  ;;  %v4078_v36 = vadd.f32 %v4046_v40, %v4045_v20  ;;  %v3919_v20 = vld [vmem:[#allocation5 + $0xa0] sm:$0xff]  ;;  %v3920_v40 = vld [vmem:[#allocation5 + $0xa8] sm:$0xff] }
 0xbff   : > { %v4047_v37 = vmul.f32 %v8418_v6, %v8418_v6  ;;  %v4048_v53 = vmul.f32 %v8420_v12, %v8420_v12 }
 0xc00   : > { %v3959_v38 = vpop.permute.xlu1 %3958  ;;  %4079 = vadd.xlane.f32.xlu1 %v4078_v36  ;;  %4085 = vadd.xlane.f32.xlu0 %v4084_v18  ;;  %v4051_v43 = vmul.f32 %v8422_v44, %v8422_v44  ;;  %v4052_v9 = vmul.f32 %v8424_v63, %v8424_v63 }
 0xc01   : > { %v8434_v5 = vsub.f32 %v3909_v23, %v3959_v38  ;;  %v8436_v50 = vsub.f32 %v3910_v56, %v3959_v38  ;;  %v3964_v25 = vpop.permute.xlu0 %3963  ;;  %v4081_v29 = vadd.f32 %v4048_v53, %v4047_v37 }
 0xc02   : > { %v8438_v15 = vsub.f32 %v3911_v58, %v3964_v25  ;;  %v8440_v45 = vsub.f32 %v3912_v11, %v3964_v25  ;;  %v4087_v54 = vadd.f32 %v4052_v9, %v4051_v43  ;;  %v3921_v9 = vld [vmem:[#allocation5 + $0xb0] sm:$0xff]  ;;  %v3922_v25 = vld [vmem:[#allocation5 + $0xb8] sm:$0xff] }
 0xc03   : > { %v4053_v0 = vmul.f32 %v8434_v5, %v8434_v5  ;;  %v4054_v39 = vmul.f32 %v8436_v50, %v8436_v50 }
 0xc04   : > { %v3969_v41 = vpop.permute.xlu1 %3968  ;;  %4088 = vadd.xlane.f32.xlu1 %v4087_v54  ;;  %4082 = vadd.xlane.f32.xlu0 %v4081_v29  ;;  %v4055_v28 = vmul.f32 %v8438_v15, %v8438_v15  ;;  %v4056_v7 = vmul.f32 %v8440_v45, %v8440_v45 }
 0xc05   : > { %v8450_v60 = vsub.f32 %v3913_v16, %v3969_v41  ;;  %v8452_v30 = vsub.f32 %v3914_v10, %v3969_v41  ;;  %v3974_v51 = vpop.permute.xlu0 %3973  ;;  %v4090_v61 = vadd.f32 %v4054_v39, %v4053_v0  ;;  %v3923_v16 = vld [vmem:[#allocation5 + $0xc0] sm:$0xff]  ;;  %v3924_v10 = vld [vmem:[#allocation5 + $0xc8] sm:$0xff] }
 0xc06   : > { %v8454_v14 = vsub.f32 %v3915_v31, %v3974_v51  ;;  %v8456_v8 = vsub.f32 %v3916_v26, %v3974_v51  ;;  %v4093_v55 = vadd.f32 %v4056_v7, %v4055_v28 }
 0xc07   : > { %v4057_v19 = vmul.f32 %v8450_v60, %v8450_v60  ;;  %v4058_v18 = vmul.f32 %v8452_v30, %v8452_v30 }
 0xc08   : > { %v3979_v23 = vpop.permute.xlu1 %3978  ;;  %4094 = vadd.xlane.f32.xlu1 %v4093_v55  ;;  %4091 = vadd.xlane.f32.xlu0 %v4090_v61  ;;  %v4059_v56 = vmul.f32 %v8454_v14, %v8454_v14  ;;  %v4060_v36 = vmul.f32 %v8456_v8, %v8456_v8  ;;  %v3926_v55 = vld [vmem:[#allocation5 + $0xd8] sm:$0xff] }
 0xc09   : > { %v8466_v58 = vsub.f32 %v3917_v59, %v3979_v23  ;;  %v8468_v11 = vsub.f32 %v3918_v2, %v3979_v23  ;;  %v3984_v37 = vpop.permute.xlu0 %3983  ;;  %v4096_v53 = vadd.f32 %v4058_v18, %v4057_v19  ;;  %v3925_v2 = vld [vmem:[#allocation5 + $0xd0] sm:$0xff]  ;;  %v3928_v19 = vld [vmem:[#allocation5 + $0xe8] sm:$0xff] }
 0xc0a   : > { %v8470_v38 = vsub.f32 %v3919_v20, %v3984_v37  ;;  %v8472_v43 = vsub.f32 %v3920_v40, %v3984_v37  ;;  %v4099_v29 = vadd.f32 %v4060_v36, %v4059_v56  ;;  %v3927_v40 = vld [vmem:[#allocation5 + $0xe0] sm:$0xff] }
 0xc0b   : > { %v4061_v54 = vmul.f32 %v8466_v58, %v8466_v58  ;;  %v4062_v31 = vmul.f32 %v8468_v11, %v8468_v11 }
 0xc0c   : > { %v3989_v26 = vpop.permute.xlu1 %3988  ;;  %4100 = vadd.xlane.f32.xlu1 %v4099_v29  ;;  %4097 = vadd.xlane.f32.xlu0 %v4096_v53  ;;  %v4063_v0 = vmul.f32 %v8470_v38, %v8470_v38  ;;  %v4064_v39 = vmul.f32 %v8472_v43, %v8472_v43 }
 0xc0d   : > { %v8482_v41 = vsub.f32 %v3921_v9, %v3989_v26  ;;  %v8484_v28 = vsub.f32 %v3922_v25, %v3989_v26  ;;  %v3994_v7 = vpop.permute.xlu0 %3993  ;;  %v4102_v51 = vadd.f32 %v4062_v31, %v4061_v54  ;;  %v3929_v31 = vld [vmem:[#allocation5 + $0xf0] sm:$0xff]  ;;  %v3930_v26 = vld [vmem:[#allocation5 + $0xf8] sm:$0xff] }
 0xc0e   : > { %v8486_v61 = vsub.f32 %v3923_v16, %v3994_v7  ;;  %v8488_v59 = vsub.f32 %v3924_v10, %v3994_v7  ;;  %v4105_v20 = vadd.f32 %v4064_v39, %v4063_v0 }
 0xc0f   : > { %v4065_v18 = vmul.f32 %v8482_v41, %v8482_v41  ;;  %v4066_v23 = vmul.f32 %v8484_v28, %v8484_v28 }
 0xc10   : > { %v3999_v56 = vpop.permute.xlu1 %3998  ;;  %4106 = vadd.xlane.f32.xlu1 %v4105_v20  ;;  %4103 = vadd.xlane.f32.xlu0 %v4102_v51  ;;  %v4067_v36 = vmul.f32 %v8486_v61, %v8486_v61  ;;  %v4068_v37 = vmul.f32 %v8488_v59, %v8488_v59 }
 0xc11   : > { %v8498_v53 = vsub.f32 %v3925_v2, %v3999_v56  ;;  %v8500_v9 = vsub.f32 %v3926_v55, %v3999_v56  ;;  %v4004_v25 = vpop.permute.xlu0 %4003  ;;  %v4108_v29 = vadd.f32 %v4066_v23, %v4065_v18 }
 0xc12   : > { %v8502_v16 = vsub.f32 %v3927_v40, %v4004_v25  ;;  %v8504_v10 = vsub.f32 %v3928_v19, %v4004_v25  ;;  %v4111_v54 = vadd.f32 %v4068_v37, %v4067_v36  ;;  %v4429_v36 = vld [vmem:[%s8845_s5 + $0x8] sm:$0xff]  ;;  %v4431_v37 = vld [vmem:[%s8845_s5 + $0x18] sm:$0xff] }
 0xc13   : > { %8895 = vst [vmem:[#allocation19_spill] sm:$0xff] %v8498_v53  ;;  %8896 = vst [vmem:[#allocation20_spill] sm:$0xff] %v8500_v9  ;;  %v4069_v0 = vmul.f32 %v8498_v53, %v8498_v53  ;;  %v4070_v39 = vmul.f32 %v8500_v9, %v8500_v9  ;;  %v4433_v25 = vld [vmem:[%s8845_s5 + $0x28] sm:$0xff] }
 0xc14   : > { %8897 = vst [vmem:[#allocation21_spill] sm:$0xff] %v8502_v16  ;;  %8898 = vst [vmem:[#allocation22_spill] sm:$0xff] %v8504_v10  ;;  %4112 = vadd.xlane.f32.xlu1 %v4111_v54  ;;  %v4009_v7 = vpop.permute.xlu1 %4008  ;;  %4109 = vadd.xlane.f32.xlu0 %v4108_v29  ;;  %v4071_v51 = vmul.f32 %v8502_v16, %v8502_v16  ;;  %v4072_v2 = vmul.f32 %v8504_v10, %v8504_v10  ;;  %v4428_v29 = vld [vmem:[%s8845_s5] sm:$0xff]  ;;  %v4435_v54 = vld [vmem:[%s8845_s5 + $0x38] sm:$0xff] }
 0xc15   : > { %v8514_v55 = vsub.f32 %v3929_v31, %v4009_v7  ;;  %v8516_v20 = vsub.f32 %v3930_v26, %v4009_v7  ;;  %v4114_v40 = vadd.f32 %v4070_v39, %v4069_v0  ;;  %v4430_v31 = vld [vmem:[%s8845_s5 + $0x10] sm:$0xff]  ;;  %v4437_v26 = vld [vmem:[%s8845_s5 + $0x48] sm:$0xff]  ;;  %v4432_v0 = vld [vmem:[%s8845_s5 + $0x20] sm:$0xff] }
 0xc16   : > { %v4117_v19 = vadd.f32 %v4072_v2, %v4071_v51  ;;  %v4439_v39 = vld [vmem:[%s8845_s5 + $0x58] sm:$0xff]  ;;  %v4434_v7 = vld [vmem:[%s8845_s5 + $0x30] sm:$0xff]  ;;  %v4441_v51 = vld [vmem:[%s8845_s5 + $0x68] sm:$0xff] }
 0xc17   : > { %8899 = vst [vmem:[#allocation23_spill] sm:$0xff] %v8514_v55  ;;  %8900 = vst [vmem:[#allocation24_spill] sm:$0xff] %v8516_v20  ;;  %v4073_v18 = vmul.f32 %v8514_v55, %v8514_v55  ;;  %v4074_v23 = vmul.f32 %v8516_v20, %v8516_v20  ;;  %v4436_v2 = vld [vmem:[%s8845_s5 + $0x40] sm:$0xff] }
 0xc18   : > { %4115 = vadd.xlane.f32.xlu0 %v4114_v40  ;;  %4118 = vadd.xlane.f32.xlu1 %v4117_v19  ;;  %v4443_v40 = vld [vmem:[%s8845_s5 + $0x78] sm:$0xff]  ;;  %v4438_v19 = vld [vmem:[%s8845_s5 + $0x50] sm:$0xff] }
 0xc19   : > { %v4120_v56 = vadd.f32 %v4074_v23, %v4073_v18  ;;  %v4557_v18 = vld [vmem:[%s8846_s6 + $0x8] sm:$0xff]  ;;  %v4440_v23 = vld [vmem:[%s8845_s5 + $0x60] sm:$0xff] }
 0xc1c   : > { %4121 = vadd.xlane.f32.xlu0 %v4120_v56  ;;  %v4559_v56 = vld [vmem:[%s8846_s6 + $0x18] sm:$0xff] }
 0xc29   : > { %4451 = vperm.xlu1 %6098, %v4429_v36   ;;  %v4442_v36 = vld [vmem:[%s8845_s5 + $0x70] sm:$0xff] }
 0xc2d   : > { %4461 = vperm.xlu1 %6098, %v4431_v37   ;;  %v4561_v37 = vld [vmem:[%s8846_s6 + $0x28] sm:$0xff] }
 0xc31   : > { %4471 = vperm.xlu1 %6098, %v4433_v25   ;;  %v4556_v25 = vld [vmem:[%s8846_s6] sm:$0xff] }
 0xc32   : > { %4446 = vperm.xlu0 %6097, %v4428_v29   ;;  %v4563_v29 = vld [vmem:[%s8846_s6 + $0x38] sm:$0xff] }
 0xc35   : > { %4481 = vperm.xlu1 %6098, %v4435_v54   ;;  %v4558_v54 = vld [vmem:[%s8846_s6 + $0x10] sm:$0xff] }
 0xc36   : > { %4456 = vperm.xlu0 %6097, %v4430_v31   ;;  %v4565_v31 = vld [vmem:[%s8846_s6 + $0x48] sm:$0xff] }
 0xc39   : > { %4491 = vperm.xlu1 %6098, %v4437_v26   ;;  %v4560_v26 = vld [vmem:[%s8846_s6 + $0x20] sm:$0xff] }
 0xc3a   : > { %4466 = vperm.xlu0 %6097, %v4432_v0   ;;  %v4567_v0 = vld [vmem:[%s8846_s6 + $0x58] sm:$0xff] }
 0xc3d   : > { %4501 = vperm.xlu1 %6098, %v4439_v39   ;;  %v4562_v39 = vld [vmem:[%s8846_s6 + $0x30] sm:$0xff] }
 0xc3e   : > { %4476 = vperm.xlu0 %6097, %v4434_v7   ;;  %v4569_v7 = vld [vmem:[%s8846_s6 + $0x68] sm:$0xff] }
 0xc41   : > { %4511 = vperm.xlu1 %6098, %v4441_v51   ;;  %v4564_v51 = vld [vmem:[%s8846_s6 + $0x40] sm:$0xff] }
 0xc42   : > { %4486 = vperm.xlu0 %6097, %v4436_v2   ;;  %v4566_v2 = vld [vmem:[%s8846_s6 + $0x50] sm:$0xff] }
 0xc45   : > { %4521 = vperm.xlu1 %6098, %v4443_v40   ;;  %v4568_v40 = vld [vmem:[%s8846_s6 + $0x60] sm:$0xff] }
 0xc46   : > { %4496 = vperm.xlu0 %6097, %v4438_v19  }
 0xc49   : > { %4579 = vperm.xlu1 %6098, %v4557_v18  }
 0xc4a   : > { %4506 = vperm.xlu0 %6097, %v4440_v23  }
 0xc4d   : > { %4589 = vperm.xlu1 %6098, %v4559_v56  }
 0xc4e   : > { %4516 = vperm.xlu0 %6097, %v4442_v36  }
 0xc51   : > { %4599 = vperm.xlu1 %6098, %v4561_v37  }
 0xc52   : > { %4574 = vperm.xlu0 %6097, %v4556_v25  }
 0xc55   : > { %4609 = vperm.xlu1 %6098, %v4563_v29  }
 0xc56   : > { %4584 = vperm.xlu0 %6097, %v4558_v54  }
 0xc59   : > { %4619 = vperm.xlu1 %6098, %v4565_v31  }
 0xc5a   : > { %4594 = vperm.xlu0 %6097, %v4560_v26  }
 0xc5d   : > { %4629 = vperm.xlu1 %6098, %v4567_v0  }
 0xc5e   : > { %4604 = vperm.xlu0 %6097, %v4562_v39  }
 0xc61   : > { %4639 = vperm.xlu1 %6098, %v4569_v7  }
 0xc62   : > { %4614 = vperm.xlu0 %6097, %v4564_v51  }
 0xc66   : > { %4624 = vperm.xlu0 %6097, %v4566_v2  }
 0xc6a   : > { %4634 = vperm.xlu0 %6097, %v4568_v40  }
 0xc89   : > { %v4077_v19 = vpop.xlane.xlu0 %4076 }
 0xc8d   : > { %v4080_v18 = vpop.xlane.xlu1 %4079  ;;  %v4086_v23 = vpop.xlane.xlu0 %4085 }
 0xc8e   : > { %v5524_v56 = vpack.c.bf16 %v4080_v18, %v4077_v19 }
 0xc90   : > { %5525 = vmatprep.subr.bf16.mxu1 %v5524_v56 }
 0xc91   : > { %v4089_v36 = vpop.xlane.xlu1 %4088  ;;  %5527 = vmatpush3.bf16.msra.mxu1 %v5524_v56  ;;  %v4083_v37 = vpop.xlane.xlu0 %4082 }
 0xc92   : > { %v5528_v25 = vpack.c.bf16 %v4086_v23, %v4083_v37 }
 0xc94   : > { %5529 = vmatprep.subr.bf16.mxu1 %v5528_v25 }
 0xc95   : > { %v4095_v29 = vpop.xlane.xlu1 %4094  ;;  %5531 = vmatpush3.bf16.msra.mxu1 %v5528_v25  ;;  %v4092_v54 = vpop.xlane.xlu0 %4091 }
 0xc96   : > { %v5532_v31 = vpack.c.bf16 %v4092_v54, %v4089_v36 }
 0xc98   : > { %5533 = vmatprep.subr.bf16.mxu1 %v5532_v31 }
 0xc99   : > { %v4101_v26 = vpop.xlane.xlu1 %4100  ;;  %5535 = vmatpush3.bf16.msra.mxu1 %v5532_v31  ;;  %v4098_v0 = vpop.xlane.xlu0 %4097 }
 0xc9a   : > { %v5536_v39 = vpack.c.bf16 %v4098_v0, %v4095_v29 }
 0xc9c   : > { %5537 = vmatprep.subr.bf16.mxu1 %v5536_v39 }
 0xc9d   : > { %v4107_v7 = vpop.xlane.xlu1 %4106  ;;  %5539 = vmatpush3.bf16.msra.mxu1 %v5536_v39  ;;  %v4104_v51 = vpop.xlane.xlu0 %4103 }
 0xc9e   : > { %v5540_v2 = vpack.c.bf16 %v4104_v51, %v4101_v26 }
 0xca0   : > { %5541 = vmatprep.subr.bf16.mxu1 %v5540_v2 }
 0xca1   : > { %5543 = vmatpush3.bf16.msra.mxu1 %v5540_v2  ;;  %v4110_v40 = vpop.xlane.xlu0 %4109  ;;  %v4113_v18 = vpop.xlane.xlu1 %4112 }
 0xca2   : > { %v5544_v19 = vpack.c.bf16 %v4110_v40, %v4107_v7 }
 0xca4   : > { %5545 = vmatprep.subr.bf16.mxu1 %v5544_v19 }
 0xca5   : > { %5547 = vmatpush3.bf16.msra.mxu1 %v5544_v19  ;;  %v4116_v23 = vpop.xlane.xlu0 %4115  ;;  %v4119_v36 = vpop.xlane.xlu1 %4118 }
 0xca6   : > { %v5548_v56 = vpack.c.bf16 %v4116_v23, %v4113_v18 }
 0xca8   : > { %5549 = vmatprep.subr.bf16.mxu1 %v5548_v56 }
 0xca9   : > { %5551 = vmatpush3.bf16.msra.mxu1 %v5548_v56  ;;  %v4122_v37 = vpop.xlane.xlu0 %4121 }
 0xcaa   : > { %v5552_v25 = vpack.c.bf16 %v4122_v37, %v4119_v36 }
 0xcac   : > { %5553 = vmatprep.subr.bf16.mxu1 %v5552_v25 }
 0xcad   : > { %5555 = vmatpush3.bf16.msra.mxu1 %v5552_v25 }
 0xcb0   : > { %5469 = vmatmul.mubr.f32.vlgmr.msra.gmra.mrb[0].mxu1 %v8349_v34 }
 0xcb1   : > { %5471 = vmatprep.mubr.f32.mxu1 %v8351_v35 }
 0xcb4   : > { %5472 = vmatmul.mubr.f32.gmra.mrb[2].mxu1 %v8355_v22 }
 0xcb5   : > { %5474 = vmatprep.mubr.f32.mxu1 %v8357_v24 }
 0xcb8   : > { %5475 = vmatmul.mubr.f32.gmra.mrb[4].mxu1 %v8361_v52 }
 0xcb9   : > { %5477 = vmatprep.mubr.f32.mxu1 %v8363_v33 }
 0xcbc   : > { %5478 = vmatmul.mubr.f32.gmra.mrb[6].mxu1 %v8367_v3 }
 0xcbd   : > { %5480 = vmatprep.mubr.f32.mxu1 %v8369_v42 }
 0xcc0   : > { %5481 = vmatmul.mubr.f32.gmra.mrb[8].mxu1 %v8373_v32 }
 0xcc1   : > { %5483 = vmatprep.mubr.f32.mxu1 %v8375_v21 }
 0xcc4   : > { %5484 = vmatmul.mubr.f32.gmra.mrb[10].mxu1 %v8379_v49 }
 0xcc5   : > { %5486 = vmatprep.mubr.f32.mxu1 %v8381_v48 }
 0xcc8   : > { %5487 = vmatmul.mubr.f32.gmra.mrb[12].mxu1 %v8385_v57 }
 0xcc9   : > { %5489 = vmatprep.mubr.f32.mxu1 %v8387_v62 }
 0xccc   : > { %5490 = vmatmul.mubr.f32.gmra.mrb[14].mxu1 %v8391_v47 }
 0xd83   : > { %v5470_v34 = vpop.f32.mrb[0].mxu1 }
 0xd84   : > { %v4269_v35 = vmul.f32 0.0009765625, %v5470_v34  ;;  %v4189_v22 = vpop.f32.mrb[1].mxu1 }
 0xd85   : > { %v4268_v24 = vmul.f32 0.0009765625, %v4189_v22 }
 0xd86   : > { %v4285_v52 = vadd.f32 1e-05, %v4269_v35 }
 0xd87   : > { %v4284_v33 = vadd.f32 1e-05, %v4268_v24  ;;  %v5473_v3 = vpop.f32.mrb[2].mxu1 }
 0xd88   : > { %6099 = vrsqrt.f32 %v4285_v52  ;;  %v4271_v42 = vmul.f32 0.0009765625, %v5473_v3  ;;  %v4199_v32 = vpop.f32.mrb[3].mxu1 }
 0xd89   : > { %6101 = vrsqrt.f32 %v4284_v33  ;;  %v4270_v21 = vmul.f32 0.0009765625, %v4199_v32 }
 0xd8a   : > { %v4287_v49 = vadd.f32 1e-05, %v4271_v42 }
 0xd8b   : > { %v5476_v48 = vpop.f32.mrb[4].mxu1  ;;  %v4286_v57 = vadd.f32 1e-05, %v4270_v21 }
 0xd8c   : > { %6103 = vrsqrt.f32 %v4287_v49  ;;  %v4273_v29 = vmul.f32 0.0009765625, %v5476_v48  ;;  %v4209_v62 = vpop.f32.mrb[5].mxu1 }
 0xd8d   : > { %v4272_v54 = vmul.f32 0.0009765625, %v4209_v62  ;;  %6105 = vrsqrt.f32 %v4286_v57 }
 0xd8e   : > { %v4289_v47 = vadd.f32 1e-05, %v4273_v29 }
 0xd8f   : > { %v4288_v31 = vadd.f32 1e-05, %v4272_v54  ;;  %v5479_v26 = vpop.f32.mrb[6].mxu1 }
 0xd90   : > { %v4275_v0 = vmul.f32 0.0009765625, %v5479_v26  ;;  %v4219_v39 = vpop.f32.mrb[7].mxu1 }
 0xd91   : > { %6107 = vrsqrt.f32 %v4288_v31  ;;  %v4274_v7 = vmul.f32 0.0009765625, %v4219_v39 }
 0xd92   : > { %v6100_v51 = vpop.eup %6099  ;;  %6109 = vrsqrt.f32 %v4289_v47  ;;  %v4291_v40 = vadd.f32 1e-05, %v4275_v0 }
 0xd93   : > { %v6102_v2 = vpop.eup %6101  ;;  %v4290_v19 = vadd.f32 1e-05, %v4274_v7  ;;  %4323 = vperm.xlu0 %6097, %v6100_v51   ;;  %v5482_v18 = vpop.f32.mrb[8].mxu1 }
 0xd94   : > { %v4277_v23 = vmul.f32 0.0009765625, %v5482_v18  ;;  %4318 = vperm.xlu1 %6098, %v6102_v2   ;;  %v4229_v56 = vpop.f32.mrb[9].mxu1 }
 0xd95   : > { %6111 = vrsqrt.f32 %v4290_v19  ;;  %v4276_v36 = vmul.f32 0.0009765625, %v4229_v56 }
 0xd96   : > { %v6104_v37 = vpop.eup %6103  ;;  %6113 = vrsqrt.f32 %v4291_v40  ;;  %v4293_v25 = vadd.f32 1e-05, %v4277_v23 }
 0xd97   : > { %v4292_v34 = vadd.f32 1e-05, %v4276_v36  ;;  %v5485_v35 = vpop.f32.mrb[10].mxu1  ;;  %v6106_v33 = vpop.eup %6105 }
 0xd98   : > { %v4279_v22 = vmul.f32 0.0009765625, %v5485_v35  ;;  %4333 = vperm.xlu1 %6098, %v6104_v37   ;;  %v4239_v24 = vpop.f32.mrb[11].mxu1  ;;  %v4571_v35 = vld [vmem:[%s8846_s6 + $0x78] sm:$0xff] }
 0xd99   : > { %6115 = vrsqrt.f32 %v4292_v34  ;;  %v4278_v52 = vmul.f32 0.0009765625, %v4239_v24  ;;  %v4570_v34 = vld [vmem:[%s8846_s6 + $0x70] sm:$0xff]  ;;  %v4452_v24 = vpop.permute.xlu1 %4451 }
 0xd9a   : > { %6117 = vrsqrt.f32 %v4293_v25  ;;  %v4295_v42 = vadd.f32 1e-05, %v4279_v22  ;;  %v4447_v22 = vpop.permute.xlu0 %4446 }
 0xd9b   : > { %v6108_v3 = vpop.eup %6107  ;;  %v4294_v32 = vadd.f32 1e-05, %v4278_v52  ;;  %v5488_v21 = vpop.f32.mrb[12].mxu1 }
 0xd9c   : > { %v4281_v49 = vmul.f32 0.0009765625, %v5488_v21  ;;  %4328 = vperm.xlu1 %6098, %v6106_v33   ;;  %4338 = vperm.xlu0 %6097, %v6108_v3   ;;  %v4249_v48 = vpop.f32.mrb[13].mxu1  ;;  %v6110_v57 = vpop.eup %6109 }
 0xd9d   : > { %6119 = vrsqrt.f32 %v4294_v32  ;;  %v4280_v29 = vmul.f32 0.0009765625, %v4249_v48  ;;  %v4462_v33 = vpop.permute.xlu1 %4461 }
 0xd9e   : > { %6121 = vrsqrt.f32 %v4295_v42  ;;  %v4297_v54 = vadd.f32 1e-05, %v4281_v49  ;;  %v4457_v52 = vpop.permute.xlu0 %4456 }
 0xd9f   : > { %v6112_v62 = vpop.eup %6111  ;;  %v4296_v47 = vadd.f32 1e-05, %v4280_v29  ;;  %v5491_v31 = vpop.f32.mrb[14].mxu1 }
 0xda0   : > { %v4283_v26 = vmul.f32 0.0009765625, %v5491_v31  ;;  %4343 = vperm.xlu1 %6098, %v6110_v57   ;;  %4348 = vperm.xlu0 %6097, %v6112_v62   ;;  %v4259_v0 = vpop.f32.mrb[15].mxu1  ;;  %v6114_v39 = vpop.eup %6113 }
 0xda1   : > { %6123 = vrsqrt.f32 %v4296_v47  ;;  %v4282_v7 = vmul.f32 0.0009765625, %v4259_v0  ;;  %v8633_v42 = vpop.permute.xlu1 %4471 }
 0xda2   : > { %6125 = vrsqrt.f32 %v4297_v54  ;;  %v4299_v2 = vadd.f32 1e-05, %v4283_v26  ;;  %v4467_v3 = vpop.permute.xlu0 %4466 }
 0xda3   : > { %v6116_v51 = vpop.eup %6115  ;;  %v4298_v40 = vadd.f32 1e-05, %v4282_v7 }
 0xda4   : > { %4353 = vperm.xlu1 %6098, %v6114_v39   ;;  %4358 = vperm.xlu0 %6097, %v6116_v51   ;;  %v6118_v19 = vpop.eup %6117 }
 0xda5   : > { %6127 = vrsqrt.f32 %v4298_v40  ;;  %v8637_v21 = vpop.permute.xlu1 %4481 }
 0xda6   : > { %6129 = vrsqrt.f32 %v4299_v2  ;;  %v8635_v32 = vpop.permute.xlu0 %4476 }
 0xda7   : > { %v6120_v18 = vpop.eup %6119 }
 0xda8   : > { %4363 = vperm.xlu1 %6098, %v6118_v19   ;;  %4368 = vperm.xlu0 %6097, %v6120_v18   ;;  %v6122_v23 = vpop.eup %6121 }
 0xda9   : > { %v8641_v48 = vpop.permute.xlu1 %4491 }
 0xdaa   : > { %v8639_v49 = vpop.permute.xlu0 %4486 }
 0xdab   : > { %v6124_v56 = vpop.eup %6123 }
 0xdac   : > { %4373 = vperm.xlu1 %6098, %v6122_v23   ;;  %4378 = vperm.xlu0 %6097, %v6124_v56   ;;  %v6126_v36 = vpop.eup %6125 }
 0xdad   : > { %v8645_v29 = vpop.permute.xlu1 %4501 }
 0xdae   : > { %v8643_v57 = vpop.permute.xlu0 %4496 }
 0xdaf   : > { %v6128_v37 = vpop.eup %6127 }
 0xdb0   : > { %4383 = vperm.xlu1 %6098, %v6126_v36   ;;  %4388 = vperm.xlu0 %6097, %v6128_v37   ;;  %v6130_v25 = vpop.eup %6129 }
 0xdb1   : > { %v8649_v54 = vpop.permute.xlu1 %4511 }
 0xdb2   : > { %v8647_v62 = vpop.permute.xlu0 %4506  ;;  %8902 = vst [vmem:[#allocation26_spill] sm:$0xff] %v8649_v54 }
 0xdb3   : > { %8901 = vst [vmem:[#allocation25_spill] sm:$0xff] %v8647_v62 }
 0xdb4   : > { %4393 = vperm.xlu1 %6098, %v6130_v25   ;;  %4644 = vperm.xlu0 %6097, %v4570_v34  }
 0xdb5   : > { %v8653_v31 = vpop.permute.xlu1 %4521 }
 0xdb6   : > { %v8651_v47 = vpop.permute.xlu0 %4516  ;;  %8904 = vst [vmem:[#allocation28_spill] sm:$0xff] %v8653_v31 }
 0xdb7   : > { %8903 = vst [vmem:[#allocation27_spill] sm:$0xff] %v8651_v47 }
 0xdb8   : > { %4649 = vperm.xlu1 %6098, %v4571_v35  }
 0xdb9   : > { %v4580_v0 = vpop.permute.xlu1 %4579 }
 0xdba   : > { %v4575_v26 = vpop.permute.xlu0 %4574 }
 0xdbd   : > { %v4590_v7 = vpop.permute.xlu1 %4589 }
 0xdbe   : > { %v4585_v39 = vpop.permute.xlu0 %4584 }
 0xdc1   : > { %v8655_v2 = vpop.permute.xlu1 %4599 }
 0xdc2   : > { %v4595_v51 = vpop.permute.xlu0 %4594 }
 0xdc5   : > { %v8659_v19 = vpop.permute.xlu1 %4609 }
 0xdc6   : > { %v8657_v40 = vpop.permute.xlu0 %4604 }
 0xdc9   : > { %v8663_v23 = vpop.permute.xlu1 %4619 }
 0xdca   : > { %v8661_v18 = vpop.permute.xlu0 %4614 }
 0xdcd   : > { %v8667_v36 = vpop.permute.xlu1 %4629 }
 0xdce   : > { %v8665_v56 = vpop.permute.xlu0 %4624  ;;  %8905 = vst [vmem:[#allocation29_spill] sm:$0xff] %v8667_v36 }
 0xdd1   : > { %v8671_v25 = vpop.permute.xlu1 %4639 }
 0xdd2   : > { %v8669_v37 = vpop.permute.xlu0 %4634  ;;  %8907 = vst [vmem:[#allocation31_spill] sm:$0xff] %v8671_v25 }
 0xdd3   : > { %8906 = vst [vmem:[#allocation30_spill] sm:$0xff] %v8669_v37 }
 0xe12   : > { %v4324_v34 = vpop.permute.xlu0 %4323 }
 0xe13   : > { %v4398_v35 = vmul.f32 %v4324_v34, %v8406_v46  ;;  %v4399_v31 = vmul.f32 %v4324_v34, %v8408_v4  ;;  %v4319_v20 = vpop.permute.xlu1 %4318 }
 0xe14   : > { %v4396_v55 = vmul.f32 %v4319_v20, %v8394_v1  ;;  %v4397_v47 = vmul.f32 %v4319_v20, %v8396_v17 }
 0xe15   : > { %v4526_v54 = vmul.f32 %v4452_v24, %v4398_v35  ;;  %v4527_v10 = vmul.f32 %v4452_v24, %v4399_v31 }
 0xe16   : > { %v4524_v16 = vmul.f32 %v4447_v22, %v4396_v55  ;;  %v4525_v37 = vmul.f32 %v4447_v22, %v4397_v47 }
 0xe17   : > { %v4654_v9 = vadd.f32 %v4580_v0, %v4526_v54  ;;  %v4655_v25 = vadd.f32 %v4580_v0, %v4527_v10  ;;  %v4334_v53 = vpop.permute.xlu1 %4333 }
 0xe18   : > { %v4652_v36 = vadd.f32 %v4575_v26, %v4524_v16  ;;  %v4653_v46 = vadd.f32 %v4575_v26, %v4525_v37  ;;  %v4402_v62 = vmul.f32 %v4334_v53, %v8402_v27  ;;  %v4403_v4 = vmul.f32 %v4334_v53, %v8404_v13 }
 0xe19   : > { %4686 = vst [vmem:[%s6434_s15 + $0x10] sm:$0xff] %v4654_v9  ;;  %4687 = vst [vmem:[%s6434_s15 + $0x18] sm:$0xff] %v4655_v25 }
 0xe1a   : > { %4684 = vst [vmem:[%s6434_s15] sm:$0xff] %v4652_v36  ;;  %4685 = vst [vmem:[%s6434_s15 + $0x8] sm:$0xff] %v4653_v46  ;;  %v4530_v1 = vmul.f32 %v4462_v33, %v4402_v62  ;;  %v4531_v17 = vmul.f32 %v4462_v33, %v4403_v4 }
 0xe1b   : > { %v4329_v20 = vpop.permute.xlu1 %4328  ;;  %v4339_v55 = vpop.permute.xlu0 %4338 }
 0xe1c   : > { %v4658_v22 = vadd.f32 %v4590_v7, %v4530_v1  ;;  %v4659_v24 = vadd.f32 %v4590_v7, %v4531_v17  ;;  %v4400_v10 = vmul.f32 %v4329_v20, %v8418_v6  ;;  %v4401_v16 = vmul.f32 %v4329_v20, %v8420_v12 }
 0xe1d   : > { %v4404_v27 = vmul.f32 %v4339_v55, %v8422_v44  ;;  %v4405_v54 = vmul.f32 %v4339_v55, %v8424_v63 }
 0xe1e   : > { %4690 = vst [vmem:[%s6434_s15 + $0x30] sm:$0xff] %v4658_v22  ;;  %4691 = vst [vmem:[%s6434_s15 + $0x38] sm:$0xff] %v4659_v24  ;;  %v4528_v13 = vmul.f32 %v4457_v52, %v4400_v10  ;;  %v4529_v53 = vmul.f32 %v4457_v52, %v4401_v16 }
 0xe1f   : > { %v4532_v9 = vmul.f32 %v4467_v3, %v4404_v27  ;;  %v4533_v33 = vmul.f32 %v4467_v3, %v4405_v54  ;;  %v4344_v62 = vpop.permute.xlu1 %4343  ;;  %v4349_v47 = vpop.permute.xlu0 %4348 }
 0xe20   : > { %v4656_v31 = vadd.f32 %v4585_v39, %v4528_v13  ;;  %v4657_v6 = vadd.f32 %v4585_v39, %v4529_v53  ;;  %v4406_v12 = vmul.f32 %v4344_v62, %v8434_v5  ;;  %v4407_v44 = vmul.f32 %v4344_v62, %v8436_v50  ;;  %v8909_v53 = vld [vmem:[#allocation29_spill] sm:$0xff] }
 0xe21   : > { %v4660_v26 = vadd.f32 %v4595_v51, %v4532_v9  ;;  %v4661_v63 = vadd.f32 %v4595_v51, %v4533_v33  ;;  %v4408_v0 = vmul.f32 %v4349_v47, %v8438_v15  ;;  %v4409_v7 = vmul.f32 %v4349_v47, %v8440_v45  ;;  %v8910_v33 = vld [vmem:[#allocation19_spill] sm:$0xff]  ;;  %v8911_v47 = vld [vmem:[#allocation20_spill] sm:$0xff] }
 0xe22   : > { %4688 = vst [vmem:[%s6434_s15 + $0x20] sm:$0xff] %v4656_v31  ;;  %4689 = vst [vmem:[%s6434_s15 + $0x28] sm:$0xff] %v4657_v6  ;;  %v4534_v52 = vmul.f32 %v8633_v42, %v4406_v12  ;;  %v4535_v3 = vmul.f32 %v8633_v42, %v4407_v44  ;;  %v8913_v44 = vld [vmem:[#allocation21_spill] sm:$0xff] }
 0xe23   : > { %4692 = vst [vmem:[%s6434_s15 + $0x40] sm:$0xff] %v4660_v26  ;;  %4693 = vst [vmem:[%s6434_s15 + $0x48] sm:$0xff] %v4661_v63  ;;  %v4536_v5 = vmul.f32 %v8635_v32, %v4408_v0  ;;  %v4537_v50 = vmul.f32 %v8635_v32, %v4409_v7  ;;  %v4354_v39 = vpop.permute.xlu1 %4353  ;;  %v4359_v15 = vpop.permute.xlu0 %4358  ;;  %v8914_v63 = vld [vmem:[#allocation22_spill] sm:$0xff] }
 0xe24   : > { %v4662_v45 = vadd.f32 %v8655_v2, %v4534_v52  ;;  %v4663_v51 = vadd.f32 %v8655_v2, %v4535_v3  ;;  %v4410_v36 = vmul.f32 %v4354_v39, %v8450_v60  ;;  %v4411_v37 = vmul.f32 %v4354_v39, %v8452_v30  ;;  %v8915_v7 = vld [vmem:[#allocation26_spill] sm:$0xff] }
 0xe25   : > { %v4664_v42 = vadd.f32 %v8657_v40, %v4536_v5  ;;  %v4665_v25 = vadd.f32 %v8657_v40, %v4537_v50  ;;  %v4412_v34 = vmul.f32 %v4359_v15, %v8454_v14  ;;  %v4413_v35 = vmul.f32 %v4359_v15, %v8456_v8  ;;  %v8916_v50 = vld [vmem:[#allocation27_spill] sm:$0xff] }
 0xe26   : > { %4694 = vst [vmem:[%s6434_s15 + $0x50] sm:$0xff] %v4662_v45  ;;  %4695 = vst [vmem:[%s6434_s15 + $0x58] sm:$0xff] %v4663_v51  ;;  %v4538_v32 = vmul.f32 %v8637_v21, %v4410_v36  ;;  %v4539_v46 = vmul.f32 %v8637_v21, %v4411_v37  ;;  %v8917_v51 = vld [vmem:[#allocation31_spill] sm:$0xff] }
 0xe27   : > { %4696 = vst [vmem:[%s6434_s15 + $0x60] sm:$0xff] %v4664_v42  ;;  %4697 = vst [vmem:[%s6434_s15 + $0x68] sm:$0xff] %v4665_v25  ;;  %v4540_v60 = vmul.f32 %v8639_v49, %v4412_v34  ;;  %v4541_v30 = vmul.f32 %v8639_v49, %v4413_v35  ;;  %v4364_v2 = vpop.permute.xlu1 %4363  ;;  %v4369_v14 = vpop.permute.xlu0 %4368  ;;  %v8918_v42 = vld [vmem:[#allocation23_spill] sm:$0xff]  ;;  %v8919_v34 = vld [vmem:[#allocation24_spill] sm:$0xff] }
 0xe28   : > { %v4666_v8 = vadd.f32 %v8659_v19, %v4538_v32  ;;  %v4667_v40 = vadd.f32 %v8659_v19, %v4539_v46  ;;  %v4414_v4 = vmul.f32 %v4364_v2, %v8466_v58  ;;  %v4415_v1 = vmul.f32 %v4364_v2, %v8468_v11 }
 0xe29   : > { %v4668_v21 = vadd.f32 %v8661_v18, %v4540_v60  ;;  %v4669_v17 = vadd.f32 %v8661_v18, %v4541_v30  ;;  %v4416_v20 = vmul.f32 %v4369_v14, %v8470_v38  ;;  %v4417_v55 = vmul.f32 %v4369_v14, %v8472_v43  ;;  %v8920_v60 = vld [vmem:[#allocation28_spill] sm:$0xff] }
 0xe2a   : > { %4698 = vst [vmem:[%s6434_s15 + $0x70] sm:$0xff] %v4666_v8  ;;  %4699 = vst [vmem:[%s6434_s15 + $0x78] sm:$0xff] %v4667_v40  ;;  %v4542_v49 = vmul.f32 %v8641_v48, %v4414_v4  ;;  %v4543_v22 = vmul.f32 %v8641_v48, %v4415_v1 }
 0xe2b   : > { %4700 = vst [vmem:[%s6434_s15 + $0x80] sm:$0xff] %v4668_v21  ;;  %4701 = vst [vmem:[%s6434_s15 + $0x88] sm:$0xff] %v4669_v17  ;;  %v4544_v58 = vmul.f32 %v8643_v57, %v4416_v20  ;;  %v4545_v11 = vmul.f32 %v8643_v57, %v4417_v55  ;;  %v4374_v19 = vpop.permute.xlu1 %4373  ;;  %v4379_v38 = vpop.permute.xlu0 %4378 }
 0xe2c   : > { %v4670_v43 = vadd.f32 %v8663_v23, %v4542_v49  ;;  %v4671_v18 = vadd.f32 %v8663_v23, %v4543_v22  ;;  %v4418_v24 = vmul.f32 %v4374_v19, %v8482_v41  ;;  %v4419_v10 = vmul.f32 %v4374_v19, %v8484_v28  ;;  %v8908_v41 = vld [vmem:[#allocation25_spill] sm:$0xff] }
 0xe2d   : > { %v4672_v48 = vadd.f32 %v8665_v56, %v4544_v58  ;;  %v4673_v16 = vadd.f32 %v8665_v56, %v4545_v11  ;;  %v4420_v27 = vmul.f32 %v4379_v38, %v8486_v61  ;;  %v4421_v54 = vmul.f32 %v4379_v38, %v8488_v59 }
 0xe2e   : > { %4702 = vst [vmem:[%s6434_s15 + $0x90] sm:$0xff] %v4670_v43  ;;  %4703 = vst [vmem:[%s6434_s15 + $0x98] sm:$0xff] %v4671_v18  ;;  %v4546_v57 = vmul.f32 %v8645_v29, %v4418_v24  ;;  %v4547_v13 = vmul.f32 %v8645_v29, %v4419_v10  ;;  %v8912_v29 = vld [vmem:[#allocation30_spill] sm:$0xff] }
 0xe2f   : > { %4704 = vst [vmem:[%s6434_s15 + $0xa0] sm:$0xff] %v4672_v48  ;;  %4705 = vst [vmem:[%s6434_s15 + $0xa8] sm:$0xff] %v4673_v16  ;;  %v4548_v28 = vmul.f32 %v8908_v41, %v4420_v27  ;;  %v4549_v23 = vmul.f32 %v8908_v41, %v4421_v54  ;;  %v4384_v56 = vpop.permute.xlu1 %4383  ;;  %v4389_v61 = vpop.permute.xlu0 %4388 }
 0xe30   : > { %v4674_v59 = vadd.f32 %v8909_v53, %v4546_v57  ;;  %v4675_v9 = vadd.f32 %v8909_v53, %v4547_v13  ;;  %v4422_v62 = vmul.f32 %v4384_v56, %v8910_v33  ;;  %v4423_v31 = vmul.f32 %v4384_v56, %v8911_v47 }
 0xe31   : > { %v4676_v6 = vadd.f32 %v8912_v29, %v4548_v28  ;;  %v4677_v12 = vadd.f32 %v8912_v29, %v4549_v23  ;;  %v4424_v26 = vmul.f32 %v4389_v61, %v8913_v44  ;;  %v4425_v0 = vmul.f32 %v4389_v61, %v8914_v63 }
 0xe32   : > { %4706 = vst [vmem:[%s6434_s15 + $0xb0] sm:$0xff] %v4674_v59  ;;  %4707 = vst [vmem:[%s6434_s15 + $0xb8] sm:$0xff] %v4675_v9  ;;  %v4550_v52 = vmul.f32 %v8915_v7, %v4422_v62  ;;  %v4551_v3 = vmul.f32 %v8915_v7, %v4423_v31 }
 0xe33   : > { %4708 = vst [vmem:[%s6434_s15 + $0xc0] sm:$0xff] %v4676_v6  ;;  %4709 = vst [vmem:[%s6434_s15 + $0xc8] sm:$0xff] %v4677_v12  ;;  %v4394_v5 = vpop.permute.xlu1 %4393  ;;  %v4552_v39 = vmul.f32 %v8916_v50, %v4424_v26  ;;  %v4553_v15 = vmul.f32 %v8916_v50, %v4425_v0  ;;  %v4645_v45 = vpop.permute.xlu0 %4644 }
 0xe34   : > { %v4678_v36 = vadd.f32 %v8917_v51, %v4550_v52  ;;  %v4679_v37 = vadd.f32 %v8917_v51, %v4551_v3  ;;  %v4426_v25 = vmul.f32 %v4394_v5, %v8918_v42  ;;  %v4427_v35 = vmul.f32 %v4394_v5, %v8919_v34 }
 0xe35   : > { %v4680_v32 = vadd.f32 %v4645_v45, %v4552_v39  ;;  %v4681_v46 = vadd.f32 %v4645_v45, %v4553_v15 }
 0xe36   : > { %4710 = vst [vmem:[%s6434_s15 + $0xd0] sm:$0xff] %v4678_v36  ;;  %4711 = vst [vmem:[%s6434_s15 + $0xd8] sm:$0xff] %v4679_v37  ;;  %v4554_v30 = vmul.f32 %v8920_v60, %v4426_v25  ;;  %v4555_v2 = vmul.f32 %v8920_v60, %v4427_v35 }
 0xe37   : > { %4712 = vst [vmem:[%s6434_s15 + $0xe0] sm:$0xff] %v4680_v32  ;;  %4713 = vst [vmem:[%s6434_s15 + $0xe8] sm:$0xff] %v4681_v46  ;;  %v4650_v14 = vpop.permute.xlu1 %4649 }
 0xe38   : > { %v4682_v8 = vadd.f32 %v4650_v14, %v4554_v30  ;;  %v4683_v40 = vadd.f32 %v4650_v14, %v4555_v2 }
 0xe3a   : > { %4714 = vst [vmem:[%s6434_s15 + $0xf0] sm:$0xff] %v4682_v8  ;;  %4715 = vst [vmem:[%s6434_s15 + $0xf8] sm:$0xff] %v4683_v40 }
 0xe3b PF: > { %s4939_s20 = sshll.u32 %s6245_s9, 12  ;;  %s4730_s16 = sshll.u32 %s6434_s15, 4  ;;  %s8784_s16 = int_to_ptr.vmem [resolvable:$true] %s4730_s16 }
 0xe3c   : > { %s8781_s13 = scalar_lea.hbm %s8848_s8, %s4939_s20  ;;  %s8921_s26 = sand.u32 1, %s6233_s28  }
 0xe3d   : > { %s8788_s17 = scalar_lea.sflag [#allocation9], %s8921_s26  ;;  %s6159_s25 = scalar_lea.vmem %s8784_s16, 4096 }
 0xe3e   : > { %p6160_p13 = scmp.ne.s32.totalorder %s8784_s16, %s6159_s25  ;;  %p8922_p0 = scmp.ne.s32.totalorder %s8875_s18, 0 }
 0xe3f   : > { %s6269_s9 = smov [#allocation10]  }
 0xe40   : > { %p6161_p2 = pnand %p6160_p13, %p8922_p0  ;;  %s6163_s0 = sshll.u32 %s6269_s9, 4  ;;  %s6164_s0 = int_to_ptr.vmem [resolvable:$false] %s6163_s0 }
 0xe41   : > { %s6165_s22 = scalar_lea.vmem %s6164_s0, 8192  ;;  %p6166_p6 = scmp.lt.s32.totalorder %s8784_s16, %s6164_s0 }
 0xe42   : > { %p6162_p5 = pneg %p6161_p2  ;;  %p6167_p7 = scmp.lt.s32.totalorder %s6165_s22, %s6159_s25 }
 0xe44   : > { %p6168_p8 = por %p6167_p7, %p6166_p6 }
 0xe46   : > { %p6169_p11 = pnand %p6168_p8, %p6162_p5 }
 0xe48   : > { %6172 = shalt.err (!%p6169_p11)
}
 0xe49   : > { %s6173_s15 = scalar_lea.hbm %s8781_s13, 4096  ;;  %s6177_s11 = scalar_lea.hbm %s8848_s8, 8192 }
 0xe4a   : > { %p6174_p12 = scmp.ne.s32.totalorder %s8781_s13, %s6173_s15  ;;  %p6178_p3 = scmp.lt.u32.totalorder %s8781_s13, %s8848_s8 }
 0xe4b   : > { %p6179_p9 = scmp.lt.u32.totalorder %s6177_s11, %s6173_s15  ;;  %p6181_p13 = scmp.lt.u32.totalorder %s6173_s15, %s8781_s13 }
 0xe4c   : > { %p6175_p1 = pnand %p6174_p12, %p8922_p0 }
 0xe4d   : > { %p6180_p10 = por %p6179_p9, %p6178_p3 }
 0xe4e   : > { %p6176_p4 = pneg %p6175_p1 }
 0xe4f   : > { %p6182_p2 = por %p6181_p13, %p6180_p10 }
 0xe51   : > { %p6183_p5 = pnand %p6182_p2, %p6176_p4 }
 0xe53   : > { %6186 = shalt.err (!%p6183_p5)
}
 0xe54   : > { %s6270_s24 = smov 256   ;;  %s6271_s26 = smov 16  }
 0xe55   : > { %5580 = dma.vmem_to_hbm [thread:$0]  (%p8922_p0), %s8784_s16, 4096, %s8781_s13, %s8788_s17, %s6270_s24, %s6270_s24, %s6271_s26  }
 0xe56 PF: > { %p5592_p6 = scmp.ge.s32.totalorder %s6257_s12, 2  ;;  %s4745_s25 = sand.u32 1, %s6229_s27  }
 0xe57   : > { %p8923_p7 = scmp.ne.s32.totalorder %s8877_s19, 0  ;;  %s4746_s9 = scalar_lea.sflag [#allocation9], %s4745_s25 }
 0xe59   : > { %p5587_p8 = pnand %p5592_p6, %p8923_p7 }
 0xe5b   : > { %6224 = dma.done.wait (!%p5587_p8), %s4746_s9, 4096  }
 0xe5c   : > { %6226 = vsyncadd (!%p5587_p8), %s4746_s9, 4294963200  ;;  %s22_s12 = sadd.s32 1, %s6257_s12   ;;  %s8924_s9 = sld [smem:[#allocation13_spill]] }
 0xe5d   : > { %p19_p11 = scmp.ge.s32.totalorder %s22_s12, 6   ;;  %s8925_s18 = sld [smem:[#allocation14_spill]] }
 0xe5e   : > { %s8926_s11 = sld [smem:[#allocation15_spill]]  ;;  %s8927_s27 = smov %s6233_s28 }
 0xe5f   : > { %s8928_s28 = smov %s6237_s29  ;;  %s8929_s29 = smov %s6394_s23 }
 0xe60   : > { %s8930_s30 = smov %s6249_s10  ;;  %21 = sbr.rel (!%p19_p11) target bundleno = 8 (0x8), region = 103 }
 0xe63   : > { %s8931_s10 = smov %s8925_s18 }
 0xe67   :  { %4751 = vsyncpa [#allocation8], 1 }
 0xe68   :  { %4753 = vsyncpa [#allocation8 + $0x1], 1 }
 0xe69   :  { %4754 = vsyncpa [#allocation9], 1 }
 0xe6a   :  { %4756 = vsyncpa [#allocation9 + $0x1], 1 }

</bundles_post_ra>
